<compile_context>
chip_gen: v7x
topology: tpu7x:2x2x1
jax: 0.10.0
libtpu: 0.0.40
codegen_flags: <defaults>
</compile_context>

<pallas_src>
import functools

import jax
import jax.numpy as jnp
from jax.experimental import pallas as pl
from jax.experimental.pallas import tpu as pltpu


# ---------------------------------------------------------------------------
# Fused-weight builders (host side, run once at init).
# Gate order follows PyTorch nn.GRU: [r, z, n]; all weights are stored
# (input, 3H) / (H, 3H), i.e. already transposed w.r.t. torch's storage.
# Fused column layout (each block H wide): [r_f | r_b | z_f | z_b | n_f | n_b].
# ---------------------------------------------------------------------------
def _fuse_blockdiag(w_f, w_b):
    """Two (I,3H) matrices -> one (2I,6H) block matrix.

    Rows 0:I feed only the *_f gate columns, rows I:2I only the *_b columns.
    Used both for the hidden weights (rows = [h_f | h_b]) and for the encoder
    input weights (rows = [x(t) | x(T-1-t)])."""
    I, H3 = w_f.shape
    H = H3 // 3
    W = jnp.zeros((2 * I, 6 * H), jnp.float32)
    for g in range(3):                                  # r, z, n
        W = W.at[:I, (2 * g) * H:(2 * g + 1) * H].set(w_f[:, g * H:(g + 1) * H])
        W = W.at[I:, (2 * g + 1) * H:(2 * g + 2) * H].set(w_b[:, g * H:(g + 1) * H])
    return W


def _fuse_bias(b_f, b_b):
    """Two (3H,) biases -> (1, 6H) in the fused gate-major column layout."""
    H = b_f.shape[0] // 3
    parts = []
    for g in range(3):
        parts.append(b_f[g * H:(g + 1) * H])
        parts.append(b_b[g * H:(g + 1) * H])
    return jnp.concatenate(parts)[None, :].astype(jnp.float32)


def _fuse_agg_input(wih_f, wih_b, E):
    """Aggregation-GRU input weights ((2E,3H) per direction) -> (Wa1, Wa2).

    The kernel computes gi_agg[step s] = enc[s] @ Wa1 + enc_rev[s] @ Wa2 with
      enc[s]     = [f(s)     | b(T-1-s)]      (encoder fwd / bwd hiddens)
      enc_rev[s] = [f(T-1-s) | b(s)]
    Requires H == E (true here: hidden_size == emb_size)."""
    H = wih_f.shape[1] // 3
    assert wih_f.shape[0] == 2 * E and H == E
    Wa1 = jnp.zeros((2 * H, 6 * H), jnp.float32)
    Wa2 = jnp.zeros((2 * H, 6 * H), jnp.float32)
    for g in range(3):
        cf = (2 * g) * H                        # fwd-direction gate column block
        cb = (2 * g + 1) * H                    # bwd-direction gate column block
        gf = wih_f[:, g * H:(g + 1) * H]        # (2E, H)
        gb = wih_b[:, g * H:(g + 1) * H]
        Wa1 = Wa1.at[:H, cf:cf + H].set(gf[:E])     # f(s)     -> fwd gates
        Wa1 = Wa1.at[H:, cb:cb + H].set(gb[E:])     # b(T-1-s) -> bwd gates
        Wa2 = Wa2.at[:H, cb:cb + H].set(gb[:E])     # f(T-1-s) -> bwd gates
        Wa2 = Wa2.at[H:, cf:cf + H].set(gf[E:])     # b(s)     -> fwd gates
    return Wa1, Wa2


def _expand_vq(vq_w, B):
    """vq weight (hops, T) -> batch-expanded (B*hops, T*B) so the time
    contraction over a time-major (T*B, E) buffer is one matmul:
    row b*hops+h, col t*B+b  =  vq[h, t]."""
    hops, T = vq_w.shape
    VqB = jnp.zeros((B * hops, T * B), jnp.float32)
    for b in range(B):
        VqB = VqB.at[b * hops:(b + 1) * hops, b::B].set(vq_w)
    return VqB


# ---------------------------------------------------------------------------
# The fused kernel.
# ---------------------------------------------------------------------------
def _rnns_attnone_kernel(
    # scalar prefetch (SMEM)
    inp_ref,                                    # (B, T) int32 token ids
    # VMEM inputs
    emb_ref,                                    # (V, E)  embedding table
    h0_ref,                                     # (B, 2H) [enc h0_fwd | h0_bwd]
    w_enc_in_ref, b_enc_in_ref,                 # (2E, 6H), (1, 6H)
    w_enc_hh_ref, b_enc_hh_ref,                 # (2H, 6H), (1, 6H)
    wa1_ref, wa2_ref, b_agg_in_ref,             # (2H, 6H) x2, (1, 6H)
    w_agg_hh_ref, b_agg_hh_ref,                 # (2H, 6H), (1, 6H)
    wp_ref, vp_ref, vqb_ref,                    # (E,E), (E,hops), (B*hops, T*B)
    wc1f_ref, wc1b_ref, wc2_ref,                # (E,E) x3
    vc_ref, pred_ref,                           # (E, labels), (hops, C)
    # output
    out_ref,                                    # (B, C, labels)
    # scratch (VMEM)
    x2_ref,                                     # (T*B, 2E) doubled encoder input
    xatt_ref,                                   # (B*T, E)  attention, batch-major
    enc_ref, encrev_ref,                        # (T*B, 2H) enc hiddens (+reversed)
    aggf_ref, aggb_ref,                         # (T*B, E)  agg fwd/bwd, time-major
):
    B, T = inp_ref.shape
    E = emb_ref.shape[1]
    H = E
    H2 = 2 * H
    hops = vp_ref.shape[1]
    f32 = jnp.float32

    # ---- 1. embedding gather (prologue, off the recurrence chain) ---------
    # Each token row is stored to: the batch-major attention buffer, the
    # forward half of the doubled input (time t) and the backward half at the
    # mirrored time position (so both directions' gi share a row block).
    for b in range(B):
        for t in range(T):
            row = emb_ref[pl.ds(inp_ref[b, t], 1), :]               # (1, E)
            xatt_ref[b * T + t:b * T + t + 1, :] = row
            x2_ref[t * B + b:t * B + b + 1, :E] = row
            rt = T - 1 - t
            x2_ref[rt * B + b:rt * B + b + 1, E:] = row

    def fused_bigru(gi_all, h0, whh, bhh):
        """Both GRU directions in one recurrence (block-diagonal weights).

        gi_all row block s holds gi(x(s)) for the fwd gates and gi(x(T-1-s))
        for the bwd gates; h = [h_fwd | h_bwd] (B, 2H).  Returns the list of
        per-step hidden states [f(s) | b(T-1-s)]."""
        hs = []
        h = h0
        for s in range(T):                                          # unrolled
            gi = gi_all[s * B:(s + 1) * B, :]                       # (B, 6H)
            gh = jnp.dot(h, whh, preferred_element_type=f32) + bhh  # serial chain
            r = jax.nn.sigmoid(gi[:, :H2] + gh[:, :H2])
            z = jax.nn.sigmoid(gi[:, H2:2 * H2] + gh[:, H2:2 * H2])
            n = jnp.tanh(gi[:, 2 * H2:] + r * gh[:, 2 * H2:])
            h = (1.0 - z) * n + z * h
            hs.append(h)
        return hs

    # ---- 2. encoder BiGRU (hoisted input projection) -----------------------
    gi_enc = (jnp.dot(x2_ref[...], w_enc_in_ref[...], preferred_element_type=f32)
              + b_enc_in_ref[...])                                  # (T*B, 6H)
    enc_hs = fused_bigru(gi_enc, h0_ref[...], w_enc_hh_ref[...], b_enc_hh_ref[...])
    for s, h in enumerate(enc_hs):                                  # slab stores only
        enc_ref[s * B:(s + 1) * B, :] = h                           # [f(s) | b(T-1-s)]
        encrev_ref[(T - 1 - s) * B:(T - s) * B, :] = h              # time-reversed copy

    # ---- 3. aggregation BiGRU (h0 = 0, hoisted input projection) ----------
    gi_agg = (jnp.dot(enc_ref[...], wa1_ref[...], preferred_element_type=f32)
              + jnp.dot(encrev_ref[...], wa2_ref[...], preferred_element_type=f32)
              + b_agg_in_ref[...])                                  # (T*B, 6H)
    agg_hs = fused_bigru(gi_agg, jnp.zeros((B, H2), f32),
                         w_agg_hh_ref[...], b_agg_hh_ref[...])
    for s, h in enumerate(agg_hs):
        aggf_ref[s * B:(s + 1) * B, :] = h[:, :H]                   # F(s)      @ time s
        aggb_ref[(T - 1 - s) * B:(T - s) * B, :] = h[:, H:]         # Bk(T-1-s) @ time T-1-s

    # ---- 4. prediction head (matmuls batched over B, softmaxes per-b) -----
    att = xatt_ref[...]                                             # (B*T, E)
    sj_all = jnp.dot(jnp.tanh(jnp.dot(att, wp_ref[...], preferred_element_type=f32)),
                     vp_ref[...], preferred_element_type=f32)       # (B*T, hops)
    # rq = vq(agg_rep^T) for both batches in one matmul (pre-expanded vq).
    rq_f = jnp.dot(vqb_ref[...], aggf_ref[...], preferred_element_type=f32)  # (B*hops, E)
    rq_b = jnp.dot(vqb_ref[...], aggb_ref[...], preferred_element_type=f32)
    wc1_term = (jnp.dot(rq_f, wc1f_ref[...], preferred_element_type=f32)
                + jnp.dot(rq_b, wc1b_ref[...], preferred_element_type=f32))  # (B*hops, E)

    wc2 = wc2_ref[...]
    vc = vc_ref[...]
    wpred = pred_ref[...]
    for b in range(B):                                              # B=2, unrolled
        att_b = att[b * T:(b + 1) * T, :]                           # (T, E)
        sj_b = sj_all[b * T:(b + 1) * T, :]                         # (T, hops)
        p = jax.nn.softmax(sj_b.T, axis=-1)                         # (hops, T), softmax over T
        rp = jnp.dot(p, att_b, preferred_element_type=f32)          # (hops, E)
        out_b = (jnp.dot(rp, wc2, preferred_element_type=f32)
                 + wc1_term[b * hops:(b + 1) * hops, :])            # (hops, E)
        rc = jax.nn.softmax(
            jnp.dot(out_b, vc, preferred_element_type=f32).T, axis=-1)   # (labels, hops)
        pred_b = jnp.dot(rc, wpred, preferred_element_type=f32)     # (labels, C)
        out_ref[b] = jax.nn.softmax(pred_b, axis=-1).T              # (C, labels)


# ---------------------------------------------------------------------------
# Wrapper: one fused pallas_call, tiny XLA glue only for the h0 lane-concat.
# ---------------------------------------------------------------------------
def rnns_attnone_forward(params, inp, hidden):
    """inp: (B, T) int32 token ids; hidden: (2, B, E) encoder GRU h0.
    Returns (score (B, class_number, labels), None)."""
    B, T = inp.shape
    E = params["emb"].shape[1]
    H2 = 2 * E
    labels = params["vcT"].shape[1]
    C = params["predT"].shape[1]

    h0 = jnp.concatenate([hidden[0], hidden[1]], axis=-1).astype(jnp.float32)

    def fs(shape):
        nd = len(shape)

        def idx(i, inp_ref):
            return (0,) * nd

        return pl.BlockSpec(shape, idx)

    score = pl.pallas_call(
        _rnns_attnone_kernel,
        out_shape=jax.ShapeDtypeStruct((B, C, labels), jnp.float32),
        grid_spec=pltpu.PrefetchScalarGridSpec(
            num_scalar_prefetch=1,                       # token ids -> SMEM
            grid=(1,),
            in_specs=[
                fs(params["emb"].shape),
                fs((B, H2)),
                fs(params["w_enc_in"].shape), fs(params["b_enc_in"].shape),
                fs(params["w_enc_hh"].shape), fs(params["b_enc_hh"].shape),
                fs(params["wa1"].shape), fs(params["wa2"].shape),
                fs(params["b_agg_in"].shape),
                fs(params["w_agg_hh"].shape), fs(params["b_agg_hh"].shape),
                fs(params["WpT"].shape), fs(params["vpT"].shape),
                fs(params["VqB"].shape),
                fs(params["Wc1fT"].shape), fs(params["Wc1bT"].shape),
                fs(params["Wc2T"].shape),
                fs(params["vcT"].shape), fs(params["predT"].shape),
            ],
            out_specs=fs((B, C, labels)),
            scratch_shapes=[
                pltpu.VMEM((T * B, 2 * E), jnp.float32),   # doubled encoder input
                pltpu.VMEM((B * T, E), jnp.float32),       # attention (batch-major)
                pltpu.VMEM((T * B, H2), jnp.float32),      # enc hiddens (step-major)
                pltpu.VMEM((T * B, H2), jnp.float32),      # enc hiddens, time-reversed
                pltpu.VMEM((T * B, E), jnp.float32),       # agg fwd (time-major)
                pltpu.VMEM((T * B, E), jnp.float32),       # agg bwd (time-major)
            ],
        ),
        compiler_params=pltpu.CompilerParams(
            dimension_semantics=("arbitrary",)),
    )(inp.astype(jnp.int32), params["emb"], h0,
      params["w_enc_in"], params["b_enc_in"],
      params["w_enc_hh"], params["b_enc_hh"],
      params["wa1"], params["wa2"], params["b_agg_in"],
      params["w_agg_hh"], params["b_agg_hh"],
      params["WpT"], params["vpT"], params["VqB"],
      params["Wc1fT"], params["Wc1bT"], params["Wc2T"],
      params["vcT"], params["predT"])

    # drop_out / drop_att are identity in eval mode; attention output is None.
    return score, None


# ---------------------------------------------------------------------------
# Deterministic parameter initialization (already in the fused kernel layouts).
# ---------------------------------------------------------------------------
def init_params(key, vocab, E, T, hops, labels, C, B):
    keys = iter(jax.random.split(key, 40))

    def w(shape, scale=0.1):
        return (scale * jax.random.normal(next(keys), shape)).astype(jnp.float32)

    H = E
    # Per-direction GRU weights, (in, 3H) / (H, 3H), gate order [r|z|n].
    enc_wih_f, enc_wih_b = w((E, 3 * H)), w((E, 3 * H))
    enc_whh_f, enc_whh_b = w((H, 3 * H)), w((H, 3 * H))
    enc_bih_f, enc_bih_b = w((3 * H,)), w((3 * H,))
    enc_bhh_f, enc_bhh_b = w((3 * H,)), w((3 * H,))

    agg_wih_f, agg_wih_b = w((2 * E, 3 * H)), w((2 * E, 3 * H))
    agg_whh_f, agg_whh_b = w((H, 3 * H)), w((H, 3 * H))
    agg_bih_f, agg_bih_b = w((3 * H,)), w((3 * H,))
    agg_bhh_f, agg_bhh_b = w((3 * H,)), w((3 * H,))

    vq_w = w((hops, T))                         # torch Linear(text_length, hops)

    wa1, wa2 = _fuse_agg_input(agg_wih_f, agg_wih_b, E)
    return {
        "emb": w((vocab, E)),
        "w_enc_in": _fuse_blockdiag(enc_wih_f, enc_wih_b),
        "b_enc_in": _fuse_bias(enc_bih_f, enc_bih_b),
        "w_enc_hh": _fuse_blockdiag(enc_whh_f, enc_whh_b),
        "b_enc_hh": _fuse_bias(enc_bhh_f, enc_bhh_b),
        "wa1": wa1,
        "wa2": wa2,
        "b_agg_in": _fuse_bias(agg_bih_f, agg_bih_b),
        "w_agg_hh": _fuse_blockdiag(agg_whh_f, agg_whh_b),
        "b_agg_hh": _fuse_bias(agg_bhh_f, agg_bhh_b),
        # Head weights, stored pre-transposed (input-major): no in-kernel .T.
        "WpT": w((E, E)),
        "vpT": w((E, hops)),
        "VqB": _expand_vq(vq_w, B),             # batch-expanded vq contraction
        "Wc1fT": w((E, E)),
        "Wc1bT": w((E, E)),
        "Wc2T": w((E, E)),
        "vcT": w((E, labels)),
        "predT": w((hops, C)),
    }


if __name__ == "__main__":
    # config: emb_size=32, text_length=8, seperate_hops=6, labels=4,
    # class_number=3, rnn_model='BiGRU'
    B, T, E = 2, 8, 32
    hops, labels, C = 6, 4, 3
    vocab = 50

    key = jax.random.PRNGKey(0)
    pkey, ikey = jax.random.split(key)
    params = init_params(pkey, vocab, E, T, hops, labels, C, B)

    inp = jax.random.randint(ikey, (B, T), 0, vocab, dtype=jnp.int32)
    hidden = jnp.zeros((2, B, E), jnp.float32)      # init_hidden(bsz) -> zeros

    fwd = jax.jit(functools.partial(rnns_attnone_forward, params))
    score, attn = fwd(inp, hidden)
    jax.block_until_ready(score)

    assert score.shape == (B, C, labels), score.shape
    assert bool(jnp.isfinite(score).all())
    assert attn is None
    print("KERNEL_OK")
</pallas_src>

<mosaic_0001>
module attributes {stable_mosaic.version = 11 : i64} {
  func.func @_rnns_attnone_kernel(%arg0: i32, %arg1: memref<2x8xi32, #tpu.memory_space<smem>>, %arg2: memref<50x32xf32, #tpu.memory_space<vmem>>, %arg3: memref<2x64xf32, #tpu.memory_space<vmem>>, %arg4: memref<64x192xf32, #tpu.memory_space<vmem>>, %arg5: memref<1x192xf32, #tpu.memory_space<vmem>>, %arg6: memref<64x192xf32, #tpu.memory_space<vmem>>, %arg7: memref<1x192xf32, #tpu.memory_space<vmem>>, %arg8: memref<64x192xf32, #tpu.memory_space<vmem>>, %arg9: memref<64x192xf32, #tpu.memory_space<vmem>>, %arg10: memref<1x192xf32, #tpu.memory_space<vmem>>, %arg11: memref<64x192xf32, #tpu.memory_space<vmem>>, %arg12: memref<1x192xf32, #tpu.memory_space<vmem>>, %arg13: memref<32x32xf32, #tpu.memory_space<vmem>>, %arg14: memref<32x6xf32, #tpu.memory_space<vmem>>, %arg15: memref<12x16xf32, #tpu.memory_space<vmem>>, %arg16: memref<32x32xf32, #tpu.memory_space<vmem>>, %arg17: memref<32x32xf32, #tpu.memory_space<vmem>>, %arg18: memref<32x32xf32, #tpu.memory_space<vmem>>, %arg19: memref<32x4xf32, #tpu.memory_space<vmem>>, %arg20: memref<6x3xf32, #tpu.memory_space<vmem>>, %arg21: memref<2x3x4xf32, #tpu.memory_space<vmem>>, %arg22: memref<16x64xf32, #tpu.memory_space<vmem>>, %arg23: memref<16x32xf32, #tpu.memory_space<vmem>>, %arg24: memref<16x64xf32, #tpu.memory_space<vmem>>, %arg25: memref<16x64xf32, #tpu.memory_space<vmem>>, %arg26: memref<16x32xf32, #tpu.memory_space<vmem>>, %arg27: memref<16x32xf32, #tpu.memory_space<vmem>>) attributes {dimension_semantics = [#tpu.dimension_semantics<arbitrary>], iteration_bounds = array<i64: 1>, scalar_prefetch = 1 : i64, scratch_operands = 6 : i64, tpu.core_type = #tpu.core_type<tc>, window_params = [{pipeline_mode = #tpu.pipeline_mode<synchronous>, transform_indices = @transform_0, window_bounds = array<i64: 50, 32>}, {pipeline_mode = #tpu.pipeline_mode<synchronous>, transform_indices = @transform_1, window_bounds = array<i64: 2, 64>}, {pipeline_mode = #tpu.pipeline_mode<synchronous>, transform_indices = @transform_2, window_bounds = array<i64: 64, 192>}, {pipeline_mode = #tpu.pipeline_mode<synchronous>, transform_indices = @transform_3, window_bounds = array<i64: 1, 192>}, {pipeline_mode = #tpu.pipeline_mode<synchronous>, transform_indices = @transform_4, window_bounds = array<i64: 64, 192>}, {pipeline_mode = #tpu.pipeline_mode<synchronous>, transform_indices = @transform_5, window_bounds = array<i64: 1, 192>}, {pipeline_mode = #tpu.pipeline_mode<synchronous>, transform_indices = @transform_6, window_bounds = array<i64: 64, 192>}, {pipeline_mode = #tpu.pipeline_mode<synchronous>, transform_indices = @transform_7, window_bounds = array<i64: 64, 192>}, {pipeline_mode = #tpu.pipeline_mode<synchronous>, transform_indices = @transform_8, window_bounds = array<i64: 1, 192>}, {pipeline_mode = #tpu.pipeline_mode<synchronous>, transform_indices = @transform_9, window_bounds = array<i64: 64, 192>}, {pipeline_mode = #tpu.pipeline_mode<synchronous>, transform_indices = @transform_10, window_bounds = array<i64: 1, 192>}, {pipeline_mode = #tpu.pipeline_mode<synchronous>, transform_indices = @transform_11, window_bounds = array<i64: 32, 32>}, {pipeline_mode = #tpu.pipeline_mode<synchronous>, transform_indices = @transform_12, window_bounds = array<i64: 32, 6>}, {pipeline_mode = #tpu.pipeline_mode<synchronous>, transform_indices = @transform_13, window_bounds = array<i64: 12, 16>}, {pipeline_mode = #tpu.pipeline_mode<synchronous>, transform_indices = @transform_14, window_bounds = array<i64: 32, 32>}, {pipeline_mode = #tpu.pipeline_mode<synchronous>, transform_indices = @transform_15, window_bounds = array<i64: 32, 32>}, {pipeline_mode = #tpu.pipeline_mode<synchronous>, transform_indices = @transform_16, window_bounds = array<i64: 32, 32>}, {pipeline_mode = #tpu.pipeline_mode<synchronous>, transform_indices = @transform_17, window_bounds = array<i64: 32, 4>}, {pipeline_mode = #tpu.pipeline_mode<synchronous>, transform_indices = @transform_18, window_bounds = array<i64: 6, 3>}, {pipeline_mode = #tpu.pipeline_mode<synchronous>, transform_indices = @transform_19, window_bounds = array<i64: 2, 3, 4>}]} {
    %c0 = arith.constant 0 : index
    %c0_0 = arith.constant 0 : index
    %0 = memref.load %arg1[%c0, %c0_0] : memref<2x8xi32, #tpu.memory_space<smem>>
    %1 = arith.index_cast %0 : i32 to index
    %c0_1 = arith.constant 0 : index
    %2 = vector.load %arg2[%1, %c0_1] : memref<50x32xf32, #tpu.memory_space<vmem>>, vector<1x32xf32>
    %c0_2 = arith.constant 0 : index
    %c0_3 = arith.constant 0 : index
    %3 = vector.load %arg23[%c0_2, %c0_3] : memref<16x32xf32, #tpu.memory_space<vmem>>, vector<1x32xf32>
    tpu.vector_store %arg23[%c0_2, %c0_3], %2 {strides = array<i32>} : memref<16x32xf32, #tpu.memory_space<vmem>>, vector<1x32xf32>,
    %c0_4 = arith.constant 0 : index
    %c0_5 = arith.constant 0 : index
    %4 = vector.load %arg22[%c0_4, %c0_5] : memref<16x64xf32, #tpu.memory_space<vmem>>, vector<1x32xf32>
    tpu.vector_store %arg22[%c0_4, %c0_5], %2 {strides = array<i32>} : memref<16x64xf32, #tpu.memory_space<vmem>>, vector<1x32xf32>,
    %c14 = arith.constant 14 : index
    %c32 = arith.constant 32 : index
    %5 = vector.load %arg22[%c14, %c32] : memref<16x64xf32, #tpu.memory_space<vmem>>, vector<1x32xf32>
    tpu.vector_store %arg22[%c14, %c32], %2 {strides = array<i32>} : memref<16x64xf32, #tpu.memory_space<vmem>>, vector<1x32xf32>,
    %c0_6 = arith.constant 0 : index
    %c1 = arith.constant 1 : index
    %6 = memref.load %arg1[%c0_6, %c1] : memref<2x8xi32, #tpu.memory_space<smem>>
    %7 = arith.index_cast %6 : i32 to index
    %c0_7 = arith.constant 0 : index
    %8 = vector.load %arg2[%7, %c0_7] : memref<50x32xf32, #tpu.memory_space<vmem>>, vector<1x32xf32>
    %c1_8 = arith.constant 1 : index
    %c0_9 = arith.constant 0 : index
    %9 = vector.load %arg23[%c1_8, %c0_9] : memref<16x32xf32, #tpu.memory_space<vmem>>, vector<1x32xf32>
    tpu.vector_store %arg23[%c1_8, %c0_9], %8 {strides = array<i32>} : memref<16x32xf32, #tpu.memory_space<vmem>>, vector<1x32xf32>,
    %c2 = arith.constant 2 : index
    %c0_10 = arith.constant 0 : index
    %10 = vector.load %arg22[%c2, %c0_10] : memref<16x64xf32, #tpu.memory_space<vmem>>, vector<1x32xf32>
    tpu.vector_store %arg22[%c2, %c0_10], %8 {strides = array<i32>} : memref<16x64xf32, #tpu.memory_space<vmem>>, vector<1x32xf32>,
    %c12 = arith.constant 12 : index
    %c32_11 = arith.constant 32 : index
    %11 = vector.load %arg22[%c12, %c32_11] : memref<16x64xf32, #tpu.memory_space<vmem>>, vector<1x32xf32>
    tpu.vector_store %arg22[%c12, %c32_11], %8 {strides = array<i32>} : memref<16x64xf32, #tpu.memory_space<vmem>>, vector<1x32xf32>,
    %c0_12 = arith.constant 0 : index
    %c2_13 = arith.constant 2 : index
    %12 = memref.load %arg1[%c0_12, %c2_13] : memref<2x8xi32, #tpu.memory_space<smem>>
    %13 = arith.index_cast %12 : i32 to index
    %c0_14 = arith.constant 0 : index
    %14 = vector.load %arg2[%13, %c0_14] : memref<50x32xf32, #tpu.memory_space<vmem>>, vector<1x32xf32>
    %c2_15 = arith.constant 2 : index
    %c0_16 = arith.constant 0 : index
    %15 = vector.load %arg23[%c2_15, %c0_16] : memref<16x32xf32, #tpu.memory_space<vmem>>, vector<1x32xf32>
    tpu.vector_store %arg23[%c2_15, %c0_16], %14 {strides = array<i32>} : memref<16x32xf32, #tpu.memory_space<vmem>>, vector<1x32xf32>,
    %c4 = arith.constant 4 : index
    %c0_17 = arith.constant 0 : index
    %16 = vector.load %arg22[%c4, %c0_17] : memref<16x64xf32, #tpu.memory_space<vmem>>, vector<1x32xf32>
    tpu.vector_store %arg22[%c4, %c0_17], %14 {strides = array<i32>} : memref<16x64xf32, #tpu.memory_space<vmem>>, vector<1x32xf32>,
    %c10 = arith.constant 10 : index
    %c32_18 = arith.constant 32 : index
    %17 = vector.load %arg22[%c10, %c32_18] : memref<16x64xf32, #tpu.memory_space<vmem>>, vector<1x32xf32>
    tpu.vector_store %arg22[%c10, %c32_18], %14 {strides = array<i32>} : memref<16x64xf32, #tpu.memory_space<vmem>>, vector<1x32xf32>,
    %c0_19 = arith.constant 0 : index
    %c3 = arith.constant 3 : index
    %18 = memref.load %arg1[%c0_19, %c3] : memref<2x8xi32, #tpu.memory_space<smem>>
    %19 = arith.index_cast %18 : i32 to index
    %c0_20 = arith.constant 0 : index
    %20 = vector.load %arg2[%19, %c0_20] : memref<50x32xf32, #tpu.memory_space<vmem>>, vector<1x32xf32>
    %c3_21 = arith.constant 3 : index
    %c0_22 = arith.constant 0 : index
    %21 = vector.load %arg23[%c3_21, %c0_22] : memref<16x32xf32, #tpu.memory_space<vmem>>, vector<1x32xf32>
    tpu.vector_store %arg23[%c3_21, %c0_22], %20 {strides = array<i32>} : memref<16x32xf32, #tpu.memory_space<vmem>>, vector<1x32xf32>,
    %c6 = arith.constant 6 : index
    %c0_23 = arith.constant 0 : index
    %22 = vector.load %arg22[%c6, %c0_23] : memref<16x64xf32, #tpu.memory_space<vmem>>, vector<1x32xf32>
    tpu.vector_store %arg22[%c6, %c0_23], %20 {strides = array<i32>} : memref<16x64xf32, #tpu.memory_space<vmem>>, vector<1x32xf32>,
    %c8 = arith.constant 8 : index
    %c32_24 = arith.constant 32 : index
    %23 = vector.load %arg22[%c8, %c32_24] : memref<16x64xf32, #tpu.memory_space<vmem>>, vector<1x32xf32>
    tpu.vector_store %arg22[%c8, %c32_24], %20 {strides = array<i32>} : memref<16x64xf32, #tpu.memory_space<vmem>>, vector<1x32xf32>,
    %c0_25 = arith.constant 0 : index
    %c4_26 = arith.constant 4 : index
    %24 = memref.load %arg1[%c0_25, %c4_26] : memref<2x8xi32, #tpu.memory_space<smem>>
    %25 = arith.index_cast %24 : i32 to index
    %c0_27 = arith.constant 0 : index
    %26 = vector.load %arg2[%25, %c0_27] : memref<50x32xf32, #tpu.memory_space<vmem>>, vector<1x32xf32>
    %c4_28 = arith.constant 4 : index
    %c0_29 = arith.constant 0 : index
    %27 = vector.load %arg23[%c4_28, %c0_29] : memref<16x32xf32, #tpu.memory_space<vmem>>, vector<1x32xf32>
    tpu.vector_store %arg23[%c4_28, %c0_29], %26 {strides = array<i32>} : memref<16x32xf32, #tpu.memory_space<vmem>>, vector<1x32xf32>,
    %c8_30 = arith.constant 8 : index
    %c0_31 = arith.constant 0 : index
    %28 = vector.load %arg22[%c8_30, %c0_31] : memref<16x64xf32, #tpu.memory_space<vmem>>, vector<1x32xf32>
    tpu.vector_store %arg22[%c8_30, %c0_31], %26 {strides = array<i32>} : memref<16x64xf32, #tpu.memory_space<vmem>>, vector<1x32xf32>,
    %c6_32 = arith.constant 6 : index
    %c32_33 = arith.constant 32 : index
    %29 = vector.load %arg22[%c6_32, %c32_33] : memref<16x64xf32, #tpu.memory_space<vmem>>, vector<1x32xf32>
    tpu.vector_store %arg22[%c6_32, %c32_33], %26 {strides = array<i32>} : memref<16x64xf32, #tpu.memory_space<vmem>>, vector<1x32xf32>,
    %c0_34 = arith.constant 0 : index
    %c5 = arith.constant 5 : index
    %30 = memref.load %arg1[%c0_34, %c5] : memref<2x8xi32, #tpu.memory_space<smem>>
    %31 = arith.index_cast %30 : i32 to index
    %c0_35 = arith.constant 0 : index
    %32 = vector.load %arg2[%31, %c0_35] : memref<50x32xf32, #tpu.memory_space<vmem>>, vector<1x32xf32>
    %c5_36 = arith.constant 5 : index
    %c0_37 = arith.constant 0 : index
    %33 = vector.load %arg23[%c5_36, %c0_37] : memref<16x32xf32, #tpu.memory_space<vmem>>, vector<1x32xf32>
    tpu.vector_store %arg23[%c5_36, %c0_37], %32 {strides = array<i32>} : memref<16x32xf32, #tpu.memory_space<vmem>>, vector<1x32xf32>,
    %c10_38 = arith.constant 10 : index
    %c0_39 = arith.constant 0 : index
    %34 = vector.load %arg22[%c10_38, %c0_39] : memref<16x64xf32, #tpu.memory_space<vmem>>, vector<1x32xf32>
    tpu.vector_store %arg22[%c10_38, %c0_39], %32 {strides = array<i32>} : memref<16x64xf32, #tpu.memory_space<vmem>>, vector<1x32xf32>,
    %c4_40 = arith.constant 4 : index
    %c32_41 = arith.constant 32 : index
    %35 = vector.load %arg22[%c4_40, %c32_41] : memref<16x64xf32, #tpu.memory_space<vmem>>, vector<1x32xf32>
    tpu.vector_store %arg22[%c4_40, %c32_41], %32 {strides = array<i32>} : memref<16x64xf32, #tpu.memory_space<vmem>>, vector<1x32xf32>,
    %c0_42 = arith.constant 0 : index
    %c6_43 = arith.constant 6 : index
    %36 = memref.load %arg1[%c0_42, %c6_43] : memref<2x8xi32, #tpu.memory_space<smem>>
    %37 = arith.index_cast %36 : i32 to index
    %c0_44 = arith.constant 0 : index
    %38 = vector.load %arg2[%37, %c0_44] : memref<50x32xf32, #tpu.memory_space<vmem>>, vector<1x32xf32>
    %c6_45 = arith.constant 6 : index
    %c0_46 = arith.constant 0 : index
    %39 = vector.load %arg23[%c6_45, %c0_46] : memref<16x32xf32, #tpu.memory_space<vmem>>, vector<1x32xf32>
    tpu.vector_store %arg23[%c6_45, %c0_46], %38 {strides = array<i32>} : memref<16x32xf32, #tpu.memory_space<vmem>>, vector<1x32xf32>,
    %c12_47 = arith.constant 12 : index
    %c0_48 = arith.constant 0 : index
    %40 = vector.load %arg22[%c12_47, %c0_48] : memref<16x64xf32, #tpu.memory_space<vmem>>, vector<1x32xf32>
    tpu.vector_store %arg22[%c12_47, %c0_48], %38 {strides = array<i32>} : memref<16x64xf32, #tpu.memory_space<vmem>>, vector<1x32xf32>,
    %c2_49 = arith.constant 2 : index
    %c32_50 = arith.constant 32 : index
    %41 = vector.load %arg22[%c2_49, %c32_50] : memref<16x64xf32, #tpu.memory_space<vmem>>, vector<1x32xf32>
    tpu.vector_store %arg22[%c2_49, %c32_50], %38 {strides = array<i32>} : memref<16x64xf32, #tpu.memory_space<vmem>>, vector<1x32xf32>,
    %c0_51 = arith.constant 0 : index
    %c7 = arith.constant 7 : index
    %42 = memref.load %arg1[%c0_51, %c7] : memref<2x8xi32, #tpu.memory_space<smem>>
    %43 = arith.index_cast %42 : i32 to index
    %c0_52 = arith.constant 0 : index
    %44 = vector.load %arg2[%43, %c0_52] : memref<50x32xf32, #tpu.memory_space<vmem>>, vector<1x32xf32>
    %c7_53 = arith.constant 7 : index
    %c0_54 = arith.constant 0 : index
    %45 = vector.load %arg23[%c7_53, %c0_54] : memref<16x32xf32, #tpu.memory_space<vmem>>, vector<1x32xf32>
    tpu.vector_store %arg23[%c7_53, %c0_54], %44 {strides = array<i32>} : memref<16x32xf32, #tpu.memory_space<vmem>>, vector<1x32xf32>,
    %c14_55 = arith.constant 14 : index
    %c0_56 = arith.constant 0 : index
    %46 = vector.load %arg22[%c14_55, %c0_56] : memref<16x64xf32, #tpu.memory_space<vmem>>, vector<1x32xf32>
    tpu.vector_store %arg22[%c14_55, %c0_56], %44 {strides = array<i32>} : memref<16x64xf32, #tpu.memory_space<vmem>>, vector<1x32xf32>,
    %c0_57 = arith.constant 0 : index
    %c32_58 = arith.constant 32 : index
    %47 = vector.load %arg22[%c0_57, %c32_58] : memref<16x64xf32, #tpu.memory_space<vmem>>, vector<1x32xf32>
    tpu.vector_store %arg22[%c0_57, %c32_58], %44 {strides = array<i32>} : memref<16x64xf32, #tpu.memory_space<vmem>>, vector<1x32xf32>,
    %c1_59 = arith.constant 1 : index
    %c0_60 = arith.constant 0 : index
    %48 = memref.load %arg1[%c1_59, %c0_60] : memref<2x8xi32, #tpu.memory_space<smem>>
    %49 = arith.index_cast %48 : i32 to index
    %c0_61 = arith.constant 0 : index
    %50 = vector.load %arg2[%49, %c0_61] : memref<50x32xf32, #tpu.memory_space<vmem>>, vector<1x32xf32>
    %c8_62 = arith.constant 8 : index
    %c0_63 = arith.constant 0 : index
    %51 = vector.load %arg23[%c8_62, %c0_63] : memref<16x32xf32, #tpu.memory_space<vmem>>, vector<1x32xf32>
    tpu.vector_store %arg23[%c8_62, %c0_63], %50 {strides = array<i32>} : memref<16x32xf32, #tpu.memory_space<vmem>>, vector<1x32xf32>,
    %c1_64 = arith.constant 1 : index
    %c0_65 = arith.constant 0 : index
    %52 = vector.load %arg22[%c1_64, %c0_65] : memref<16x64xf32, #tpu.memory_space<vmem>>, vector<1x32xf32>
    tpu.vector_store %arg22[%c1_64, %c0_65], %50 {strides = array<i32>} : memref<16x64xf32, #tpu.memory_space<vmem>>, vector<1x32xf32>,
    %c15 = arith.constant 15 : index
    %c32_66 = arith.constant 32 : index
    %53 = vector.load %arg22[%c15, %c32_66] : memref<16x64xf32, #tpu.memory_space<vmem>>, vector<1x32xf32>
    tpu.vector_store %arg22[%c15, %c32_66], %50 {strides = array<i32>} : memref<16x64xf32, #tpu.memory_space<vmem>>, vector<1x32xf32>,
    %c1_67 = arith.constant 1 : index
    %c1_68 = arith.constant 1 : index
    %54 = memref.load %arg1[%c1_67, %c1_68] : memref<2x8xi32, #tpu.memory_space<smem>>
    %55 = arith.index_cast %54 : i32 to index
    %c0_69 = arith.constant 0 : index
    %56 = vector.load %arg2[%55, %c0_69] : memref<50x32xf32, #tpu.memory_space<vmem>>, vector<1x32xf32>
    %c9 = arith.constant 9 : index
    %c0_70 = arith.constant 0 : index
    %57 = vector.load %arg23[%c9, %c0_70] : memref<16x32xf32, #tpu.memory_space<vmem>>, vector<1x32xf32>
    tpu.vector_store %arg23[%c9, %c0_70], %56 {strides = array<i32>} : memref<16x32xf32, #tpu.memory_space<vmem>>, vector<1x32xf32>,
    %c3_71 = arith.constant 3 : index
    %c0_72 = arith.constant 0 : index
    %58 = vector.load %arg22[%c3_71, %c0_72] : memref<16x64xf32, #tpu.memory_space<vmem>>, vector<1x32xf32>
    tpu.vector_store %arg22[%c3_71, %c0_72], %56 {strides = array<i32>} : memref<16x64xf32, #tpu.memory_space<vmem>>, vector<1x32xf32>,
    %c13 = arith.constant 13 : index
    %c32_73 = arith.constant 32 : index
    %59 = vector.load %arg22[%c13, %c32_73] : memref<16x64xf32, #tpu.memory_space<vmem>>, vector<1x32xf32>
    tpu.vector_store %arg22[%c13, %c32_73], %56 {strides = array<i32>} : memref<16x64xf32, #tpu.memory_space<vmem>>, vector<1x32xf32>,
    %c1_74 = arith.constant 1 : index
    %c2_75 = arith.constant 2 : index
    %60 = memref.load %arg1[%c1_74, %c2_75] : memref<2x8xi32, #tpu.memory_space<smem>>
    %61 = arith.index_cast %60 : i32 to index
    %c0_76 = arith.constant 0 : index
    %62 = vector.load %arg2[%61, %c0_76] : memref<50x32xf32, #tpu.memory_space<vmem>>, vector<1x32xf32>
    %c10_77 = arith.constant 10 : index
    %c0_78 = arith.constant 0 : index
    %63 = vector.load %arg23[%c10_77, %c0_78] : memref<16x32xf32, #tpu.memory_space<vmem>>, vector<1x32xf32>
    tpu.vector_store %arg23[%c10_77, %c0_78], %62 {strides = array<i32>} : memref<16x32xf32, #tpu.memory_space<vmem>>, vector<1x32xf32>,
    %c5_79 = arith.constant 5 : index
    %c0_80 = arith.constant 0 : index
    %64 = vector.load %arg22[%c5_79, %c0_80] : memref<16x64xf32, #tpu.memory_space<vmem>>, vector<1x32xf32>
    tpu.vector_store %arg22[%c5_79, %c0_80], %62 {strides = array<i32>} : memref<16x64xf32, #tpu.memory_space<vmem>>, vector<1x32xf32>,
    %c11 = arith.constant 11 : index
    %c32_81 = arith.constant 32 : index
    %65 = vector.load %arg22[%c11, %c32_81] : memref<16x64xf32, #tpu.memory_space<vmem>>, vector<1x32xf32>
    tpu.vector_store %arg22[%c11, %c32_81], %62 {strides = array<i32>} : memref<16x64xf32, #tpu.memory_space<vmem>>, vector<1x32xf32>,
    %c1_82 = arith.constant 1 : index
    %c3_83 = arith.constant 3 : index
    %66 = memref.load %arg1[%c1_82, %c3_83] : memref<2x8xi32, #tpu.memory_space<smem>>
    %67 = arith.index_cast %66 : i32 to index
    %c0_84 = arith.constant 0 : index
    %68 = vector.load %arg2[%67, %c0_84] : memref<50x32xf32, #tpu.memory_space<vmem>>, vector<1x32xf32>
    %c11_85 = arith.constant 11 : index
    %c0_86 = arith.constant 0 : index
    %69 = vector.load %arg23[%c11_85, %c0_86] : memref<16x32xf32, #tpu.memory_space<vmem>>, vector<1x32xf32>
    tpu.vector_store %arg23[%c11_85, %c0_86], %68 {strides = array<i32>} : memref<16x32xf32, #tpu.memory_space<vmem>>, vector<1x32xf32>,
    %c7_87 = arith.constant 7 : index
    %c0_88 = arith.constant 0 : index
    %70 = vector.load %arg22[%c7_87, %c0_88] : memref<16x64xf32, #tpu.memory_space<vmem>>, vector<1x32xf32>
    tpu.vector_store %arg22[%c7_87, %c0_88], %68 {strides = array<i32>} : memref<16x64xf32, #tpu.memory_space<vmem>>, vector<1x32xf32>,
    %c9_89 = arith.constant 9 : index
    %c32_90 = arith.constant 32 : index
    %71 = vector.load %arg22[%c9_89, %c32_90] : memref<16x64xf32, #tpu.memory_space<vmem>>, vector<1x32xf32>
    tpu.vector_store %arg22[%c9_89, %c32_90], %68 {strides = array<i32>} : memref<16x64xf32, #tpu.memory_space<vmem>>, vector<1x32xf32>,
    %c1_91 = arith.constant 1 : index
    %c4_92 = arith.constant 4 : index
    %72 = memref.load %arg1[%c1_91, %c4_92] : memref<2x8xi32, #tpu.memory_space<smem>>
    %73 = arith.index_cast %72 : i32 to index
    %c0_93 = arith.constant 0 : index
    %74 = vector.load %arg2[%73, %c0_93] : memref<50x32xf32, #tpu.memory_space<vmem>>, vector<1x32xf32>
    %c12_94 = arith.constant 12 : index
    %c0_95 = arith.constant 0 : index
    %75 = vector.load %arg23[%c12_94, %c0_95] : memref<16x32xf32, #tpu.memory_space<vmem>>, vector<1x32xf32>
    tpu.vector_store %arg23[%c12_94, %c0_95], %74 {strides = array<i32>} : memref<16x32xf32, #tpu.memory_space<vmem>>, vector<1x32xf32>,
    %c9_96 = arith.constant 9 : index
    %c0_97 = arith.constant 0 : index
    %76 = vector.load %arg22[%c9_96, %c0_97] : memref<16x64xf32, #tpu.memory_space<vmem>>, vector<1x32xf32>
    tpu.vector_store %arg22[%c9_96, %c0_97], %74 {strides = array<i32>} : memref<16x64xf32, #tpu.memory_space<vmem>>, vector<1x32xf32>,
    %c7_98 = arith.constant 7 : index
    %c32_99 = arith.constant 32 : index
    %77 = vector.load %arg22[%c7_98, %c32_99] : memref<16x64xf32, #tpu.memory_space<vmem>>, vector<1x32xf32>
    tpu.vector_store %arg22[%c7_98, %c32_99], %74 {strides = array<i32>} : memref<16x64xf32, #tpu.memory_space<vmem>>, vector<1x32xf32>,
    %c1_100 = arith.constant 1 : index
    %c5_101 = arith.constant 5 : index
    %78 = memref.load %arg1[%c1_100, %c5_101] : memref<2x8xi32, #tpu.memory_space<smem>>
    %79 = arith.index_cast %78 : i32 to index
    %c0_102 = arith.constant 0 : index
    %80 = vector.load %arg2[%79, %c0_102] : memref<50x32xf32, #tpu.memory_space<vmem>>, vector<1x32xf32>
    %c13_103 = arith.constant 13 : index
    %c0_104 = arith.constant 0 : index
    %81 = vector.load %arg23[%c13_103, %c0_104] : memref<16x32xf32, #tpu.memory_space<vmem>>, vector<1x32xf32>
    tpu.vector_store %arg23[%c13_103, %c0_104], %80 {strides = array<i32>} : memref<16x32xf32, #tpu.memory_space<vmem>>, vector<1x32xf32>,
    %c11_105 = arith.constant 11 : index
    %c0_106 = arith.constant 0 : index
    %82 = vector.load %arg22[%c11_105, %c0_106] : memref<16x64xf32, #tpu.memory_space<vmem>>, vector<1x32xf32>
    tpu.vector_store %arg22[%c11_105, %c0_106], %80 {strides = array<i32>} : memref<16x64xf32, #tpu.memory_space<vmem>>, vector<1x32xf32>,
    %c5_107 = arith.constant 5 : index
    %c32_108 = arith.constant 32 : index
    %83 = vector.load %arg22[%c5_107, %c32_108] : memref<16x64xf32, #tpu.memory_space<vmem>>, vector<1x32xf32>
    tpu.vector_store %arg22[%c5_107, %c32_108], %80 {strides = array<i32>} : memref<16x64xf32, #tpu.memory_space<vmem>>, vector<1x32xf32>,
    %c1_109 = arith.constant 1 : index
    %c6_110 = arith.constant 6 : index
    %84 = memref.load %arg1[%c1_109, %c6_110] : memref<2x8xi32, #tpu.memory_space<smem>>
    %85 = arith.index_cast %84 : i32 to index
    %c0_111 = arith.constant 0 : index
    %86 = vector.load %arg2[%85, %c0_111] : memref<50x32xf32, #tpu.memory_space<vmem>>, vector<1x32xf32>
    %c14_112 = arith.constant 14 : index
    %c0_113 = arith.constant 0 : index
    %87 = vector.load %arg23[%c14_112, %c0_113] : memref<16x32xf32, #tpu.memory_space<vmem>>, vector<1x32xf32>
    tpu.vector_store %arg23[%c14_112, %c0_113], %86 {strides = array<i32>} : memref<16x32xf32, #tpu.memory_space<vmem>>, vector<1x32xf32>,
    %c13_114 = arith.constant 13 : index
    %c0_115 = arith.constant 0 : index
    %88 = vector.load %arg22[%c13_114, %c0_115] : memref<16x64xf32, #tpu.memory_space<vmem>>, vector<1x32xf32>
    tpu.vector_store %arg22[%c13_114, %c0_115], %86 {strides = array<i32>} : memref<16x64xf32, #tpu.memory_space<vmem>>, vector<1x32xf32>,
    %c3_116 = arith.constant 3 : index
    %c32_117 = arith.constant 32 : index
    %89 = vector.load %arg22[%c3_116, %c32_117] : memref<16x64xf32, #tpu.memory_space<vmem>>, vector<1x32xf32>
    tpu.vector_store %arg22[%c3_116, %c32_117], %86 {strides = array<i32>} : memref<16x64xf32, #tpu.memory_space<vmem>>, vector<1x32xf32>,
    %c1_118 = arith.constant 1 : index
    %c7_119 = arith.constant 7 : index
    %90 = memref.load %arg1[%c1_118, %c7_119] : memref<2x8xi32, #tpu.memory_space<smem>>
    %91 = arith.index_cast %90 : i32 to index
    %c0_120 = arith.constant 0 : index
    %92 = vector.load %arg2[%91, %c0_120] : memref<50x32xf32, #tpu.memory_space<vmem>>, vector<1x32xf32>
    %c15_121 = arith.constant 15 : index
    %c0_122 = arith.constant 0 : index
    %93 = vector.load %arg23[%c15_121, %c0_122] : memref<16x32xf32, #tpu.memory_space<vmem>>, vector<1x32xf32>
    tpu.vector_store %arg23[%c15_121, %c0_122], %92 {strides = array<i32>} : memref<16x32xf32, #tpu.memory_space<vmem>>, vector<1x32xf32>,
    %c15_123 = arith.constant 15 : index
    %c0_124 = arith.constant 0 : index
    %94 = vector.load %arg22[%c15_123, %c0_124] : memref<16x64xf32, #tpu.memory_space<vmem>>, vector<1x32xf32>
    tpu.vector_store %arg22[%c15_123, %c0_124], %92 {strides = array<i32>} : memref<16x64xf32, #tpu.memory_space<vmem>>, vector<1x32xf32>,
    %c1_125 = arith.constant 1 : index
    %c32_126 = arith.constant 32 : index
    %95 = vector.load %arg22[%c1_125, %c32_126] : memref<16x64xf32, #tpu.memory_space<vmem>>, vector<1x32xf32>
    tpu.vector_store %arg22[%c1_125, %c32_126], %92 {strides = array<i32>} : memref<16x64xf32, #tpu.memory_space<vmem>>, vector<1x32xf32>,
    %c0_127 = arith.constant 0 : index
    %c0_128 = arith.constant 0 : index
    %96 = vector.load %arg22[%c0_127, %c0_128] : memref<16x64xf32, #tpu.memory_space<vmem>>, vector<16x64xf32>
    %c0_129 = arith.constant 0 : index
    %c0_130 = arith.constant 0 : index
    %97 = vector.load %arg4[%c0_129, %c0_130] : memref<64x192xf32, #tpu.memory_space<vmem>>, vector<64x192xf32>
    %cst = arith.constant dense<0.000000e+00> : vector<16x192xf32>
    %98 = tpu.matmul %96, %97, %cst {dimension_numbers = #tpu.dot_dimension_numbers<[1], [0], [0], [1], [0, 0, 1, 1], [], []>} : vector<16x64xf32>, vector<64x192xf32>, vector<16x192xf32> -> vector<16x192xf32>
    %c0_131 = arith.constant 0 : index
    %c0_132 = arith.constant 0 : index
    %99 = vector.load %arg5[%c0_131, %c0_132] : memref<1x192xf32, #tpu.memory_space<vmem>>, vector<1x192xf32>
    %100 = vector.broadcast %99 : vector<1x192xf32> to vector<16x192xf32>
    %101 = arith.addf %98, %100 : vector<16x192xf32>
    %c0_133 = arith.constant 0 : index
    %c0_134 = arith.constant 0 : index
    %102 = vector.load %arg3[%c0_133, %c0_134] : memref<2x64xf32, #tpu.memory_space<vmem>>, vector<2x64xf32>
    %c0_135 = arith.constant 0 : index
    %c0_136 = arith.constant 0 : index
    %103 = vector.load %arg6[%c0_135, %c0_136] : memref<64x192xf32, #tpu.memory_space<vmem>>, vector<64x192xf32>
    %c0_137 = arith.constant 0 : index
    %c0_138 = arith.constant 0 : index
    %104 = vector.load %arg7[%c0_137, %c0_138] : memref<1x192xf32, #tpu.memory_space<vmem>>, vector<1x192xf32>
    %105 = vector.extract_strided_slice %101 {offsets = [0, 0], sizes = [2, 192], strides = [1, 1]} : vector<16x192xf32> to vector<2x192xf32>
    %cst_139 = arith.constant dense<0.000000e+00> : vector<2x192xf32>
    %106 = tpu.matmul %102, %103, %cst_139 {dimension_numbers = #tpu.dot_dimension_numbers<[1], [0], [0], [1], [0, 0, 1, 1], [], []>} : vector<2x64xf32>, vector<64x192xf32>, vector<2x192xf32> -> vector<2x192xf32>
    %107 = vector.broadcast %104 : vector<1x192xf32> to vector<2x192xf32>
    %108 = arith.addf %106, %107 : vector<2x192xf32>
    %109 = vector.extract_strided_slice %105 {offsets = [0, 0], sizes = [2, 64], strides = [1, 1]} : vector<2x192xf32> to vector<2x64xf32>
    %110 = vector.extract_strided_slice %108 {offsets = [0, 0], sizes = [2, 64], strides = [1, 1]} : vector<2x192xf32> to vector<2x64xf32>
    %111 = arith.addf %109, %110 : vector<2x64xf32>
    %112 = arith.negf %111 : vector<2x64xf32>
    %113 = math.exp %112 : vector<2x64xf32>
    %cst_140 = arith.constant 1.000000e+00 : f32
    %114 = vector.broadcast %cst_140 : f32 to vector<2x64xf32>
    %115 = arith.addf %114, %113 : vector<2x64xf32>
    %116 = arith.divf %114, %115 : vector<2x64xf32>
    %117 = vector.extract_strided_slice %105 {offsets = [0, 64], sizes = [2, 64], strides = [1, 1]} : vector<2x192xf32> to vector<2x64xf32>
    %118 = vector.extract_strided_slice %108 {offsets = [0, 64], sizes = [2, 64], strides = [1, 1]} : vector<2x192xf32> to vector<2x64xf32>
    %119 = arith.addf %117, %118 : vector<2x64xf32>
    %120 = arith.negf %119 : vector<2x64xf32>
    %121 = math.exp %120 : vector<2x64xf32>
    %cst_141 = arith.constant 1.000000e+00 : f32
    %122 = vector.broadcast %cst_141 : f32 to vector<2x64xf32>
    %123 = arith.addf %122, %121 : vector<2x64xf32>
    %124 = arith.divf %122, %123 : vector<2x64xf32>
    %125 = vector.extract_strided_slice %105 {offsets = [0, 128], sizes = [2, 64], strides = [1, 1]} : vector<2x192xf32> to vector<2x64xf32>
    %126 = vector.extract_strided_slice %108 {offsets = [0, 128], sizes = [2, 64], strides = [1, 1]} : vector<2x192xf32> to vector<2x64xf32>
    %127 = arith.mulf %116, %126 : vector<2x64xf32>
    %128 = arith.addf %125, %127 : vector<2x64xf32>
    %129 = math.tanh %128 : vector<2x64xf32>
    %cst_142 = arith.constant 1.000000e+00 : f32
    %130 = vector.broadcast %cst_142 : f32 to vector<2x64xf32>
    %131 = arith.subf %130, %124 : vector<2x64xf32>
    %132 = arith.mulf %131, %129 : vector<2x64xf32>
    %133 = arith.mulf %124, %102 : vector<2x64xf32>
    %134 = arith.addf %132, %133 : vector<2x64xf32>
    %135 = vector.extract_strided_slice %101 {offsets = [2, 0], sizes = [2, 192], strides = [1, 1]} : vector<16x192xf32> to vector<2x192xf32>
    %cst_143 = arith.constant dense<0.000000e+00> : vector<2x192xf32>
    %136 = tpu.matmul %134, %103, %cst_143 {dimension_numbers = #tpu.dot_dimension_numbers<[1], [0], [0], [1], [0, 0, 1, 1], [], []>} : vector<2x64xf32>, vector<64x192xf32>, vector<2x192xf32> -> vector<2x192xf32>
    %137 = vector.broadcast %104 : vector<1x192xf32> to vector<2x192xf32>
    %138 = arith.addf %136, %137 : vector<2x192xf32>
    %139 = vector.extract_strided_slice %135 {offsets = [0, 0], sizes = [2, 64], strides = [1, 1]} : vector<2x192xf32> to vector<2x64xf32>
    %140 = vector.extract_strided_slice %138 {offsets = [0, 0], sizes = [2, 64], strides = [1, 1]} : vector<2x192xf32> to vector<2x64xf32>
    %141 = arith.addf %139, %140 : vector<2x64xf32>
    %142 = arith.negf %141 : vector<2x64xf32>
    %143 = math.exp %142 : vector<2x64xf32>
    %cst_144 = arith.constant 1.000000e+00 : f32
    %144 = vector.broadcast %cst_144 : f32 to vector<2x64xf32>
    %145 = arith.addf %144, %143 : vector<2x64xf32>
    %146 = arith.divf %144, %145 : vector<2x64xf32>
    %147 = vector.extract_strided_slice %135 {offsets = [0, 64], sizes = [2, 64], strides = [1, 1]} : vector<2x192xf32> to vector<2x64xf32>
    %148 = vector.extract_strided_slice %138 {offsets = [0, 64], sizes = [2, 64], strides = [1, 1]} : vector<2x192xf32> to vector<2x64xf32>
    %149 = arith.addf %147, %148 : vector<2x64xf32>
    %150 = arith.negf %149 : vector<2x64xf32>
    %151 = math.exp %150 : vector<2x64xf32>
    %cst_145 = arith.constant 1.000000e+00 : f32
    %152 = vector.broadcast %cst_145 : f32 to vector<2x64xf32>
    %153 = arith.addf %152, %151 : vector<2x64xf32>
    %154 = arith.divf %152, %153 : vector<2x64xf32>
    %155 = vector.extract_strided_slice %135 {offsets = [0, 128], sizes = [2, 64], strides = [1, 1]} : vector<2x192xf32> to vector<2x64xf32>
    %156 = vector.extract_strided_slice %138 {offsets = [0, 128], sizes = [2, 64], strides = [1, 1]} : vector<2x192xf32> to vector<2x64xf32>
    %157 = arith.mulf %146, %156 : vector<2x64xf32>
    %158 = arith.addf %155, %157 : vector<2x64xf32>
    %159 = math.tanh %158 : vector<2x64xf32>
    %cst_146 = arith.constant 1.000000e+00 : f32
    %160 = vector.broadcast %cst_146 : f32 to vector<2x64xf32>
    %161 = arith.subf %160, %154 : vector<2x64xf32>
    %162 = arith.mulf %161, %159 : vector<2x64xf32>
    %163 = arith.mulf %154, %134 : vector<2x64xf32>
    %164 = arith.addf %162, %163 : vector<2x64xf32>
    %165 = vector.extract_strided_slice %101 {offsets = [4, 0], sizes = [2, 192], strides = [1, 1]} : vector<16x192xf32> to vector<2x192xf32>
    %cst_147 = arith.constant dense<0.000000e+00> : vector<2x192xf32>
    %166 = tpu.matmul %164, %103, %cst_147 {dimension_numbers = #tpu.dot_dimension_numbers<[1], [0], [0], [1], [0, 0, 1, 1], [], []>} : vector<2x64xf32>, vector<64x192xf32>, vector<2x192xf32> -> vector<2x192xf32>
    %167 = vector.broadcast %104 : vector<1x192xf32> to vector<2x192xf32>
    %168 = arith.addf %166, %167 : vector<2x192xf32>
    %169 = vector.extract_strided_slice %165 {offsets = [0, 0], sizes = [2, 64], strides = [1, 1]} : vector<2x192xf32> to vector<2x64xf32>
    %170 = vector.extract_strided_slice %168 {offsets = [0, 0], sizes = [2, 64], strides = [1, 1]} : vector<2x192xf32> to vector<2x64xf32>
    %171 = arith.addf %169, %170 : vector<2x64xf32>
    %172 = arith.negf %171 : vector<2x64xf32>
    %173 = math.exp %172 : vector<2x64xf32>
    %cst_148 = arith.constant 1.000000e+00 : f32
    %174 = vector.broadcast %cst_148 : f32 to vector<2x64xf32>
    %175 = arith.addf %174, %173 : vector<2x64xf32>
    %176 = arith.divf %174, %175 : vector<2x64xf32>
    %177 = vector.extract_strided_slice %165 {offsets = [0, 64], sizes = [2, 64], strides = [1, 1]} : vector<2x192xf32> to vector<2x64xf32>
    %178 = vector.extract_strided_slice %168 {offsets = [0, 64], sizes = [2, 64], strides = [1, 1]} : vector<2x192xf32> to vector<2x64xf32>
    %179 = arith.addf %177, %178 : vector<2x64xf32>
    %180 = arith.negf %179 : vector<2x64xf32>
    %181 = math.exp %180 : vector<2x64xf32>
    %cst_149 = arith.constant 1.000000e+00 : f32
    %182 = vector.broadcast %cst_149 : f32 to vector<2x64xf32>
    %183 = arith.addf %182, %181 : vector<2x64xf32>
    %184 = arith.divf %182, %183 : vector<2x64xf32>
    %185 = vector.extract_strided_slice %165 {offsets = [0, 128], sizes = [2, 64], strides = [1, 1]} : vector<2x192xf32> to vector<2x64xf32>
    %186 = vector.extract_strided_slice %168 {offsets = [0, 128], sizes = [2, 64], strides = [1, 1]} : vector<2x192xf32> to vector<2x64xf32>
    %187 = arith.mulf %176, %186 : vector<2x64xf32>
    %188 = arith.addf %185, %187 : vector<2x64xf32>
    %189 = math.tanh %188 : vector<2x64xf32>
    %cst_150 = arith.constant 1.000000e+00 : f32
    %190 = vector.broadcast %cst_150 : f32 to vector<2x64xf32>
    %191 = arith.subf %190, %184 : vector<2x64xf32>
    %192 = arith.mulf %191, %189 : vector<2x64xf32>
    %193 = arith.mulf %184, %164 : vector<2x64xf32>
    %194 = arith.addf %192, %193 : vector<2x64xf32>
    %195 = vector.extract_strided_slice %101 {offsets = [6, 0], sizes = [2, 192], strides = [1, 1]} : vector<16x192xf32> to vector<2x192xf32>
    %cst_151 = arith.constant dense<0.000000e+00> : vector<2x192xf32>
    %196 = tpu.matmul %194, %103, %cst_151 {dimension_numbers = #tpu.dot_dimension_numbers<[1], [0], [0], [1], [0, 0, 1, 1], [], []>} : vector<2x64xf32>, vector<64x192xf32>, vector<2x192xf32> -> vector<2x192xf32>
    %197 = vector.broadcast %104 : vector<1x192xf32> to vector<2x192xf32>
    %198 = arith.addf %196, %197 : vector<2x192xf32>
    %199 = vector.extract_strided_slice %195 {offsets = [0, 0], sizes = [2, 64], strides = [1, 1]} : vector<2x192xf32> to vector<2x64xf32>
    %200 = vector.extract_strided_slice %198 {offsets = [0, 0], sizes = [2, 64], strides = [1, 1]} : vector<2x192xf32> to vector<2x64xf32>
    %201 = arith.addf %199, %200 : vector<2x64xf32>
    %202 = arith.negf %201 : vector<2x64xf32>
    %203 = math.exp %202 : vector<2x64xf32>
    %cst_152 = arith.constant 1.000000e+00 : f32
    %204 = vector.broadcast %cst_152 : f32 to vector<2x64xf32>
    %205 = arith.addf %204, %203 : vector<2x64xf32>
    %206 = arith.divf %204, %205 : vector<2x64xf32>
    %207 = vector.extract_strided_slice %195 {offsets = [0, 64], sizes = [2, 64], strides = [1, 1]} : vector<2x192xf32> to vector<2x64xf32>
    %208 = vector.extract_strided_slice %198 {offsets = [0, 64], sizes = [2, 64], strides = [1, 1]} : vector<2x192xf32> to vector<2x64xf32>
    %209 = arith.addf %207, %208 : vector<2x64xf32>
    %210 = arith.negf %209 : vector<2x64xf32>
    %211 = math.exp %210 : vector<2x64xf32>
    %cst_153 = arith.constant 1.000000e+00 : f32
    %212 = vector.broadcast %cst_153 : f32 to vector<2x64xf32>
    %213 = arith.addf %212, %211 : vector<2x64xf32>
    %214 = arith.divf %212, %213 : vector<2x64xf32>
    %215 = vector.extract_strided_slice %195 {offsets = [0, 128], sizes = [2, 64], strides = [1, 1]} : vector<2x192xf32> to vector<2x64xf32>
    %216 = vector.extract_strided_slice %198 {offsets = [0, 128], sizes = [2, 64], strides = [1, 1]} : vector<2x192xf32> to vector<2x64xf32>
    %217 = arith.mulf %206, %216 : vector<2x64xf32>
    %218 = arith.addf %215, %217 : vector<2x64xf32>
    %219 = math.tanh %218 : vector<2x64xf32>
    %cst_154 = arith.constant 1.000000e+00 : f32
    %220 = vector.broadcast %cst_154 : f32 to vector<2x64xf32>
    %221 = arith.subf %220, %214 : vector<2x64xf32>
    %222 = arith.mulf %221, %219 : vector<2x64xf32>
    %223 = arith.mulf %214, %194 : vector<2x64xf32>
    %224 = arith.addf %222, %223 : vector<2x64xf32>
    %225 = vector.extract_strided_slice %101 {offsets = [8, 0], sizes = [2, 192], strides = [1, 1]} : vector<16x192xf32> to vector<2x192xf32>
    %cst_155 = arith.constant dense<0.000000e+00> : vector<2x192xf32>
    %226 = tpu.matmul %224, %103, %cst_155 {dimension_numbers = #tpu.dot_dimension_numbers<[1], [0], [0], [1], [0, 0, 1, 1], [], []>} : vector<2x64xf32>, vector<64x192xf32>, vector<2x192xf32> -> vector<2x192xf32>
    %227 = vector.broadcast %104 : vector<1x192xf32> to vector<2x192xf32>
    %228 = arith.addf %226, %227 : vector<2x192xf32>
    %229 = vector.extract_strided_slice %225 {offsets = [0, 0], sizes = [2, 64], strides = [1, 1]} : vector<2x192xf32> to vector<2x64xf32>
    %230 = vector.extract_strided_slice %228 {offsets = [0, 0], sizes = [2, 64], strides = [1, 1]} : vector<2x192xf32> to vector<2x64xf32>
    %231 = arith.addf %229, %230 : vector<2x64xf32>
    %232 = arith.negf %231 : vector<2x64xf32>
    %233 = math.exp %232 : vector<2x64xf32>
    %cst_156 = arith.constant 1.000000e+00 : f32
    %234 = vector.broadcast %cst_156 : f32 to vector<2x64xf32>
    %235 = arith.addf %234, %233 : vector<2x64xf32>
    %236 = arith.divf %234, %235 : vector<2x64xf32>
    %237 = vector.extract_strided_slice %225 {offsets = [0, 64], sizes = [2, 64], strides = [1, 1]} : vector<2x192xf32> to vector<2x64xf32>
    %238 = vector.extract_strided_slice %228 {offsets = [0, 64], sizes = [2, 64], strides = [1, 1]} : vector<2x192xf32> to vector<2x64xf32>
    %239 = arith.addf %237, %238 : vector<2x64xf32>
    %240 = arith.negf %239 : vector<2x64xf32>
    %241 = math.exp %240 : vector<2x64xf32>
    %cst_157 = arith.constant 1.000000e+00 : f32
    %242 = vector.broadcast %cst_157 : f32 to vector<2x64xf32>
    %243 = arith.addf %242, %241 : vector<2x64xf32>
    %244 = arith.divf %242, %243 : vector<2x64xf32>
    %245 = vector.extract_strided_slice %225 {offsets = [0, 128], sizes = [2, 64], strides = [1, 1]} : vector<2x192xf32> to vector<2x64xf32>
    %246 = vector.extract_strided_slice %228 {offsets = [0, 128], sizes = [2, 64], strides = [1, 1]} : vector<2x192xf32> to vector<2x64xf32>
    %247 = arith.mulf %236, %246 : vector<2x64xf32>
    %248 = arith.addf %245, %247 : vector<2x64xf32>
    %249 = math.tanh %248 : vector<2x64xf32>
    %cst_158 = arith.constant 1.000000e+00 : f32
    %250 = vector.broadcast %cst_158 : f32 to vector<2x64xf32>
    %251 = arith.subf %250, %244 : vector<2x64xf32>
    %252 = arith.mulf %251, %249 : vector<2x64xf32>
    %253 = arith.mulf %244, %224 : vector<2x64xf32>
    %254 = arith.addf %252, %253 : vector<2x64xf32>
    %255 = vector.extract_strided_slice %101 {offsets = [10, 0], sizes = [2, 192], strides = [1, 1]} : vector<16x192xf32> to vector<2x192xf32>
    %cst_159 = arith.constant dense<0.000000e+00> : vector<2x192xf32>
    %256 = tpu.matmul %254, %103, %cst_159 {dimension_numbers = #tpu.dot_dimension_numbers<[1], [0], [0], [1], [0, 0, 1, 1], [], []>} : vector<2x64xf32>, vector<64x192xf32>, vector<2x192xf32> -> vector<2x192xf32>
    %257 = vector.broadcast %104 : vector<1x192xf32> to vector<2x192xf32>
    %258 = arith.addf %256, %257 : vector<2x192xf32>
    %259 = vector.extract_strided_slice %255 {offsets = [0, 0], sizes = [2, 64], strides = [1, 1]} : vector<2x192xf32> to vector<2x64xf32>
    %260 = vector.extract_strided_slice %258 {offsets = [0, 0], sizes = [2, 64], strides = [1, 1]} : vector<2x192xf32> to vector<2x64xf32>
    %261 = arith.addf %259, %260 : vector<2x64xf32>
    %262 = arith.negf %261 : vector<2x64xf32>
    %263 = math.exp %262 : vector<2x64xf32>
    %cst_160 = arith.constant 1.000000e+00 : f32
    %264 = vector.broadcast %cst_160 : f32 to vector<2x64xf32>
    %265 = arith.addf %264, %263 : vector<2x64xf32>
    %266 = arith.divf %264, %265 : vector<2x64xf32>
    %267 = vector.extract_strided_slice %255 {offsets = [0, 64], sizes = [2, 64], strides = [1, 1]} : vector<2x192xf32> to vector<2x64xf32>
    %268 = vector.extract_strided_slice %258 {offsets = [0, 64], sizes = [2, 64], strides = [1, 1]} : vector<2x192xf32> to vector<2x64xf32>
    %269 = arith.addf %267, %268 : vector<2x64xf32>
    %270 = arith.negf %269 : vector<2x64xf32>
    %271 = math.exp %270 : vector<2x64xf32>
    %cst_161 = arith.constant 1.000000e+00 : f32
    %272 = vector.broadcast %cst_161 : f32 to vector<2x64xf32>
    %273 = arith.addf %272, %271 : vector<2x64xf32>
    %274 = arith.divf %272, %273 : vector<2x64xf32>
    %275 = vector.extract_strided_slice %255 {offsets = [0, 128], sizes = [2, 64], strides = [1, 1]} : vector<2x192xf32> to vector<2x64xf32>
    %276 = vector.extract_strided_slice %258 {offsets = [0, 128], sizes = [2, 64], strides = [1, 1]} : vector<2x192xf32> to vector<2x64xf32>
    %277 = arith.mulf %266, %276 : vector<2x64xf32>
    %278 = arith.addf %275, %277 : vector<2x64xf32>
    %279 = math.tanh %278 : vector<2x64xf32>
    %cst_162 = arith.constant 1.000000e+00 : f32
    %280 = vector.broadcast %cst_162 : f32 to vector<2x64xf32>
    %281 = arith.subf %280, %274 : vector<2x64xf32>
    %282 = arith.mulf %281, %279 : vector<2x64xf32>
    %283 = arith.mulf %274, %254 : vector<2x64xf32>
    %284 = arith.addf %282, %283 : vector<2x64xf32>
    %285 = vector.extract_strided_slice %101 {offsets = [12, 0], sizes = [2, 192], strides = [1, 1]} : vector<16x192xf32> to vector<2x192xf32>
    %cst_163 = arith.constant dense<0.000000e+00> : vector<2x192xf32>
    %286 = tpu.matmul %284, %103, %cst_163 {dimension_numbers = #tpu.dot_dimension_numbers<[1], [0], [0], [1], [0, 0, 1, 1], [], []>} : vector<2x64xf32>, vector<64x192xf32>, vector<2x192xf32> -> vector<2x192xf32>
    %287 = vector.broadcast %104 : vector<1x192xf32> to vector<2x192xf32>
    %288 = arith.addf %286, %287 : vector<2x192xf32>
    %289 = vector.extract_strided_slice %285 {offsets = [0, 0], sizes = [2, 64], strides = [1, 1]} : vector<2x192xf32> to vector<2x64xf32>
    %290 = vector.extract_strided_slice %288 {offsets = [0, 0], sizes = [2, 64], strides = [1, 1]} : vector<2x192xf32> to vector<2x64xf32>
    %291 = arith.addf %289, %290 : vector<2x64xf32>
    %292 = arith.negf %291 : vector<2x64xf32>
    %293 = math.exp %292 : vector<2x64xf32>
    %cst_164 = arith.constant 1.000000e+00 : f32
    %294 = vector.broadcast %cst_164 : f32 to vector<2x64xf32>
    %295 = arith.addf %294, %293 : vector<2x64xf32>
    %296 = arith.divf %294, %295 : vector<2x64xf32>
    %297 = vector.extract_strided_slice %285 {offsets = [0, 64], sizes = [2, 64], strides = [1, 1]} : vector<2x192xf32> to vector<2x64xf32>
    %298 = vector.extract_strided_slice %288 {offsets = [0, 64], sizes = [2, 64], strides = [1, 1]} : vector<2x192xf32> to vector<2x64xf32>
    %299 = arith.addf %297, %298 : vector<2x64xf32>
    %300 = arith.negf %299 : vector<2x64xf32>
    %301 = math.exp %300 : vector<2x64xf32>
    %cst_165 = arith.constant 1.000000e+00 : f32
    %302 = vector.broadcast %cst_165 : f32 to vector<2x64xf32>
    %303 = arith.addf %302, %301 : vector<2x64xf32>
    %304 = arith.divf %302, %303 : vector<2x64xf32>
    %305 = vector.extract_strided_slice %285 {offsets = [0, 128], sizes = [2, 64], strides = [1, 1]} : vector<2x192xf32> to vector<2x64xf32>
    %306 = vector.extract_strided_slice %288 {offsets = [0, 128], sizes = [2, 64], strides = [1, 1]} : vector<2x192xf32> to vector<2x64xf32>
    %307 = arith.mulf %296, %306 : vector<2x64xf32>
    %308 = arith.addf %305, %307 : vector<2x64xf32>
    %309 = math.tanh %308 : vector<2x64xf32>
    %cst_166 = arith.constant 1.000000e+00 : f32
    %310 = vector.broadcast %cst_166 : f32 to vector<2x64xf32>
    %311 = arith.subf %310, %304 : vector<2x64xf32>
    %312 = arith.mulf %311, %309 : vector<2x64xf32>
    %313 = arith.mulf %304, %284 : vector<2x64xf32>
    %314 = arith.addf %312, %313 : vector<2x64xf32>
    %315 = vector.extract_strided_slice %101 {offsets = [14, 0], sizes = [2, 192], strides = [1, 1]} : vector<16x192xf32> to vector<2x192xf32>
    %cst_167 = arith.constant dense<0.000000e+00> : vector<2x192xf32>
    %316 = tpu.matmul %314, %103, %cst_167 {dimension_numbers = #tpu.dot_dimension_numbers<[1], [0], [0], [1], [0, 0, 1, 1], [], []>} : vector<2x64xf32>, vector<64x192xf32>, vector<2x192xf32> -> vector<2x192xf32>
    %317 = vector.broadcast %104 : vector<1x192xf32> to vector<2x192xf32>
    %318 = arith.addf %316, %317 : vector<2x192xf32>
    %319 = vector.extract_strided_slice %315 {offsets = [0, 0], sizes = [2, 64], strides = [1, 1]} : vector<2x192xf32> to vector<2x64xf32>
    %320 = vector.extract_strided_slice %318 {offsets = [0, 0], sizes = [2, 64], strides = [1, 1]} : vector<2x192xf32> to vector<2x64xf32>
    %321 = arith.addf %319, %320 : vector<2x64xf32>
    %322 = arith.negf %321 : vector<2x64xf32>
    %323 = math.exp %322 : vector<2x64xf32>
    %cst_168 = arith.constant 1.000000e+00 : f32
    %324 = vector.broadcast %cst_168 : f32 to vector<2x64xf32>
    %325 = arith.addf %324, %323 : vector<2x64xf32>
    %326 = arith.divf %324, %325 : vector<2x64xf32>
    %327 = vector.extract_strided_slice %315 {offsets = [0, 64], sizes = [2, 64], strides = [1, 1]} : vector<2x192xf32> to vector<2x64xf32>
    %328 = vector.extract_strided_slice %318 {offsets = [0, 64], sizes = [2, 64], strides = [1, 1]} : vector<2x192xf32> to vector<2x64xf32>
    %329 = arith.addf %327, %328 : vector<2x64xf32>
    %330 = arith.negf %329 : vector<2x64xf32>
    %331 = math.exp %330 : vector<2x64xf32>
    %cst_169 = arith.constant 1.000000e+00 : f32
    %332 = vector.broadcast %cst_169 : f32 to vector<2x64xf32>
    %333 = arith.addf %332, %331 : vector<2x64xf32>
    %334 = arith.divf %332, %333 : vector<2x64xf32>
    %335 = vector.extract_strided_slice %315 {offsets = [0, 128], sizes = [2, 64], strides = [1, 1]} : vector<2x192xf32> to vector<2x64xf32>
    %336 = vector.extract_strided_slice %318 {offsets = [0, 128], sizes = [2, 64], strides = [1, 1]} : vector<2x192xf32> to vector<2x64xf32>
    %337 = arith.mulf %326, %336 : vector<2x64xf32>
    %338 = arith.addf %335, %337 : vector<2x64xf32>
    %339 = math.tanh %338 : vector<2x64xf32>
    %cst_170 = arith.constant 1.000000e+00 : f32
    %340 = vector.broadcast %cst_170 : f32 to vector<2x64xf32>
    %341 = arith.subf %340, %334 : vector<2x64xf32>
    %342 = arith.mulf %341, %339 : vector<2x64xf32>
    %343 = arith.mulf %334, %314 : vector<2x64xf32>
    %344 = arith.addf %342, %343 : vector<2x64xf32>
    %c0_171 = arith.constant 0 : index
    %c0_172 = arith.constant 0 : index
    %345 = vector.load %arg24[%c0_171, %c0_172] : memref<16x64xf32, #tpu.memory_space<vmem>>, vector<2x64xf32>
    tpu.vector_store %arg24[%c0_171, %c0_172], %134 {strides = array<i32>} : memref<16x64xf32, #tpu.memory_space<vmem>>, vector<2x64xf32>,
    %c14_173 = arith.constant 14 : index
    %c0_174 = arith.constant 0 : index
    %346 = vector.load %arg25[%c14_173, %c0_174] : memref<16x64xf32, #tpu.memory_space<vmem>>, vector<2x64xf32>
    tpu.vector_store %arg25[%c14_173, %c0_174], %134 {strides = array<i32>} : memref<16x64xf32, #tpu.memory_space<vmem>>, vector<2x64xf32>,
    %c2_175 = arith.constant 2 : index
    %c0_176 = arith.constant 0 : index
    %347 = vector.load %arg24[%c2_175, %c0_176] : memref<16x64xf32, #tpu.memory_space<vmem>>, vector<2x64xf32>
    tpu.vector_store %arg24[%c2_175, %c0_176], %164 {strides = array<i32>} : memref<16x64xf32, #tpu.memory_space<vmem>>, vector<2x64xf32>,
    %c12_177 = arith.constant 12 : index
    %c0_178 = arith.constant 0 : index
    %348 = vector.load %arg25[%c12_177, %c0_178] : memref<16x64xf32, #tpu.memory_space<vmem>>, vector<2x64xf32>
    tpu.vector_store %arg25[%c12_177, %c0_178], %164 {strides = array<i32>} : memref<16x64xf32, #tpu.memory_space<vmem>>, vector<2x64xf32>,
    %c4_179 = arith.constant 4 : index
    %c0_180 = arith.constant 0 : index
    %349 = vector.load %arg24[%c4_179, %c0_180] : memref<16x64xf32, #tpu.memory_space<vmem>>, vector<2x64xf32>
    tpu.vector_store %arg24[%c4_179, %c0_180], %194 {strides = array<i32>} : memref<16x64xf32, #tpu.memory_space<vmem>>, vector<2x64xf32>,
    %c10_181 = arith.constant 10 : index
    %c0_182 = arith.constant 0 : index
    %350 = vector.load %arg25[%c10_181, %c0_182] : memref<16x64xf32, #tpu.memory_space<vmem>>, vector<2x64xf32>
    tpu.vector_store %arg25[%c10_181, %c0_182], %194 {strides = array<i32>} : memref<16x64xf32, #tpu.memory_space<vmem>>, vector<2x64xf32>,
    %c6_183 = arith.constant 6 : index
    %c0_184 = arith.constant 0 : index
    %351 = vector.load %arg24[%c6_183, %c0_184] : memref<16x64xf32, #tpu.memory_space<vmem>>, vector<2x64xf32>
    tpu.vector_store %arg24[%c6_183, %c0_184], %224 {strides = array<i32>} : memref<16x64xf32, #tpu.memory_space<vmem>>, vector<2x64xf32>,
    %c8_185 = arith.constant 8 : index
    %c0_186 = arith.constant 0 : index
    %352 = vector.load %arg25[%c8_185, %c0_186] : memref<16x64xf32, #tpu.memory_space<vmem>>, vector<2x64xf32>
    tpu.vector_store %arg25[%c8_185, %c0_186], %224 {strides = array<i32>} : memref<16x64xf32, #tpu.memory_space<vmem>>, vector<2x64xf32>,
    %c8_187 = arith.constant 8 : index
    %c0_188 = arith.constant 0 : index
    %353 = vector.load %arg24[%c8_187, %c0_188] : memref<16x64xf32, #tpu.memory_space<vmem>>, vector<2x64xf32>
    tpu.vector_store %arg24[%c8_187, %c0_188], %254 {strides = array<i32>} : memref<16x64xf32, #tpu.memory_space<vmem>>, vector<2x64xf32>,
    %c6_189 = arith.constant 6 : index
    %c0_190 = arith.constant 0 : index
    %354 = vector.load %arg25[%c6_189, %c0_190] : memref<16x64xf32, #tpu.memory_space<vmem>>, vector<2x64xf32>
    tpu.vector_store %arg25[%c6_189, %c0_190], %254 {strides = array<i32>} : memref<16x64xf32, #tpu.memory_space<vmem>>, vector<2x64xf32>,
    %c10_191 = arith.constant 10 : index
    %c0_192 = arith.constant 0 : index
    %355 = vector.load %arg24[%c10_191, %c0_192] : memref<16x64xf32, #tpu.memory_space<vmem>>, vector<2x64xf32>
    tpu.vector_store %arg24[%c10_191, %c0_192], %284 {strides = array<i32>} : memref<16x64xf32, #tpu.memory_space<vmem>>, vector<2x64xf32>,
    %c4_193 = arith.constant 4 : index
    %c0_194 = arith.constant 0 : index
    %356 = vector.load %arg25[%c4_193, %c0_194] : memref<16x64xf32, #tpu.memory_space<vmem>>, vector<2x64xf32>
    tpu.vector_store %arg25[%c4_193, %c0_194], %284 {strides = array<i32>} : memref<16x64xf32, #tpu.memory_space<vmem>>, vector<2x64xf32>,
    %c12_195 = arith.constant 12 : index
    %c0_196 = arith.constant 0 : index
    %357 = vector.load %arg24[%c12_195, %c0_196] : memref<16x64xf32, #tpu.memory_space<vmem>>, vector<2x64xf32>
    tpu.vector_store %arg24[%c12_195, %c0_196], %314 {strides = array<i32>} : memref<16x64xf32, #tpu.memory_space<vmem>>, vector<2x64xf32>,
    %c2_197 = arith.constant 2 : index
    %c0_198 = arith.constant 0 : index
    %358 = vector.load %arg25[%c2_197, %c0_198] : memref<16x64xf32, #tpu.memory_space<vmem>>, vector<2x64xf32>
    tpu.vector_store %arg25[%c2_197, %c0_198], %314 {strides = array<i32>} : memref<16x64xf32, #tpu.memory_space<vmem>>, vector<2x64xf32>,
    %c14_199 = arith.constant 14 : index
    %c0_200 = arith.constant 0 : index
    %359 = vector.load %arg24[%c14_199, %c0_200] : memref<16x64xf32, #tpu.memory_space<vmem>>, vector<2x64xf32>
    tpu.vector_store %arg24[%c14_199, %c0_200], %344 {strides = array<i32>} : memref<16x64xf32, #tpu.memory_space<vmem>>, vector<2x64xf32>,
    %c0_201 = arith.constant 0 : index
    %c0_202 = arith.constant 0 : index
    %360 = vector.load %arg25[%c0_201, %c0_202] : memref<16x64xf32, #tpu.memory_space<vmem>>, vector<2x64xf32>
    tpu.vector_store %arg25[%c0_201, %c0_202], %344 {strides = array<i32>} : memref<16x64xf32, #tpu.memory_space<vmem>>, vector<2x64xf32>,
    %c0_203 = arith.constant 0 : index
    %c0_204 = arith.constant 0 : index
    %361 = vector.load %arg24[%c0_203, %c0_204] : memref<16x64xf32, #tpu.memory_space<vmem>>, vector<16x64xf32>
    %c0_205 = arith.constant 0 : index
    %c0_206 = arith.constant 0 : index
    %362 = vector.load %arg8[%c0_205, %c0_206] : memref<64x192xf32, #tpu.memory_space<vmem>>, vector<64x192xf32>
    %cst_207 = arith.constant dense<0.000000e+00> : vector<16x192xf32>
    %363 = tpu.matmul %361, %362, %cst_207 {dimension_numbers = #tpu.dot_dimension_numbers<[1], [0], [0], [1], [0, 0, 1, 1], [], []>} : vector<16x64xf32>, vector<64x192xf32>, vector<16x192xf32> -> vector<16x192xf32>
    %c0_208 = arith.constant 0 : index
    %c0_209 = arith.constant 0 : index
    %364 = vector.load %arg25[%c0_208, %c0_209] : memref<16x64xf32, #tpu.memory_space<vmem>>, vector<16x64xf32>
    %c0_210 = arith.constant 0 : index
    %c0_211 = arith.constant 0 : index
    %365 = vector.load %arg9[%c0_210, %c0_211] : memref<64x192xf32, #tpu.memory_space<vmem>>, vector<64x192xf32>
    %cst_212 = arith.constant dense<0.000000e+00> : vector<16x192xf32>
    %366 = tpu.matmul %364, %365, %cst_212 {dimension_numbers = #tpu.dot_dimension_numbers<[1], [0], [0], [1], [0, 0, 1, 1], [], []>} : vector<16x64xf32>, vector<64x192xf32>, vector<16x192xf32> -> vector<16x192xf32>
    %367 = arith.addf %363, %366 : vector<16x192xf32>
    %c0_213 = arith.constant 0 : index
    %c0_214 = arith.constant 0 : index
    %368 = vector.load %arg10[%c0_213, %c0_214] : memref<1x192xf32, #tpu.memory_space<vmem>>, vector<1x192xf32>
    %369 = vector.broadcast %368 : vector<1x192xf32> to vector<16x192xf32>
    %370 = arith.addf %367, %369 : vector<16x192xf32>
    %cst_215 = arith.constant 0.000000e+00 : f32
    %371 = vector.broadcast %cst_215 : f32 to vector<2x64xf32>
    %c0_216 = arith.constant 0 : index
    %c0_217 = arith.constant 0 : index
    %372 = vector.load %arg11[%c0_216, %c0_217] : memref<64x192xf32, #tpu.memory_space<vmem>>, vector<64x192xf32>
    %c0_218 = arith.constant 0 : index
    %c0_219 = arith.constant 0 : index
    %373 = vector.load %arg12[%c0_218, %c0_219] : memref<1x192xf32, #tpu.memory_space<vmem>>, vector<1x192xf32>
    %374 = vector.extract_strided_slice %370 {offsets = [0, 0], sizes = [2, 192], strides = [1, 1]} : vector<16x192xf32> to vector<2x192xf32>
    %cst_220 = arith.constant dense<0.000000e+00> : vector<2x192xf32>
    %375 = tpu.matmul %371, %372, %cst_220 {dimension_numbers = #tpu.dot_dimension_numbers<[1], [0], [0], [1], [0, 0, 1, 1], [], []>} : vector<2x64xf32>, vector<64x192xf32>, vector<2x192xf32> -> vector<2x192xf32>
    %376 = vector.broadcast %373 : vector<1x192xf32> to vector<2x192xf32>
    %377 = arith.addf %375, %376 : vector<2x192xf32>
    %378 = vector.extract_strided_slice %374 {offsets = [0, 0], sizes = [2, 64], strides = [1, 1]} : vector<2x192xf32> to vector<2x64xf32>
    %379 = vector.extract_strided_slice %377 {offsets = [0, 0], sizes = [2, 64], strides = [1, 1]} : vector<2x192xf32> to vector<2x64xf32>
    %380 = arith.addf %378, %379 : vector<2x64xf32>
    %381 = arith.negf %380 : vector<2x64xf32>
    %382 = math.exp %381 : vector<2x64xf32>
    %cst_221 = arith.constant 1.000000e+00 : f32
    %383 = vector.broadcast %cst_221 : f32 to vector<2x64xf32>
    %384 = arith.addf %383, %382 : vector<2x64xf32>
    %385 = arith.divf %383, %384 : vector<2x64xf32>
    %386 = vector.extract_strided_slice %374 {offsets = [0, 64], sizes = [2, 64], strides = [1, 1]} : vector<2x192xf32> to vector<2x64xf32>
    %387 = vector.extract_strided_slice %377 {offsets = [0, 64], sizes = [2, 64], strides = [1, 1]} : vector<2x192xf32> to vector<2x64xf32>
    %388 = arith.addf %386, %387 : vector<2x64xf32>
    %389 = arith.negf %388 : vector<2x64xf32>
    %390 = math.exp %389 : vector<2x64xf32>
    %cst_222 = arith.constant 1.000000e+00 : f32
    %391 = vector.broadcast %cst_222 : f32 to vector<2x64xf32>
    %392 = arith.addf %391, %390 : vector<2x64xf32>
    %393 = arith.divf %391, %392 : vector<2x64xf32>
    %394 = vector.extract_strided_slice %374 {offsets = [0, 128], sizes = [2, 64], strides = [1, 1]} : vector<2x192xf32> to vector<2x64xf32>
    %395 = vector.extract_strided_slice %377 {offsets = [0, 128], sizes = [2, 64], strides = [1, 1]} : vector<2x192xf32> to vector<2x64xf32>
    %396 = arith.mulf %385, %395 : vector<2x64xf32>
    %397 = arith.addf %394, %396 : vector<2x64xf32>
    %398 = math.tanh %397 : vector<2x64xf32>
    %cst_223 = arith.constant 1.000000e+00 : f32
    %399 = vector.broadcast %cst_223 : f32 to vector<2x64xf32>
    %400 = arith.subf %399, %393 : vector<2x64xf32>
    %401 = arith.mulf %400, %398 : vector<2x64xf32>
    %402 = arith.mulf %393, %371 : vector<2x64xf32>
    %403 = arith.addf %401, %402 : vector<2x64xf32>
    %404 = vector.extract_strided_slice %370 {offsets = [2, 0], sizes = [2, 192], strides = [1, 1]} : vector<16x192xf32> to vector<2x192xf32>
    %cst_224 = arith.constant dense<0.000000e+00> : vector<2x192xf32>
    %405 = tpu.matmul %403, %372, %cst_224 {dimension_numbers = #tpu.dot_dimension_numbers<[1], [0], [0], [1], [0, 0, 1, 1], [], []>} : vector<2x64xf32>, vector<64x192xf32>, vector<2x192xf32> -> vector<2x192xf32>
    %406 = vector.broadcast %373 : vector<1x192xf32> to vector<2x192xf32>
    %407 = arith.addf %405, %406 : vector<2x192xf32>
    %408 = vector.extract_strided_slice %404 {offsets = [0, 0], sizes = [2, 64], strides = [1, 1]} : vector<2x192xf32> to vector<2x64xf32>
    %409 = vector.extract_strided_slice %407 {offsets = [0, 0], sizes = [2, 64], strides = [1, 1]} : vector<2x192xf32> to vector<2x64xf32>
    %410 = arith.addf %408, %409 : vector<2x64xf32>
    %411 = arith.negf %410 : vector<2x64xf32>
    %412 = math.exp %411 : vector<2x64xf32>
    %cst_225 = arith.constant 1.000000e+00 : f32
    %413 = vector.broadcast %cst_225 : f32 to vector<2x64xf32>
    %414 = arith.addf %413, %412 : vector<2x64xf32>
    %415 = arith.divf %413, %414 : vector<2x64xf32>
    %416 = vector.extract_strided_slice %404 {offsets = [0, 64], sizes = [2, 64], strides = [1, 1]} : vector<2x192xf32> to vector<2x64xf32>
    %417 = vector.extract_strided_slice %407 {offsets = [0, 64], sizes = [2, 64], strides = [1, 1]} : vector<2x192xf32> to vector<2x64xf32>
    %418 = arith.addf %416, %417 : vector<2x64xf32>
    %419 = arith.negf %418 : vector<2x64xf32>
    %420 = math.exp %419 : vector<2x64xf32>
    %cst_226 = arith.constant 1.000000e+00 : f32
    %421 = vector.broadcast %cst_226 : f32 to vector<2x64xf32>
    %422 = arith.addf %421, %420 : vector<2x64xf32>
    %423 = arith.divf %421, %422 : vector<2x64xf32>
    %424 = vector.extract_strided_slice %404 {offsets = [0, 128], sizes = [2, 64], strides = [1, 1]} : vector<2x192xf32> to vector<2x64xf32>
    %425 = vector.extract_strided_slice %407 {offsets = [0, 128], sizes = [2, 64], strides = [1, 1]} : vector<2x192xf32> to vector<2x64xf32>
    %426 = arith.mulf %415, %425 : vector<2x64xf32>
    %427 = arith.addf %424, %426 : vector<2x64xf32>
    %428 = math.tanh %427 : vector<2x64xf32>
    %cst_227 = arith.constant 1.000000e+00 : f32
    %429 = vector.broadcast %cst_227 : f32 to vector<2x64xf32>
    %430 = arith.subf %429, %423 : vector<2x64xf32>
    %431 = arith.mulf %430, %428 : vector<2x64xf32>
    %432 = arith.mulf %423, %403 : vector<2x64xf32>
    %433 = arith.addf %431, %432 : vector<2x64xf32>
    %434 = vector.extract_strided_slice %370 {offsets = [4, 0], sizes = [2, 192], strides = [1, 1]} : vector<16x192xf32> to vector<2x192xf32>
    %cst_228 = arith.constant dense<0.000000e+00> : vector<2x192xf32>
    %435 = tpu.matmul %433, %372, %cst_228 {dimension_numbers = #tpu.dot_dimension_numbers<[1], [0], [0], [1], [0, 0, 1, 1], [], []>} : vector<2x64xf32>, vector<64x192xf32>, vector<2x192xf32> -> vector<2x192xf32>
    %436 = vector.broadcast %373 : vector<1x192xf32> to vector<2x192xf32>
    %437 = arith.addf %435, %436 : vector<2x192xf32>
    %438 = vector.extract_strided_slice %434 {offsets = [0, 0], sizes = [2, 64], strides = [1, 1]} : vector<2x192xf32> to vector<2x64xf32>
    %439 = vector.extract_strided_slice %437 {offsets = [0, 0], sizes = [2, 64], strides = [1, 1]} : vector<2x192xf32> to vector<2x64xf32>
    %440 = arith.addf %438, %439 : vector<2x64xf32>
    %441 = arith.negf %440 : vector<2x64xf32>
    %442 = math.exp %441 : vector<2x64xf32>
    %cst_229 = arith.constant 1.000000e+00 : f32
    %443 = vector.broadcast %cst_229 : f32 to vector<2x64xf32>
    %444 = arith.addf %443, %442 : vector<2x64xf32>
    %445 = arith.divf %443, %444 : vector<2x64xf32>
    %446 = vector.extract_strided_slice %434 {offsets = [0, 64], sizes = [2, 64], strides = [1, 1]} : vector<2x192xf32> to vector<2x64xf32>
    %447 = vector.extract_strided_slice %437 {offsets = [0, 64], sizes = [2, 64], strides = [1, 1]} : vector<2x192xf32> to vector<2x64xf32>
    %448 = arith.addf %446, %447 : vector<2x64xf32>
    %449 = arith.negf %448 : vector<2x64xf32>
    %450 = math.exp %449 : vector<2x64xf32>
    %cst_230 = arith.constant 1.000000e+00 : f32
    %451 = vector.broadcast %cst_230 : f32 to vector<2x64xf32>
    %452 = arith.addf %451, %450 : vector<2x64xf32>
    %453 = arith.divf %451, %452 : vector<2x64xf32>
    %454 = vector.extract_strided_slice %434 {offsets = [0, 128], sizes = [2, 64], strides = [1, 1]} : vector<2x192xf32> to vector<2x64xf32>
    %455 = vector.extract_strided_slice %437 {offsets = [0, 128], sizes = [2, 64], strides = [1, 1]} : vector<2x192xf32> to vector<2x64xf32>
    %456 = arith.mulf %445, %455 : vector<2x64xf32>
    %457 = arith.addf %454, %456 : vector<2x64xf32>
    %458 = math.tanh %457 : vector<2x64xf32>
    %cst_231 = arith.constant 1.000000e+00 : f32
    %459 = vector.broadcast %cst_231 : f32 to vector<2x64xf32>
    %460 = arith.subf %459, %453 : vector<2x64xf32>
    %461 = arith.mulf %460, %458 : vector<2x64xf32>
    %462 = arith.mulf %453, %433 : vector<2x64xf32>
    %463 = arith.addf %461, %462 : vector<2x64xf32>
    %464 = vector.extract_strided_slice %370 {offsets = [6, 0], sizes = [2, 192], strides = [1, 1]} : vector<16x192xf32> to vector<2x192xf32>
    %cst_232 = arith.constant dense<0.000000e+00> : vector<2x192xf32>
    %465 = tpu.matmul %463, %372, %cst_232 {dimension_numbers = #tpu.dot_dimension_numbers<[1], [0], [0], [1], [0, 0, 1, 1], [], []>} : vector<2x64xf32>, vector<64x192xf32>, vector<2x192xf32> -> vector<2x192xf32>
    %466 = vector.broadcast %373 : vector<1x192xf32> to vector<2x192xf32>
    %467 = arith.addf %465, %466 : vector<2x192xf32>
    %468 = vector.extract_strided_slice %464 {offsets = [0, 0], sizes = [2, 64], strides = [1, 1]} : vector<2x192xf32> to vector<2x64xf32>
    %469 = vector.extract_strided_slice %467 {offsets = [0, 0], sizes = [2, 64], strides = [1, 1]} : vector<2x192xf32> to vector<2x64xf32>
    %470 = arith.addf %468, %469 : vector<2x64xf32>
    %471 = arith.negf %470 : vector<2x64xf32>
    %472 = math.exp %471 : vector<2x64xf32>
    %cst_233 = arith.constant 1.000000e+00 : f32
    %473 = vector.broadcast %cst_233 : f32 to vector<2x64xf32>
    %474 = arith.addf %473, %472 : vector<2x64xf32>
    %475 = arith.divf %473, %474 : vector<2x64xf32>
    %476 = vector.extract_strided_slice %464 {offsets = [0, 64], sizes = [2, 64], strides = [1, 1]} : vector<2x192xf32> to vector<2x64xf32>
    %477 = vector.extract_strided_slice %467 {offsets = [0, 64], sizes = [2, 64], strides = [1, 1]} : vector<2x192xf32> to vector<2x64xf32>
    %478 = arith.addf %476, %477 : vector<2x64xf32>
    %479 = arith.negf %478 : vector<2x64xf32>
    %480 = math.exp %479 : vector<2x64xf32>
    %cst_234 = arith.constant 1.000000e+00 : f32
    %481 = vector.broadcast %cst_234 : f32 to vector<2x64xf32>
    %482 = arith.addf %481, %480 : vector<2x64xf32>
    %483 = arith.divf %481, %482 : vector<2x64xf32>
    %484 = vector.extract_strided_slice %464 {offsets = [0, 128], sizes = [2, 64], strides = [1, 1]} : vector<2x192xf32> to vector<2x64xf32>
    %485 = vector.extract_strided_slice %467 {offsets = [0, 128], sizes = [2, 64], strides = [1, 1]} : vector<2x192xf32> to vector<2x64xf32>
    %486 = arith.mulf %475, %485 : vector<2x64xf32>
    %487 = arith.addf %484, %486 : vector<2x64xf32>
    %488 = math.tanh %487 : vector<2x64xf32>
    %cst_235 = arith.constant 1.000000e+00 : f32
    %489 = vector.broadcast %cst_235 : f32 to vector<2x64xf32>
    %490 = arith.subf %489, %483 : vector<2x64xf32>
    %491 = arith.mulf %490, %488 : vector<2x64xf32>
    %492 = arith.mulf %483, %463 : vector<2x64xf32>
    %493 = arith.addf %491, %492 : vector<2x64xf32>
    %494 = vector.extract_strided_slice %370 {offsets = [8, 0], sizes = [2, 192], strides = [1, 1]} : vector<16x192xf32> to vector<2x192xf32>
    %cst_236 = arith.constant dense<0.000000e+00> : vector<2x192xf32>
    %495 = tpu.matmul %493, %372, %cst_236 {dimension_numbers = #tpu.dot_dimension_numbers<[1], [0], [0], [1], [0, 0, 1, 1], [], []>} : vector<2x64xf32>, vector<64x192xf32>, vector<2x192xf32> -> vector<2x192xf32>
    %496 = vector.broadcast %373 : vector<1x192xf32> to vector<2x192xf32>
    %497 = arith.addf %495, %496 : vector<2x192xf32>
    %498 = vector.extract_strided_slice %494 {offsets = [0, 0], sizes = [2, 64], strides = [1, 1]} : vector<2x192xf32> to vector<2x64xf32>
    %499 = vector.extract_strided_slice %497 {offsets = [0, 0], sizes = [2, 64], strides = [1, 1]} : vector<2x192xf32> to vector<2x64xf32>
    %500 = arith.addf %498, %499 : vector<2x64xf32>
    %501 = arith.negf %500 : vector<2x64xf32>
    %502 = math.exp %501 : vector<2x64xf32>
    %cst_237 = arith.constant 1.000000e+00 : f32
    %503 = vector.broadcast %cst_237 : f32 to vector<2x64xf32>
    %504 = arith.addf %503, %502 : vector<2x64xf32>
    %505 = arith.divf %503, %504 : vector<2x64xf32>
    %506 = vector.extract_strided_slice %494 {offsets = [0, 64], sizes = [2, 64], strides = [1, 1]} : vector<2x192xf32> to vector<2x64xf32>
    %507 = vector.extract_strided_slice %497 {offsets = [0, 64], sizes = [2, 64], strides = [1, 1]} : vector<2x192xf32> to vector<2x64xf32>
    %508 = arith.addf %506, %507 : vector<2x64xf32>
    %509 = arith.negf %508 : vector<2x64xf32>
    %510 = math.exp %509 : vector<2x64xf32>
    %cst_238 = arith.constant 1.000000e+00 : f32
    %511 = vector.broadcast %cst_238 : f32 to vector<2x64xf32>
    %512 = arith.addf %511, %510 : vector<2x64xf32>
    %513 = arith.divf %511, %512 : vector<2x64xf32>
    %514 = vector.extract_strided_slice %494 {offsets = [0, 128], sizes = [2, 64], strides = [1, 1]} : vector<2x192xf32> to vector<2x64xf32>
    %515 = vector.extract_strided_slice %497 {offsets = [0, 128], sizes = [2, 64], strides = [1, 1]} : vector<2x192xf32> to vector<2x64xf32>
    %516 = arith.mulf %505, %515 : vector<2x64xf32>
    %517 = arith.addf %514, %516 : vector<2x64xf32>
    %518 = math.tanh %517 : vector<2x64xf32>
    %cst_239 = arith.constant 1.000000e+00 : f32
    %519 = vector.broadcast %cst_239 : f32 to vector<2x64xf32>
    %520 = arith.subf %519, %513 : vector<2x64xf32>
    %521 = arith.mulf %520, %518 : vector<2x64xf32>
    %522 = arith.mulf %513, %493 : vector<2x64xf32>
    %523 = arith.addf %521, %522 : vector<2x64xf32>
    %524 = vector.extract_strided_slice %370 {offsets = [10, 0], sizes = [2, 192], strides = [1, 1]} : vector<16x192xf32> to vector<2x192xf32>
    %cst_240 = arith.constant dense<0.000000e+00> : vector<2x192xf32>
    %525 = tpu.matmul %523, %372, %cst_240 {dimension_numbers = #tpu.dot_dimension_numbers<[1], [0], [0], [1], [0, 0, 1, 1], [], []>} : vector<2x64xf32>, vector<64x192xf32>, vector<2x192xf32> -> vector<2x192xf32>
    %526 = vector.broadcast %373 : vector<1x192xf32> to vector<2x192xf32>
    %527 = arith.addf %525, %526 : vector<2x192xf32>
    %528 = vector.extract_strided_slice %524 {offsets = [0, 0], sizes = [2, 64], strides = [1, 1]} : vector<2x192xf32> to vector<2x64xf32>
    %529 = vector.extract_strided_slice %527 {offsets = [0, 0], sizes = [2, 64], strides = [1, 1]} : vector<2x192xf32> to vector<2x64xf32>
    %530 = arith.addf %528, %529 : vector<2x64xf32>
    %531 = arith.negf %530 : vector<2x64xf32>
    %532 = math.exp %531 : vector<2x64xf32>
    %cst_241 = arith.constant 1.000000e+00 : f32
    %533 = vector.broadcast %cst_241 : f32 to vector<2x64xf32>
    %534 = arith.addf %533, %532 : vector<2x64xf32>
    %535 = arith.divf %533, %534 : vector<2x64xf32>
    %536 = vector.extract_strided_slice %524 {offsets = [0, 64], sizes = [2, 64], strides = [1, 1]} : vector<2x192xf32> to vector<2x64xf32>
    %537 = vector.extract_strided_slice %527 {offsets = [0, 64], sizes = [2, 64], strides = [1, 1]} : vector<2x192xf32> to vector<2x64xf32>
    %538 = arith.addf %536, %537 : vector<2x64xf32>
    %539 = arith.negf %538 : vector<2x64xf32>
    %540 = math.exp %539 : vector<2x64xf32>
    %cst_242 = arith.constant 1.000000e+00 : f32
    %541 = vector.broadcast %cst_242 : f32 to vector<2x64xf32>
    %542 = arith.addf %541, %540 : vector<2x64xf32>
    %543 = arith.divf %541, %542 : vector<2x64xf32>
    %544 = vector.extract_strided_slice %524 {offsets = [0, 128], sizes = [2, 64], strides = [1, 1]} : vector<2x192xf32> to vector<2x64xf32>
    %545 = vector.extract_strided_slice %527 {offsets = [0, 128], sizes = [2, 64], strides = [1, 1]} : vector<2x192xf32> to vector<2x64xf32>
    %546 = arith.mulf %535, %545 : vector<2x64xf32>
    %547 = arith.addf %544, %546 : vector<2x64xf32>
    %548 = math.tanh %547 : vector<2x64xf32>
    %cst_243 = arith.constant 1.000000e+00 : f32
    %549 = vector.broadcast %cst_243 : f32 to vector<2x64xf32>
    %550 = arith.subf %549, %543 : vector<2x64xf32>
    %551 = arith.mulf %550, %548 : vector<2x64xf32>
    %552 = arith.mulf %543, %523 : vector<2x64xf32>
    %553 = arith.addf %551, %552 : vector<2x64xf32>
    %554 = vector.extract_strided_slice %370 {offsets = [12, 0], sizes = [2, 192], strides = [1, 1]} : vector<16x192xf32> to vector<2x192xf32>
    %cst_244 = arith.constant dense<0.000000e+00> : vector<2x192xf32>
    %555 = tpu.matmul %553, %372, %cst_244 {dimension_numbers = #tpu.dot_dimension_numbers<[1], [0], [0], [1], [0, 0, 1, 1], [], []>} : vector<2x64xf32>, vector<64x192xf32>, vector<2x192xf32> -> vector<2x192xf32>
    %556 = vector.broadcast %373 : vector<1x192xf32> to vector<2x192xf32>
    %557 = arith.addf %555, %556 : vector<2x192xf32>
    %558 = vector.extract_strided_slice %554 {offsets = [0, 0], sizes = [2, 64], strides = [1, 1]} : vector<2x192xf32> to vector<2x64xf32>
    %559 = vector.extract_strided_slice %557 {offsets = [0, 0], sizes = [2, 64], strides = [1, 1]} : vector<2x192xf32> to vector<2x64xf32>
    %560 = arith.addf %558, %559 : vector<2x64xf32>
    %561 = arith.negf %560 : vector<2x64xf32>
    %562 = math.exp %561 : vector<2x64xf32>
    %cst_245 = arith.constant 1.000000e+00 : f32
    %563 = vector.broadcast %cst_245 : f32 to vector<2x64xf32>
    %564 = arith.addf %563, %562 : vector<2x64xf32>
    %565 = arith.divf %563, %564 : vector<2x64xf32>
    %566 = vector.extract_strided_slice %554 {offsets = [0, 64], sizes = [2, 64], strides = [1, 1]} : vector<2x192xf32> to vector<2x64xf32>
    %567 = vector.extract_strided_slice %557 {offsets = [0, 64], sizes = [2, 64], strides = [1, 1]} : vector<2x192xf32> to vector<2x64xf32>
    %568 = arith.addf %566, %567 : vector<2x64xf32>
    %569 = arith.negf %568 : vector<2x64xf32>
    %570 = math.exp %569 : vector<2x64xf32>
    %cst_246 = arith.constant 1.000000e+00 : f32
    %571 = vector.broadcast %cst_246 : f32 to vector<2x64xf32>
    %572 = arith.addf %571, %570 : vector<2x64xf32>
    %573 = arith.divf %571, %572 : vector<2x64xf32>
    %574 = vector.extract_strided_slice %554 {offsets = [0, 128], sizes = [2, 64], strides = [1, 1]} : vector<2x192xf32> to vector<2x64xf32>
    %575 = vector.extract_strided_slice %557 {offsets = [0, 128], sizes = [2, 64], strides = [1, 1]} : vector<2x192xf32> to vector<2x64xf32>
    %576 = arith.mulf %565, %575 : vector<2x64xf32>
    %577 = arith.addf %574, %576 : vector<2x64xf32>
    %578 = math.tanh %577 : vector<2x64xf32>
    %cst_247 = arith.constant 1.000000e+00 : f32
    %579 = vector.broadcast %cst_247 : f32 to vector<2x64xf32>
    %580 = arith.subf %579, %573 : vector<2x64xf32>
    %581 = arith.mulf %580, %578 : vector<2x64xf32>
    %582 = arith.mulf %573, %553 : vector<2x64xf32>
    %583 = arith.addf %581, %582 : vector<2x64xf32>
    %584 = vector.extract_strided_slice %370 {offsets = [14, 0], sizes = [2, 192], strides = [1, 1]} : vector<16x192xf32> to vector<2x192xf32>
    %cst_248 = arith.constant dense<0.000000e+00> : vector<2x192xf32>
    %585 = tpu.matmul %583, %372, %cst_248 {dimension_numbers = #tpu.dot_dimension_numbers<[1], [0], [0], [1], [0, 0, 1, 1], [], []>} : vector<2x64xf32>, vector<64x192xf32>, vector<2x192xf32> -> vector<2x192xf32>
    %586 = vector.broadcast %373 : vector<1x192xf32> to vector<2x192xf32>
    %587 = arith.addf %585, %586 : vector<2x192xf32>
    %588 = vector.extract_strided_slice %584 {offsets = [0, 0], sizes = [2, 64], strides = [1, 1]} : vector<2x192xf32> to vector<2x64xf32>
    %589 = vector.extract_strided_slice %587 {offsets = [0, 0], sizes = [2, 64], strides = [1, 1]} : vector<2x192xf32> to vector<2x64xf32>
    %590 = arith.addf %588, %589 : vector<2x64xf32>
    %591 = arith.negf %590 : vector<2x64xf32>
    %592 = math.exp %591 : vector<2x64xf32>
    %cst_249 = arith.constant 1.000000e+00 : f32
    %593 = vector.broadcast %cst_249 : f32 to vector<2x64xf32>
    %594 = arith.addf %593, %592 : vector<2x64xf32>
    %595 = arith.divf %593, %594 : vector<2x64xf32>
    %596 = vector.extract_strided_slice %584 {offsets = [0, 64], sizes = [2, 64], strides = [1, 1]} : vector<2x192xf32> to vector<2x64xf32>
    %597 = vector.extract_strided_slice %587 {offsets = [0, 64], sizes = [2, 64], strides = [1, 1]} : vector<2x192xf32> to vector<2x64xf32>
    %598 = arith.addf %596, %597 : vector<2x64xf32>
    %599 = arith.negf %598 : vector<2x64xf32>
    %600 = math.exp %599 : vector<2x64xf32>
    %cst_250 = arith.constant 1.000000e+00 : f32
    %601 = vector.broadcast %cst_250 : f32 to vector<2x64xf32>
    %602 = arith.addf %601, %600 : vector<2x64xf32>
    %603 = arith.divf %601, %602 : vector<2x64xf32>
    %604 = vector.extract_strided_slice %584 {offsets = [0, 128], sizes = [2, 64], strides = [1, 1]} : vector<2x192xf32> to vector<2x64xf32>
    %605 = vector.extract_strided_slice %587 {offsets = [0, 128], sizes = [2, 64], strides = [1, 1]} : vector<2x192xf32> to vector<2x64xf32>
    %606 = arith.mulf %595, %605 : vector<2x64xf32>
    %607 = arith.addf %604, %606 : vector<2x64xf32>
    %608 = math.tanh %607 : vector<2x64xf32>
    %cst_251 = arith.constant 1.000000e+00 : f32
    %609 = vector.broadcast %cst_251 : f32 to vector<2x64xf32>
    %610 = arith.subf %609, %603 : vector<2x64xf32>
    %611 = arith.mulf %610, %608 : vector<2x64xf32>
    %612 = arith.mulf %603, %583 : vector<2x64xf32>
    %613 = arith.addf %611, %612 : vector<2x64xf32>
    %614 = vector.extract_strided_slice %403 {offsets = [0, 0], sizes = [2, 32], strides = [1, 1]} : vector<2x64xf32> to vector<2x32xf32>
    %c0_252 = arith.constant 0 : index
    %c0_253 = arith.constant 0 : index
    %615 = vector.load %arg26[%c0_252, %c0_253] : memref<16x32xf32, #tpu.memory_space<vmem>>, vector<2x32xf32>
    tpu.vector_store %arg26[%c0_252, %c0_253], %614 {strides = array<i32>} : memref<16x32xf32, #tpu.memory_space<vmem>>, vector<2x32xf32>,
    %616 = vector.extract_strided_slice %403 {offsets = [0, 32], sizes = [2, 32], strides = [1, 1]} : vector<2x64xf32> to vector<2x32xf32>
    %c14_254 = arith.constant 14 : index
    %c0_255 = arith.constant 0 : index
    %617 = vector.load %arg27[%c14_254, %c0_255] : memref<16x32xf32, #tpu.memory_space<vmem>>, vector<2x32xf32>
    tpu.vector_store %arg27[%c14_254, %c0_255], %616 {strides = array<i32>} : memref<16x32xf32, #tpu.memory_space<vmem>>, vector<2x32xf32>,
    %618 = vector.extract_strided_slice %433 {offsets = [0, 0], sizes = [2, 32], strides = [1, 1]} : vector<2x64xf32> to vector<2x32xf32>
    %c2_256 = arith.constant 2 : index
    %c0_257 = arith.constant 0 : index
    %619 = vector.load %arg26[%c2_256, %c0_257] : memref<16x32xf32, #tpu.memory_space<vmem>>, vector<2x32xf32>
    tpu.vector_store %arg26[%c2_256, %c0_257], %618 {strides = array<i32>} : memref<16x32xf32, #tpu.memory_space<vmem>>, vector<2x32xf32>,
    %620 = vector.extract_strided_slice %433 {offsets = [0, 32], sizes = [2, 32], strides = [1, 1]} : vector<2x64xf32> to vector<2x32xf32>
    %c12_258 = arith.constant 12 : index
    %c0_259 = arith.constant 0 : index
    %621 = vector.load %arg27[%c12_258, %c0_259] : memref<16x32xf32, #tpu.memory_space<vmem>>, vector<2x32xf32>
    tpu.vector_store %arg27[%c12_258, %c0_259], %620 {strides = array<i32>} : memref<16x32xf32, #tpu.memory_space<vmem>>, vector<2x32xf32>,
    %622 = vector.extract_strided_slice %463 {offsets = [0, 0], sizes = [2, 32], strides = [1, 1]} : vector<2x64xf32> to vector<2x32xf32>
    %c4_260 = arith.constant 4 : index
    %c0_261 = arith.constant 0 : index
    %623 = vector.load %arg26[%c4_260, %c0_261] : memref<16x32xf32, #tpu.memory_space<vmem>>, vector<2x32xf32>
    tpu.vector_store %arg26[%c4_260, %c0_261], %622 {strides = array<i32>} : memref<16x32xf32, #tpu.memory_space<vmem>>, vector<2x32xf32>,
    %624 = vector.extract_strided_slice %463 {offsets = [0, 32], sizes = [2, 32], strides = [1, 1]} : vector<2x64xf32> to vector<2x32xf32>
    %c10_262 = arith.constant 10 : index
    %c0_263 = arith.constant 0 : index
    %625 = vector.load %arg27[%c10_262, %c0_263] : memref<16x32xf32, #tpu.memory_space<vmem>>, vector<2x32xf32>
    tpu.vector_store %arg27[%c10_262, %c0_263], %624 {strides = array<i32>} : memref<16x32xf32, #tpu.memory_space<vmem>>, vector<2x32xf32>,
    %626 = vector.extract_strided_slice %493 {offsets = [0, 0], sizes = [2, 32], strides = [1, 1]} : vector<2x64xf32> to vector<2x32xf32>
    %c6_264 = arith.constant 6 : index
    %c0_265 = arith.constant 0 : index
    %627 = vector.load %arg26[%c6_264, %c0_265] : memref<16x32xf32, #tpu.memory_space<vmem>>, vector<2x32xf32>
    tpu.vector_store %arg26[%c6_264, %c0_265], %626 {strides = array<i32>} : memref<16x32xf32, #tpu.memory_space<vmem>>, vector<2x32xf32>,
    %628 = vector.extract_strided_slice %493 {offsets = [0, 32], sizes = [2, 32], strides = [1, 1]} : vector<2x64xf32> to vector<2x32xf32>
    %c8_266 = arith.constant 8 : index
    %c0_267 = arith.constant 0 : index
    %629 = vector.load %arg27[%c8_266, %c0_267] : memref<16x32xf32, #tpu.memory_space<vmem>>, vector<2x32xf32>
    tpu.vector_store %arg27[%c8_266, %c0_267], %628 {strides = array<i32>} : memref<16x32xf32, #tpu.memory_space<vmem>>, vector<2x32xf32>,
    %630 = vector.extract_strided_slice %523 {offsets = [0, 0], sizes = [2, 32], strides = [1, 1]} : vector<2x64xf32> to vector<2x32xf32>
    %c8_268 = arith.constant 8 : index
    %c0_269 = arith.constant 0 : index
    %631 = vector.load %arg26[%c8_268, %c0_269] : memref<16x32xf32, #tpu.memory_space<vmem>>, vector<2x32xf32>
    tpu.vector_store %arg26[%c8_268, %c0_269], %630 {strides = array<i32>} : memref<16x32xf32, #tpu.memory_space<vmem>>, vector<2x32xf32>,
    %632 = vector.extract_strided_slice %523 {offsets = [0, 32], sizes = [2, 32], strides = [1, 1]} : vector<2x64xf32> to vector<2x32xf32>
    %c6_270 = arith.constant 6 : index
    %c0_271 = arith.constant 0 : index
    %633 = vector.load %arg27[%c6_270, %c0_271] : memref<16x32xf32, #tpu.memory_space<vmem>>, vector<2x32xf32>
    tpu.vector_store %arg27[%c6_270, %c0_271], %632 {strides = array<i32>} : memref<16x32xf32, #tpu.memory_space<vmem>>, vector<2x32xf32>,
    %634 = vector.extract_strided_slice %553 {offsets = [0, 0], sizes = [2, 32], strides = [1, 1]} : vector<2x64xf32> to vector<2x32xf32>
    %c10_272 = arith.constant 10 : index
    %c0_273 = arith.constant 0 : index
    %635 = vector.load %arg26[%c10_272, %c0_273] : memref<16x32xf32, #tpu.memory_space<vmem>>, vector<2x32xf32>
    tpu.vector_store %arg26[%c10_272, %c0_273], %634 {strides = array<i32>} : memref<16x32xf32, #tpu.memory_space<vmem>>, vector<2x32xf32>,
    %636 = vector.extract_strided_slice %553 {offsets = [0, 32], sizes = [2, 32], strides = [1, 1]} : vector<2x64xf32> to vector<2x32xf32>
    %c4_274 = arith.constant 4 : index
    %c0_275 = arith.constant 0 : index
    %637 = vector.load %arg27[%c4_274, %c0_275] : memref<16x32xf32, #tpu.memory_space<vmem>>, vector<2x32xf32>
    tpu.vector_store %arg27[%c4_274, %c0_275], %636 {strides = array<i32>} : memref<16x32xf32, #tpu.memory_space<vmem>>, vector<2x32xf32>,
    %638 = vector.extract_strided_slice %583 {offsets = [0, 0], sizes = [2, 32], strides = [1, 1]} : vector<2x64xf32> to vector<2x32xf32>
    %c12_276 = arith.constant 12 : index
    %c0_277 = arith.constant 0 : index
    %639 = vector.load %arg26[%c12_276, %c0_277] : memref<16x32xf32, #tpu.memory_space<vmem>>, vector<2x32xf32>
    tpu.vector_store %arg26[%c12_276, %c0_277], %638 {strides = array<i32>} : memref<16x32xf32, #tpu.memory_space<vmem>>, vector<2x32xf32>,
    %640 = vector.extract_strided_slice %583 {offsets = [0, 32], sizes = [2, 32], strides = [1, 1]} : vector<2x64xf32> to vector<2x32xf32>
    %c2_278 = arith.constant 2 : index
    %c0_279 = arith.constant 0 : index
    %641 = vector.load %arg27[%c2_278, %c0_279] : memref<16x32xf32, #tpu.memory_space<vmem>>, vector<2x32xf32>
    tpu.vector_store %arg27[%c2_278, %c0_279], %640 {strides = array<i32>} : memref<16x32xf32, #tpu.memory_space<vmem>>, vector<2x32xf32>,
    %642 = vector.extract_strided_slice %613 {offsets = [0, 0], sizes = [2, 32], strides = [1, 1]} : vector<2x64xf32> to vector<2x32xf32>
    %c14_280 = arith.constant 14 : index
    %c0_281 = arith.constant 0 : index
    %643 = vector.load %arg26[%c14_280, %c0_281] : memref<16x32xf32, #tpu.memory_space<vmem>>, vector<2x32xf32>
    tpu.vector_store %arg26[%c14_280, %c0_281], %642 {strides = array<i32>} : memref<16x32xf32, #tpu.memory_space<vmem>>, vector<2x32xf32>,
    %644 = vector.extract_strided_slice %613 {offsets = [0, 32], sizes = [2, 32], strides = [1, 1]} : vector<2x64xf32> to vector<2x32xf32>
    %c0_282 = arith.constant 0 : index
    %c0_283 = arith.constant 0 : index
    %645 = vector.load %arg27[%c0_282, %c0_283] : memref<16x32xf32, #tpu.memory_space<vmem>>, vector<2x32xf32>
    tpu.vector_store %arg27[%c0_282, %c0_283], %644 {strides = array<i32>} : memref<16x32xf32, #tpu.memory_space<vmem>>, vector<2x32xf32>,
    %c0_284 = arith.constant 0 : index
    %c0_285 = arith.constant 0 : index
    %646 = vector.load %arg23[%c0_284, %c0_285] : memref<16x32xf32, #tpu.memory_space<vmem>>, vector<16x32xf32>
    %c0_286 = arith.constant 0 : index
    %c0_287 = arith.constant 0 : index
    %647 = vector.load %arg13[%c0_286, %c0_287] : memref<32x32xf32, #tpu.memory_space<vmem>>, vector<32x32xf32>
    %cst_288 = arith.constant dense<0.000000e+00> : vector<16x32xf32>
    %648 = tpu.matmul %646, %647, %cst_288 {dimension_numbers = #tpu.dot_dimension_numbers<[1], [0], [0], [1], [0, 0, 1, 1], [], []>} : vector<16x32xf32>, vector<32x32xf32>, vector<16x32xf32> -> vector<16x32xf32>
    %649 = math.tanh %648 : vector<16x32xf32>
    %c0_289 = arith.constant 0 : index
    %c0_290 = arith.constant 0 : index
    %650 = vector.load %arg14[%c0_289, %c0_290] : memref<32x6xf32, #tpu.memory_space<vmem>>, vector<32x6xf32>
    %cst_291 = arith.constant dense<0.000000e+00> : vector<16x6xf32>
    %651 = tpu.matmul %649, %650, %cst_291 {dimension_numbers = #tpu.dot_dimension_numbers<[1], [0], [0], [1], [0, 0, 1, 1], [], []>} : vector<16x32xf32>, vector<32x6xf32>, vector<16x6xf32> -> vector<16x6xf32>
    %c0_292 = arith.constant 0 : index
    %c0_293 = arith.constant 0 : index
    %652 = vector.load %arg15[%c0_292, %c0_293] : memref<12x16xf32, #tpu.memory_space<vmem>>, vector<12x16xf32>
    %c0_294 = arith.constant 0 : index
    %c0_295 = arith.constant 0 : index
    %653 = vector.load %arg26[%c0_294, %c0_295] : memref<16x32xf32, #tpu.memory_space<vmem>>, vector<16x32xf32>
    %cst_296 = arith.constant dense<0.000000e+00> : vector<12x32xf32>
    %654 = tpu.matmul %652, %653, %cst_296 {dimension_numbers = #tpu.dot_dimension_numbers<[1], [0], [0], [1], [0, 0, 1, 1], [], []>} : vector<12x16xf32>, vector<16x32xf32>, vector<12x32xf32> -> vector<12x32xf32>
    %c0_297 = arith.constant 0 : index
    %c0_298 = arith.constant 0 : index
    %655 = vector.load %arg15[%c0_297, %c0_298] : memref<12x16xf32, #tpu.memory_space<vmem>>, vector<12x16xf32>
    %c0_299 = arith.constant 0 : index
    %c0_300 = arith.constant 0 : index
    %656 = vector.load %arg27[%c0_299, %c0_300] : memref<16x32xf32, #tpu.memory_space<vmem>>, vector<16x32xf32>
    %cst_301 = arith.constant dense<0.000000e+00> : vector<12x32xf32>
    %657 = tpu.matmul %655, %656, %cst_301 {dimension_numbers = #tpu.dot_dimension_numbers<[1], [0], [0], [1], [0, 0, 1, 1], [], []>} : vector<12x16xf32>, vector<16x32xf32>, vector<12x32xf32> -> vector<12x32xf32>
    %c0_302 = arith.constant 0 : index
    %c0_303 = arith.constant 0 : index
    %658 = vector.load %arg16[%c0_302, %c0_303] : memref<32x32xf32, #tpu.memory_space<vmem>>, vector<32x32xf32>
    %cst_304 = arith.constant dense<0.000000e+00> : vector<12x32xf32>
    %659 = tpu.matmul %654, %658, %cst_304 {dimension_numbers = #tpu.dot_dimension_numbers<[1], [0], [0], [1], [0, 0, 1, 1], [], []>} : vector<12x32xf32>, vector<32x32xf32>, vector<12x32xf32> -> vector<12x32xf32>
    %c0_305 = arith.constant 0 : index
    %c0_306 = arith.constant 0 : index
    %660 = vector.load %arg17[%c0_305, %c0_306] : memref<32x32xf32, #tpu.memory_space<vmem>>, vector<32x32xf32>
    %cst_307 = arith.constant dense<0.000000e+00> : vector<12x32xf32>
    %661 = tpu.matmul %657, %660, %cst_307 {dimension_numbers = #tpu.dot_dimension_numbers<[1], [0], [0], [1], [0, 0, 1, 1], [], []>} : vector<12x32xf32>, vector<32x32xf32>, vector<12x32xf32> -> vector<12x32xf32>
    %662 = arith.addf %659, %661 : vector<12x32xf32>
    %c0_308 = arith.constant 0 : index
    %c0_309 = arith.constant 0 : index
    %663 = vector.load %arg18[%c0_308, %c0_309] : memref<32x32xf32, #tpu.memory_space<vmem>>, vector<32x32xf32>
    %c0_310 = arith.constant 0 : index
    %c0_311 = arith.constant 0 : index
    %664 = vector.load %arg19[%c0_310, %c0_311] : memref<32x4xf32, #tpu.memory_space<vmem>>, vector<32x4xf32>
    %c0_312 = arith.constant 0 : index
    %c0_313 = arith.constant 0 : index
    %665 = vector.load %arg20[%c0_312, %c0_313] : memref<6x3xf32, #tpu.memory_space<vmem>>, vector<6x3xf32>
    %666 = vector.extract_strided_slice %646 {offsets = [0, 0], sizes = [8, 32], strides = [1, 1]} : vector<16x32xf32> to vector<8x32xf32>
    %667 = vector.extract_strided_slice %651 {offsets = [0, 0], sizes = [8, 6], strides = [1, 1]} : vector<16x6xf32> to vector<8x6xf32>
    %668 = tpu.transpose %667, [1, 0] : vector<8x6xf32> -> vector<6x8xf32>
    %cst_314 = arith.constant dense<0xFF800000> : vector<6xf32>
    %669 = vector.multi_reduction <maximumf>, %668, %cst_314 [1] : vector<6x8xf32> to vector<6xf32>
    %cst_315 = arith.constant 0xFF800000 : f32
    %670 = vector.broadcast %cst_315 : f32 to vector<6xf32>
    %671 = arith.maximumf %670, %669 : vector<6xf32>
    %672 = vector.shape_cast %671 : vector<6xf32> to vector<6x1xf32>
    %673 = vector.broadcast %672 : vector<6x1xf32> to vector<6x8xf32>
    %674 = arith.subf %668, %673 : vector<6x8xf32>
    %675 = math.exp %674 : vector<6x8xf32>
    %cst_316 = arith.constant dense<0.000000e+00> : vector<6xf32>
    %676 = vector.multi_reduction <add>, %675, %cst_316 [1] : vector<6x8xf32> to vector<6xf32>
    %677 = vector.shape_cast %676 : vector<6xf32> to vector<6x1xf32>
    %678 = vector.broadcast %677 : vector<6x1xf32> to vector<6x8xf32>
    %679 = arith.divf %675, %678 : vector<6x8xf32>
    %cst_317 = arith.constant dense<0.000000e+00> : vector<6x32xf32>
    %680 = tpu.matmul %679, %666, %cst_317 {dimension_numbers = #tpu.dot_dimension_numbers<[1], [0], [0], [1], [0, 0, 1, 1], [], []>} : vector<6x8xf32>, vector<8x32xf32>, vector<6x32xf32> -> vector<6x32xf32>
    %cst_318 = arith.constant dense<0.000000e+00> : vector<6x32xf32>
    %681 = tpu.matmul %680, %663, %cst_318 {dimension_numbers = #tpu.dot_dimension_numbers<[1], [0], [0], [1], [0, 0, 1, 1], [], []>} : vector<6x32xf32>, vector<32x32xf32>, vector<6x32xf32> -> vector<6x32xf32>
    %682 = vector.extract_strided_slice %662 {offsets = [0, 0], sizes = [6, 32], strides = [1, 1]} : vector<12x32xf32> to vector<6x32xf32>
    %683 = arith.addf %681, %682 : vector<6x32xf32>
    %cst_319 = arith.constant dense<0.000000e+00> : vector<6x4xf32>
    %684 = tpu.matmul %683, %664, %cst_319 {dimension_numbers = #tpu.dot_dimension_numbers<[1], [0], [0], [1], [0, 0, 1, 1], [], []>} : vector<6x32xf32>, vector<32x4xf32>, vector<6x4xf32> -> vector<6x4xf32>
    %685 = tpu.transpose %684, [1, 0] : vector<6x4xf32> -> vector<4x6xf32>
    %cst_320 = arith.constant dense<0xFF800000> : vector<4xf32>
    %686 = vector.multi_reduction <maximumf>, %685, %cst_320 [1] : vector<4x6xf32> to vector<4xf32>
    %cst_321 = arith.constant 0xFF800000 : f32
    %687 = vector.broadcast %cst_321 : f32 to vector<4xf32>
    %688 = arith.maximumf %687, %686 : vector<4xf32>
    %689 = vector.shape_cast %688 : vector<4xf32> to vector<4x1xf32>
    %690 = vector.broadcast %689 : vector<4x1xf32> to vector<4x6xf32>
    %691 = arith.subf %685, %690 : vector<4x6xf32>
    %692 = math.exp %691 : vector<4x6xf32>
    %cst_322 = arith.constant dense<0.000000e+00> : vector<4xf32>
    %693 = vector.multi_reduction <add>, %692, %cst_322 [1] : vector<4x6xf32> to vector<4xf32>
    %694 = vector.shape_cast %693 : vector<4xf32> to vector<4x1xf32>
    %695 = vector.broadcast %694 : vector<4x1xf32> to vector<4x6xf32>
    %696 = arith.divf %692, %695 : vector<4x6xf32>
    %cst_323 = arith.constant dense<0.000000e+00> : vector<4x3xf32>
    %697 = tpu.matmul %696, %665, %cst_323 {dimension_numbers = #tpu.dot_dimension_numbers<[1], [0], [0], [1], [0, 0, 1, 1], [], []>} : vector<4x6xf32>, vector<6x3xf32>, vector<4x3xf32> -> vector<4x3xf32>
    %cst_324 = arith.constant dense<0xFF800000> : vector<4xf32>
    %698 = vector.multi_reduction <maximumf>, %697, %cst_324 [1] : vector<4x3xf32> to vector<4xf32>
    %cst_325 = arith.constant 0xFF800000 : f32
    %699 = vector.broadcast %cst_325 : f32 to vector<4xf32>
    %700 = arith.maximumf %699, %698 : vector<4xf32>
    %701 = vector.shape_cast %700 : vector<4xf32> to vector<4x1xf32>
    %702 = vector.broadcast %701 : vector<4x1xf32> to vector<4x3xf32>
    %703 = arith.subf %697, %702 : vector<4x3xf32>
    %704 = math.exp %703 : vector<4x3xf32>
    %cst_326 = arith.constant dense<0.000000e+00> : vector<4xf32>
    %705 = vector.multi_reduction <add>, %704, %cst_326 [1] : vector<4x3xf32> to vector<4xf32>
    %706 = vector.shape_cast %705 : vector<4xf32> to vector<4x1xf32>
    %707 = vector.broadcast %706 : vector<4x1xf32> to vector<4x3xf32>
    %708 = arith.divf %704, %707 : vector<4x3xf32>
    %709 = tpu.transpose %708, [1, 0] : vector<4x3xf32> -> vector<3x4xf32>
    %c0_327 = arith.constant 0 : index
    %c0_328 = arith.constant 0 : index
    %c0_329 = arith.constant 0 : index
    %710 = vector.load %arg21[%c0_327, %c0_328, %c0_329] : memref<2x3x4xf32, #tpu.memory_space<vmem>>, vector<1x3x4xf32>
    %711 = vector.shape_cast %710 : vector<1x3x4xf32> to vector<3x4xf32>
    %712 = vector.shape_cast %709 : vector<3x4xf32> to vector<1x3x4xf32>
    tpu.vector_store %arg21[%c0_327, %c0_328, %c0_329], %712 {strides = array<i32>} : memref<2x3x4xf32, #tpu.memory_space<vmem>>, vector<1x3x4xf32>,
    %713 = vector.extract_strided_slice %646 {offsets = [8, 0], sizes = [8, 32], strides = [1, 1]} : vector<16x32xf32> to vector<8x32xf32>
    %714 = vector.extract_strided_slice %651 {offsets = [8, 0], sizes = [8, 6], strides = [1, 1]} : vector<16x6xf32> to vector<8x6xf32>
    %715 = tpu.transpose %714, [1, 0] : vector<8x6xf32> -> vector<6x8xf32>
    %cst_330 = arith.constant dense<0xFF800000> : vector<6xf32>
    %716 = vector.multi_reduction <maximumf>, %715, %cst_330 [1] : vector<6x8xf32> to vector<6xf32>
    %cst_331 = arith.constant 0xFF800000 : f32
    %717 = vector.broadcast %cst_331 : f32 to vector<6xf32>
    %718 = arith.maximumf %717, %716 : vector<6xf32>
    %719 = vector.shape_cast %718 : vector<6xf32> to vector<6x1xf32>
    %720 = vector.broadcast %719 : vector<6x1xf32> to vector<6x8xf32>
    %721 = arith.subf %715, %720 : vector<6x8xf32>
    %722 = math.exp %721 : vector<6x8xf32>
    %cst_332 = arith.constant dense<0.000000e+00> : vector<6xf32>
    %723 = vector.multi_reduction <add>, %722, %cst_332 [1] : vector<6x8xf32> to vector<6xf32>
    %724 = vector.shape_cast %723 : vector<6xf32> to vector<6x1xf32>
    %725 = vector.broadcast %724 : vector<6x1xf32> to vector<6x8xf32>
    %726 = arith.divf %722, %725 : vector<6x8xf32>
    %cst_333 = arith.constant dense<0.000000e+00> : vector<6x32xf32>
    %727 = tpu.matmul %726, %713, %cst_333 {dimension_numbers = #tpu.dot_dimension_numbers<[1], [0], [0], [1], [0, 0, 1, 1], [], []>} : vector<6x8xf32>, vector<8x32xf32>, vector<6x32xf32> -> vector<6x32xf32>
    %cst_334 = arith.constant dense<0.000000e+00> : vector<6x32xf32>
    %728 = tpu.matmul %727, %663, %cst_334 {dimension_numbers = #tpu.dot_dimension_numbers<[1], [0], [0], [1], [0, 0, 1, 1], [], []>} : vector<6x32xf32>, vector<32x32xf32>, vector<6x32xf32> -> vector<6x32xf32>
    %729 = vector.extract_strided_slice %662 {offsets = [6, 0], sizes = [6, 32], strides = [1, 1]} : vector<12x32xf32> to vector<6x32xf32>
    %730 = arith.addf %728, %729 : vector<6x32xf32>
    %cst_335 = arith.constant dense<0.000000e+00> : vector<6x4xf32>
    %731 = tpu.matmul %730, %664, %cst_335 {dimension_numbers = #tpu.dot_dimension_numbers<[1], [0], [0], [1], [0, 0, 1, 1], [], []>} : vector<6x32xf32>, vector<32x4xf32>, vector<6x4xf32> -> vector<6x4xf32>
    %732 = tpu.transpose %731, [1, 0] : vector<6x4xf32> -> vector<4x6xf32>
    %cst_336 = arith.constant dense<0xFF800000> : vector<4xf32>
    %733 = vector.multi_reduction <maximumf>, %732, %cst_336 [1] : vector<4x6xf32> to vector<4xf32>
    %cst_337 = arith.constant 0xFF800000 : f32
    %734 = vector.broadcast %cst_337 : f32 to vector<4xf32>
    %735 = arith.maximumf %734, %733 : vector<4xf32>
    %736 = vector.shape_cast %735 : vector<4xf32> to vector<4x1xf32>
    %737 = vector.broadcast %736 : vector<4x1xf32> to vector<4x6xf32>
    %738 = arith.subf %732, %737 : vector<4x6xf32>
    %739 = math.exp %738 : vector<4x6xf32>
    %cst_338 = arith.constant dense<0.000000e+00> : vector<4xf32>
    %740 = vector.multi_reduction <add>, %739, %cst_338 [1] : vector<4x6xf32> to vector<4xf32>
    %741 = vector.shape_cast %740 : vector<4xf32> to vector<4x1xf32>
    %742 = vector.broadcast %741 : vector<4x1xf32> to vector<4x6xf32>
    %743 = arith.divf %739, %742 : vector<4x6xf32>
    %cst_339 = arith.constant dense<0.000000e+00> : vector<4x3xf32>
    %744 = tpu.matmul %743, %665, %cst_339 {dimension_numbers = #tpu.dot_dimension_numbers<[1], [0], [0], [1], [0, 0, 1, 1], [], []>} : vector<4x6xf32>, vector<6x3xf32>, vector<4x3xf32> -> vector<4x3xf32>
    %cst_340 = arith.constant dense<0xFF800000> : vector<4xf32>
    %745 = vector.multi_reduction <maximumf>, %744, %cst_340 [1] : vector<4x3xf32> to vector<4xf32>
    %cst_341 = arith.constant 0xFF800000 : f32
    %746 = vector.broadcast %cst_341 : f32 to vector<4xf32>
    %747 = arith.maximumf %746, %745 : vector<4xf32>
    %748 = vector.shape_cast %747 : vector<4xf32> to vector<4x1xf32>
    %749 = vector.broadcast %748 : vector<4x1xf32> to vector<4x3xf32>
    %750 = arith.subf %744, %749 : vector<4x3xf32>
    %751 = math.exp %750 : vector<4x3xf32>
    %cst_342 = arith.constant dense<0.000000e+00> : vector<4xf32>
    %752 = vector.multi_reduction <add>, %751, %cst_342 [1] : vector<4x3xf32> to vector<4xf32>
    %753 = vector.shape_cast %752 : vector<4xf32> to vector<4x1xf32>
    %754 = vector.broadcast %753 : vector<4x1xf32> to vector<4x3xf32>
    %755 = arith.divf %751, %754 : vector<4x3xf32>
    %756 = tpu.transpose %755, [1, 0] : vector<4x3xf32> -> vector<3x4xf32>
    %c1_343 = arith.constant 1 : index
    %c0_344 = arith.constant 0 : index
    %c0_345 = arith.constant 0 : index
    %757 = vector.load %arg21[%c1_343, %c0_344, %c0_345] : memref<2x3x4xf32, #tpu.memory_space<vmem>>, vector<1x3x4xf32>
    %758 = vector.shape_cast %757 : vector<1x3x4xf32> to vector<3x4xf32>
    %759 = vector.shape_cast %756 : vector<3x4xf32> to vector<1x3x4xf32>
    tpu.vector_store %arg21[%c1_343, %c0_344, %c0_345], %759 {strides = array<i32>} : memref<2x3x4xf32, #tpu.memory_space<vmem>>, vector<1x3x4xf32>,
    return
  }
  func.func @transform_0(%arg0: i32, %arg1: memref<2x8xi32, #tpu.memory_space<smem>>) -> (i32, i32) {
    %c0_i32 = arith.constant 0 : i32
    %c0_i32_0 = arith.constant 0 : i32
    %c0_i32_1 = arith.constant 0 : i32
    return %c0_i32, %c0_i32_0 : i32, i32
  }
  func.func @transform_1(%arg0: i32, %arg1: memref<2x8xi32, #tpu.memory_space<smem>>) -> (i32, i32) {
    %c0_i32 = arith.constant 0 : i32
    %c0_i32_0 = arith.constant 0 : i32
    %c0_i32_1 = arith.constant 0 : i32
    return %c0_i32, %c0_i32_0 : i32, i32
  }
  func.func @transform_2(%arg0: i32, %arg1: memref<2x8xi32, #tpu.memory_space<smem>>) -> (i32, i32) {
    %c0_i32 = arith.constant 0 : i32
    %c0_i32_0 = arith.constant 0 : i32
    %c0_i32_1 = arith.constant 0 : i32
    return %c0_i32, %c0_i32_0 : i32, i32
  }
  func.func @transform_3(%arg0: i32, %arg1: memref<2x8xi32, #tpu.memory_space<smem>>) -> (i32, i32) {
    %c0_i32 = arith.constant 0 : i32
    %c0_i32_0 = arith.constant 0 : i32
    %c0_i32_1 = arith.constant 0 : i32
    return %c0_i32, %c0_i32_0 : i32, i32
  }
  func.func @transform_4(%arg0: i32, %arg1: memref<2x8xi32, #tpu.memory_space<smem>>) -> (i32, i32) {
    %c0_i32 = arith.constant 0 : i32
    %c0_i32_0 = arith.constant 0 : i32
    %c0_i32_1 = arith.constant 0 : i32
    return %c0_i32, %c0_i32_0 : i32, i32
  }
  func.func @transform_5(%arg0: i32, %arg1: memref<2x8xi32, #tpu.memory_space<smem>>) -> (i32, i32) {
    %c0_i32 = arith.constant 0 : i32
    %c0_i32_0 = arith.constant 0 : i32
    %c0_i32_1 = arith.constant 0 : i32
    return %c0_i32, %c0_i32_0 : i32, i32
  }
  func.func @transform_6(%arg0: i32, %arg1: memref<2x8xi32, #tpu.memory_space<smem>>) -> (i32, i32) {
    %c0_i32 = arith.constant 0 : i32
    %c0_i32_0 = arith.constant 0 : i32
    %c0_i32_1 = arith.constant 0 : i32
    return %c0_i32, %c0_i32_0 : i32, i32
  }
  func.func @transform_7(%arg0: i32, %arg1: memref<2x8xi32, #tpu.memory_space<smem>>) -> (i32, i32) {
    %c0_i32 = arith.constant 0 : i32
    %c0_i32_0 = arith.constant 0 : i32
    %c0_i32_1 = arith.constant 0 : i32
    return %c0_i32, %c0_i32_0 : i32, i32
  }
  func.func @transform_8(%arg0: i32, %arg1: memref<2x8xi32, #tpu.memory_space<smem>>) -> (i32, i32) {
    %c0_i32 = arith.constant 0 : i32
    %c0_i32_0 = arith.constant 0 : i32
    %c0_i32_1 = arith.constant 0 : i32
    return %c0_i32, %c0_i32_0 : i32, i32
  }
  func.func @transform_9(%arg0: i32, %arg1: memref<2x8xi32, #tpu.memory_space<smem>>) -> (i32, i32) {
    %c0_i32 = arith.constant 0 : i32
    %c0_i32_0 = arith.constant 0 : i32
    %c0_i32_1 = arith.constant 0 : i32
    return %c0_i32, %c0_i32_0 : i32, i32
  }
  func.func @transform_10(%arg0: i32, %arg1: memref<2x8xi32, #tpu.memory_space<smem>>) -> (i32, i32) {
    %c0_i32 = arith.constant 0 : i32
    %c0_i32_0 = arith.constant 0 : i32
    %c0_i32_1 = arith.constant 0 : i32
    return %c0_i32, %c0_i32_0 : i32, i32
  }
  func.func @transform_11(%arg0: i32, %arg1: memref<2x8xi32, #tpu.memory_space<smem>>) -> (i32, i32) {
    %c0_i32 = arith.constant 0 : i32
    %c0_i32_0 = arith.constant 0 : i32
    %c0_i32_1 = arith.constant 0 : i32
    return %c0_i32, %c0_i32_0 : i32, i32
  }
  func.func @transform_12(%arg0: i32, %arg1: memref<2x8xi32, #tpu.memory_space<smem>>) -> (i32, i32) {
    %c0_i32 = arith.constant 0 : i32
    %c0_i32_0 = arith.constant 0 : i32
    %c0_i32_1 = arith.constant 0 : i32
    return %c0_i32, %c0_i32_0 : i32, i32
  }
  func.func @transform_13(%arg0: i32, %arg1: memref<2x8xi32, #tpu.memory_space<smem>>) -> (i32, i32) {
    %c0_i32 = arith.constant 0 : i32
    %c0_i32_0 = arith.constant 0 : i32
    %c0_i32_1 = arith.constant 0 : i32
    return %c0_i32, %c0_i32_0 : i32, i32
  }
  func.func @transform_14(%arg0: i32, %arg1: memref<2x8xi32, #tpu.memory_space<smem>>) -> (i32, i32) {
    %c0_i32 = arith.constant 0 : i32
    %c0_i32_0 = arith.constant 0 : i32
    %c0_i32_1 = arith.constant 0 : i32
    return %c0_i32, %c0_i32_0 : i32, i32
  }
  func.func @transform_15(%arg0: i32, %arg1: memref<2x8xi32, #tpu.memory_space<smem>>) -> (i32, i32) {
    %c0_i32 = arith.constant 0 : i32
    %c0_i32_0 = arith.constant 0 : i32
    %c0_i32_1 = arith.constant 0 : i32
    return %c0_i32, %c0_i32_0 : i32, i32
  }
  func.func @transform_16(%arg0: i32, %arg1: memref<2x8xi32, #tpu.memory_space<smem>>) -> (i32, i32) {
    %c0_i32 = arith.constant 0 : i32
    %c0_i32_0 = arith.constant 0 : i32
    %c0_i32_1 = arith.constant 0 : i32
    return %c0_i32, %c0_i32_0 : i32, i32
  }
  func.func @transform_17(%arg0: i32, %arg1: memref<2x8xi32, #tpu.memory_space<smem>>) -> (i32, i32) {
    %c0_i32 = arith.constant 0 : i32
    %c0_i32_0 = arith.constant 0 : i32
    %c0_i32_1 = arith.constant 0 : i32
    return %c0_i32, %c0_i32_0 : i32, i32
  }
  func.func @transform_18(%arg0: i32, %arg1: memref<2x8xi32, #tpu.memory_space<smem>>) -> (i32, i32) {
    %c0_i32 = arith.constant 0 : i32
    %c0_i32_0 = arith.constant 0 : i32
    %c0_i32_1 = arith.constant 0 : i32
    return %c0_i32, %c0_i32_0 : i32, i32
  }
  func.func @transform_19(%arg0: i32, %arg1: memref<2x8xi32, #tpu.memory_space<smem>>) -> (i32, i32, i32) {
    %c0_i32 = arith.constant 0 : i32
    %c0_i32_0 = arith.constant 0 : i32
    %c0_i32_1 = arith.constant 0 : i32
    %c0_i32_2 = arith.constant 0 : i32
    return %c0_i32, %c0_i32_0, %c0_i32_1 : i32, i32, i32
  }
}

</mosaic_0001>

<bundles_post_ra>
// kernel: rnns_attnone_forward.1
= control target key start
LH: loop header
LB: loop body
LE: loop exit
PB: predicated region body
PF: predicated region fallthrough
CT: control target
= control target key end

     0   :  { %s6169_s0 = inlined_call_operand.vmem [shape: s32[2,8], index: 0, kind: input, shape index: {}]   ;;  %s6170_s1 = inlined_call_operand.hbm [shape: f32[50,32], index: 1, kind: input, shape index: {}]   ;;  %s6171_s2 = inlined_call_operand.vmem [shape: f32[2,64], index: 2, kind: input, shape index: {}]   ;;  %s6172_s3 = inlined_call_operand.hbm [shape: f32[64,192], index: 3, kind: input, shape index: {}]   ;;  %s6173_s4 = inlined_call_operand.hbm [shape: f32[1,192], index: 4, kind: input, shape index: {}]   ;;  %s6174_s5 = inlined_call_operand.hbm [shape: f32[64,192], index: 5, kind: input, shape index: {}]   ;;  %s6175_s6 = inlined_call_operand.hbm [shape: f32[1,192], index: 6, kind: input, shape index: {}]   ;;  %s6176_s7 = inlined_call_operand.hbm [shape: f32[64,192], index: 7, kind: input, shape index: {}]   ;;  %s6177_s8 = inlined_call_operand.hbm [shape: f32[64,192], index: 8, kind: input, shape index: {}]   ;;  %s6178_s9 = inlined_call_operand.hbm [shape: f32[1,192], index: 9, kind: input, shape index: {}]   ;;  %s6179_s10 = inlined_call_operand.hbm [shape: f32[64,192], index: 10, kind: input, shape index: {}]   ;;  %s6180_s11 = inlined_call_operand.hbm [shape: f32[1,192], index: 11, kind: input, shape index: {}]   ;;  %s6181_s12 = inlined_call_operand.hbm [shape: f32[32,32], index: 12, kind: input, shape index: {}]   ;;  %s6182_s13 = inlined_call_operand.hbm [shape: f32[32,6], index: 13, kind: input, shape index: {}]   ;;  %s6183_s14 = inlined_call_operand.hbm [shape: f32[12,16], index: 14, kind: input, shape index: {}]   ;;  %s6184_s15 = inlined_call_operand.hbm [shape: f32[32,32], index: 15, kind: input, shape index: {}]   ;;  %s6185_s16 = inlined_call_operand.hbm [shape: f32[32,32], index: 16, kind: input, shape index: {}]   ;;  %s6186_s17 = inlined_call_operand.vmem [shape: f32[32,32], index: 17, kind: input, shape index: {}]   ;;  %s6187_s18 = inlined_call_operand.vmem [shape: f32[32,4], index: 18, kind: input, shape index: {}]   ;;  %s6188_s19 = inlined_call_operand.vmem [shape: f32[6,3], index: 19, kind: input, shape index: {}]   ;;  %s6189_s20 = inlined_call_operand.vmem [shape: f32[2,3,4], index: 20, kind: output, shape index: {}]  }
   0x1   :  { %6195 = sst [smem:[#allocation42_spill]] %s6169_s0 }
   0x2   :  { %6196 = sst [smem:[#allocation43_spill]] %s6170_s1  ;;  %s6202_s23 = sld [smem:[#allocation42_spill]] }
   0x3   :  { %6197 = sst [smem:[#allocation44_spill]] %s6171_s2 }
   0x4   :  { %6198 = sst [smem:[#allocation45_spill]] %s6172_s3 }
   0x5   :  { %6199 = sst [smem:[#allocation46_spill]] %s6173_s4 }
   0x6   :  { %6200 = sst [smem:[#allocation47_spill]] %s6183_s14 }
   0x7   :  { %6201 = sst [smem:[#allocation48_spill]] %s6189_s20 }
   0x8   :  { %s25_s14 = sshll.u32 %s6202_s23, 4  ;;  %s26_s14 = int_to_ptr.vmem [resolvable:$true] %s25_s14 }
   0x9   :  { %s4719_s24 = scalar_lea.vmem %s26_s14, 32  ;;  %p4724_p1 = scmp.lt.s32.totalorder %s26_s14, %s26_s14 }
   0xa   :  { %p4720_p0 = scmp.ne.s32.totalorder %s26_s14, %s4719_s24  ;;  %p4725_p2 = scmp.lt.s32.totalorder %s4719_s24, %s4719_s24 }
   0xc   :  { %p4726_p3 = por %p4725_p2, %p4724_p1 }
   0xe   :  { %p4727_p4 = pnand %p4726_p3, %p4720_p0 }
  0x10   :  { %4730 = shalt.err (!%p4727_p4)  }
  0x11   :  { %s5079_s2 = smov [#allocation9]  }
  0x12   :  { %28 = dma.vmem_to_smem %s26_s14, 32, %s5079_s2, [#allocation8] }
  0x13   :  { %5061 = dma.done.wait [#allocation8], 32 }
  0x14   :  { %5062 = vsyncadd [#allocation8], 4294967264 }
  0x15   :  { %30 = sfence }
  0x16   :  { %31 = vsyncpa [#allocation11], 0 }
  0x17   :  { %32 = vsyncpa [#allocation13], 0 }
  0x18   :  { %33 = vsyncpa [#allocation16], 0 }
  0x19   :  { %34 = vsyncpa [#allocation19], 0 }
  0x1a   :  { %35 = vsyncpa [#allocation22], 0 }
  0x1b   :  { %36 = vsyncpa [#allocation25], 0 }
  0x1c   :  { %37 = vsyncpa [#allocation28], 0 }
  0x1d   :  { %38 = vsyncpa [#allocation31], 0  ;;  %s5080_s25 = smov [#allocation12]   ;;  %s6203_s28 = sld [smem:[#allocation45_spill]] }
  0x1e   :  { %s58_s3 = sshll.u32 %s5080_s25, 4  ;;  %s59_s3 = int_to_ptr.vmem [resolvable:$true] %s58_s3 }
  0x23   :  { %s4731_s4 = scalar_lea.hbm %s6203_s28, 2048 }
  0x24   :  { %p4732_p5 = scmp.ne.s32.totalorder %s6203_s28, %s4731_s4  ;;  %p4735_p6 = scmp.lt.u32.totalorder %s4731_s4, %s6203_s28 }
  0x26   :  { %p4737_p7 = pnand %p4735_p6, %p4732_p5 }
  0x28   :  { %4740 = shalt.err (!%p4737_p7)
}
  0x29   :  { %s4741_s21 = scalar_lea.vmem %s59_s3, 2048  ;;  %p4746_p9 = scmp.lt.s32.totalorder %s59_s3, %s59_s3 }
  0x2a   :  { %p4742_p8 = scmp.ne.s32.totalorder %s59_s3, %s4741_s21  ;;  %p4747_p10 = scmp.lt.s32.totalorder %s4741_s21, %s4741_s21 }
  0x2c   :  { %p4748_p11 = por %p4747_p10, %p4746_p9 }
  0x2e   :  { %p4749_p12 = pnand %p4748_p11, %p4742_p8 }
  0x30   :  { %4752 = shalt.err (!%p4749_p12)
}
  0x31   :  { %s5081_s1 = smov 256   ;;  %s5082_s22 = smov 16  }
  0x32   :  { %64 = dma.hbm_to_vmem [thread:$0]  %s6203_s28, 2048, %s59_s3, [#allocation13], %s5081_s1, %s5081_s1, %s5082_s22  }
  0x33   :  { %s5083_s2 = smov [#allocation15]   ;;  %s5084_s26 = smov [#allocation18]  }
  0x34   :  { %s80_s25 = sshll.u32 %s5083_s2, 4  ;;  %s102_s27 = sshll.u32 %s5084_s26, 4  ;;  %s81_s25 = int_to_ptr.vmem [resolvable:$true] %s80_s25  ;;  %s103_s27 = int_to_ptr.vmem [resolvable:$true] %s102_s27 }
  0x35   :  { %s4753_s14 = scalar_lea.hbm %s6174_s5, 2048 }
  0x36   :  { %p4754_p13 = scmp.ne.s32.totalorder %s6174_s5, %s4753_s14  ;;  %p4757_p0 = scmp.lt.u32.totalorder %s4753_s14, %s6174_s5 }
  0x38   :  { %p4759_p1 = pnand %p4757_p0, %p4754_p13 }
  0x3a   :  { %4762 = shalt.err (!%p4759_p1)
}
  0x3b   :  { %s4763_s3 = scalar_lea.vmem %s81_s25, 2048  ;;  %p4768_p3 = scmp.lt.s32.totalorder %s81_s25, %s81_s25 }
  0x3c   :  { %p4764_p2 = scmp.ne.s32.totalorder %s81_s25, %s4763_s3  ;;  %p4769_p4 = scmp.lt.s32.totalorder %s4763_s3, %s4763_s3 }
  0x3e   :  { %p4770_p5 = por %p4769_p4, %p4768_p3 }
  0x40   :  { %p4771_p6 = pnand %p4770_p5, %p4764_p2 }
  0x42   :  { %4774 = shalt.err (!%p4771_p6)
}
  0x43   :  { %86 = dma.hbm_to_vmem [thread:$0]  %s6174_s5, 2048, %s81_s25, [#allocation16], %s5081_s1, %s5081_s1, %s5082_s22  }
  0x44   :  { %s4775_s2 = scalar_lea.hbm %s6176_s7, 2048 }
  0x45   :  { %p4776_p7 = scmp.ne.s32.totalorder %s6176_s7, %s4775_s2  ;;  %p4779_p8 = scmp.lt.u32.totalorder %s4775_s2, %s6176_s7 }
  0x47   :  { %p4781_p9 = pnand %p4779_p8, %p4776_p7 }
  0x49   :  { %4784 = shalt.err (!%p4781_p9)
}
  0x4a   :  { %s4785_s30 = scalar_lea.vmem %s103_s27, 2048  ;;  %p4790_p11 = scmp.lt.s32.totalorder %s103_s27, %s103_s27 }
  0x4b   :  { %p4786_p10 = scmp.ne.s32.totalorder %s103_s27, %s4785_s30  ;;  %p4791_p12 = scmp.lt.s32.totalorder %s4785_s30, %s4785_s30 }
  0x4d   :  { %p4792_p13 = por %p4791_p12, %p4790_p11 }
  0x4f   :  { %p4793_p0 = pnand %p4792_p13, %p4786_p10 }
  0x51   :  { %4796 = shalt.err (!%p4793_p0)
}
  0x52   :  { %108 = dma.hbm_to_vmem [thread:$0]  %s6176_s7, 2048, %s103_s27, [#allocation19], %s5081_s1, %s5081_s1, %s5082_s22  }
  0x53   :  { %s5085_s0 = smov [#allocation21]   ;;  %s5086_s3 = smov [#allocation24]  }
  0x54   :  { %s127_s21 = sshll.u32 %s5085_s0, 4  ;;  %s149_s28 = sshll.u32 %s5086_s3, 4  ;;  %s128_s21 = int_to_ptr.vmem [resolvable:$true] %s127_s21  ;;  %s150_s28 = int_to_ptr.vmem [resolvable:$true] %s149_s28 }
  0x55   :  { %s4797_s20 = scalar_lea.hbm %s6178_s9, 32 }
  0x56   :  { %p4798_p1 = scmp.ne.s32.totalorder %s6178_s9, %s4797_s20  ;;  %p4801_p2 = scmp.lt.u32.totalorder %s4797_s20, %s6178_s9 }
  0x58   :  { %p4803_p3 = pnand %p4801_p2, %p4798_p1 }
  0x5a   :  { %4806 = shalt.err (!%p4803_p3)
}
  0x5b   :  { %s4807_s7 = scalar_lea.vmem %s128_s21, 32  ;;  %p4812_p5 = scmp.lt.s32.totalorder %s128_s21, %s128_s21 }
  0x5c   :  { %p4808_p4 = scmp.ne.s32.totalorder %s128_s21, %s4807_s7  ;;  %p4813_p6 = scmp.lt.s32.totalorder %s4807_s7, %s4807_s7 }
  0x5e   :  { %p4814_p7 = por %p4813_p6, %p4812_p5 }
  0x60   :  { %p4815_p8 = pnand %p4814_p7, %p4808_p4 }
  0x62   :  { %4818 = shalt.err (!%p4815_p8)
}
  0x63   :  { %130 = dma.hbm_to_vmem [thread:$0]  %s6178_s9, 32, %s128_s21, [#allocation22]  }
  0x64   :  { %s4819_s25 = scalar_lea.hbm %s6180_s11, 32 }
  0x65   :  { %p4820_p9 = scmp.ne.s32.totalorder %s6180_s11, %s4819_s25  ;;  %p4823_p10 = scmp.lt.u32.totalorder %s4819_s25, %s6180_s11 }
  0x67   :  { %p4825_p11 = pnand %p4823_p10, %p4820_p9 }
  0x69   :  { %4828 = shalt.err (!%p4825_p11)
}
  0x6a   :  { %s4829_s20 = scalar_lea.vmem %s150_s28, 32  ;;  %p4834_p13 = scmp.lt.s32.totalorder %s150_s28, %s150_s28 }
  0x6b   :  { %p4830_p12 = scmp.ne.s32.totalorder %s150_s28, %s4829_s20  ;;  %p4835_p0 = scmp.lt.s32.totalorder %s4829_s20, %s4829_s20 }
  0x6d   :  { %p4836_p1 = por %p4835_p0, %p4834_p13 }
  0x6f   :  { %p4837_p2 = pnand %p4836_p1, %p4830_p12 }
  0x71   :  { %4840 = shalt.err (!%p4837_p2)
}
  0x72   :  { %152 = dma.hbm_to_vmem [thread:$0]  %s6180_s11, 32, %s150_s28, [#allocation25]  }
  0x73   :  { %s5087_s2 = smov [#allocation27]   ;;  %s5088_s4 = smov [#allocation30]  }
  0x74   :  { %s170_s26 = sshll.u32 %s5087_s2, 4  ;;  %s194_s29 = sshll.u32 %s5088_s4, 4  ;;  %s171_s26 = int_to_ptr.vmem [resolvable:$true] %s170_s26  ;;  %s195_s29 = int_to_ptr.vmem [resolvable:$true] %s194_s29 }
  0x75   :  { %s4841_s14 = scalar_lea.hbm %s6182_s13, 512 }
  0x76   :  { %p4842_p3 = scmp.ne.s32.totalorder %s6182_s13, %s4841_s14  ;;  %p4845_p4 = scmp.lt.u32.totalorder %s4841_s14, %s6182_s13 }
  0x78   :  { %p4847_p5 = pnand %p4845_p4, %p4842_p3 }
  0x7a   :  { %4850 = shalt.err (!%p4847_p5)
}
  0x7b   :  { %s4851_s11 = scalar_lea.vmem %s171_s26, 512  ;;  %p4856_p7 = scmp.lt.s32.totalorder %s171_s26, %s171_s26 }
  0x7c   :  { %p4852_p6 = scmp.ne.s32.totalorder %s171_s26, %s4851_s11  ;;  %p4857_p8 = scmp.lt.s32.totalorder %s4851_s11, %s4851_s11 }
  0x7e   :  { %p4858_p9 = por %p4857_p8, %p4856_p7 }
  0x80   :  { %p4859_p10 = pnand %p4858_p9, %p4852_p6 }
  0x82   :  { %4862 = shalt.err (!%p4859_p10)
}
  0x83   :  { %s5089_s28 = smov 128   ;;  %s5090_s3 = smov 8  }
  0x84   :  { %176 = dma.hbm_to_vmem [thread:$0]  %s6182_s13, 512, %s171_s26, [#allocation28], %s5089_s28, %s5089_s28, %s5090_s3  }
  0x85   :  { %s4863_s21 = scalar_lea.hbm %s6184_s15, 512 }
  0x86   :  { %p4864_p11 = scmp.ne.s32.totalorder %s6184_s15, %s4863_s21  ;;  %p4867_p12 = scmp.lt.u32.totalorder %s4863_s21, %s6184_s15 }
  0x88   :  { %p4869_p13 = pnand %p4867_p12, %p4864_p11 }
  0x8a   :  { %4872 = shalt.err (!%p4869_p13)
}
  0x8b   :  { %s4873_s14 = scalar_lea.vmem %s195_s29, 512  ;;  %p4878_p1 = scmp.lt.s32.totalorder %s195_s29, %s195_s29 }
  0x8c   :  { %p4874_p0 = scmp.ne.s32.totalorder %s195_s29, %s4873_s14  ;;  %p4879_p2 = scmp.lt.s32.totalorder %s4873_s14, %s4873_s14 }
  0x8e   :  { %p4880_p3 = por %p4879_p2, %p4878_p1 }
  0x90   :  { %p4881_p4 = pnand %p4880_p3, %p4874_p0 }
  0x92   :  { %4884 = shalt.err (!%p4881_p4)
}
  0x93   :  { %200 = dma.hbm_to_vmem [thread:$0]  %s6184_s15, 512, %s195_s29, [#allocation31], %s5089_s28, %s5089_s28, %s5090_s3  }
  0x94   :  { %s5091_s30 = smov [#allocation10]   ;;  %s5092_s25 = smov [#allocation14]  }
  0x95   :  { %s44_s5 = sshll.u32 %s5091_s30, 4  ;;  %s71_s0 = sshll.u32 %s5092_s25, 4  ;;  %s45_s5 = int_to_ptr.vmem [resolvable:$true] %s44_s5  ;;  %s72_s0 = int_to_ptr.vmem [resolvable:$true] %s71_s0 }
  0x96   :  { %s6204_s24 = sld [smem:[#allocation43_spill]] }
  0x9c   :  { %s4885_s20 = scalar_lea.hbm %s6204_s24, 896 }
  0x9d   :  { %p4886_p5 = scmp.ne.s32.totalorder %s6204_s24, %s4885_s20  ;;  %p4889_p6 = scmp.lt.u32.totalorder %s4885_s20, %s6204_s24 }
  0x9f   :  { %p4891_p7 = pnand %p4889_p6, %p4886_p5 }
  0xa1   :  { %4894 = shalt.err (!%p4891_p7)
}
  0xa2   :  { %s4895_s15 = scalar_lea.vmem %s45_s5, 896  ;;  %p4900_p9 = scmp.lt.s32.totalorder %s45_s5, %s45_s5 }
  0xa3   :  { %p4896_p8 = scmp.ne.s32.totalorder %s45_s5, %s4895_s15  ;;  %p4901_p10 = scmp.lt.s32.totalorder %s4895_s15, %s4895_s15 }
  0xa5   :  { %p4902_p11 = por %p4901_p10, %p4900_p9 }
  0xa7   :  { %p4903_p12 = pnand %p4902_p11, %p4896_p8 }
  0xa9   :  { %4906 = shalt.err (!%p4903_p12)
}
  0xaa   :  { %50 = dma.hbm_to_vmem [thread:$0]  %s6204_s24, 896, %s45_s5, [#allocation11], %s5089_s28, %s5089_s28, %s5090_s3  }
  0xab   :  { %s6205_s13 = sld [smem:[#allocation46_spill]] }
  0xb1   :  { %s4907_s26 = scalar_lea.hbm %s6205_s13, 32 }
  0xb2   :  { %p4908_p13 = scmp.ne.s32.totalorder %s6205_s13, %s4907_s26  ;;  %p4911_p0 = scmp.lt.u32.totalorder %s4907_s26, %s6205_s13 }
  0xb4   :  { %p4913_p1 = pnand %p4911_p0, %p4908_p13 }
  0xb6   :  { %4916 = shalt.err (!%p4913_p1)
}
  0xb7   :  { %s4917_s20 = scalar_lea.vmem %s72_s0, 32  ;;  %p4922_p3 = scmp.lt.s32.totalorder %s72_s0, %s72_s0 }
  0xb8   :  { %p4918_p2 = scmp.ne.s32.totalorder %s72_s0, %s4917_s20  ;;  %p4923_p4 = scmp.lt.s32.totalorder %s4917_s20, %s4917_s20 }
  0xba   :  { %p4924_p5 = por %p4923_p4, %p4922_p3 }
  0xbc   :  { %p4925_p6 = pnand %p4924_p5, %p4918_p2 }
  0xbe   :  { %4928 = shalt.err (!%p4925_p6)
}
  0xbf   :  { %74 = dma.hbm_to_vmem [thread:$0]  %s6205_s13, 32, %s72_s0, [#allocation13]  }
  0xc0   :  { %s5093_s9 = smov [#allocation17]   ;;  %s5094_s2 = smov [#allocation20]  }
  0xc1   :  { %s93_s21 = sshll.u32 %s5093_s9, 4  ;;  %s114_s4 = sshll.u32 %s5094_s2, 4  ;;  %s94_s21 = int_to_ptr.vmem [resolvable:$true] %s93_s21  ;;  %s115_s4 = int_to_ptr.vmem [resolvable:$true] %s114_s4 }
  0xc2   :  { %s4929_s7 = scalar_lea.hbm %s6175_s6, 32 }
  0xc3   :  { %p4930_p7 = scmp.ne.s32.totalorder %s6175_s6, %s4929_s7  ;;  %p4933_p8 = scmp.lt.u32.totalorder %s4929_s7, %s6175_s6 }
  0xc5   :  { %p4935_p9 = pnand %p4933_p8, %p4930_p7 }
  0xc7   :  { %4938 = shalt.err (!%p4935_p9)
}
  0xc8   :  { %s4939_s0 = scalar_lea.vmem %s94_s21, 32  ;;  %p4944_p11 = scmp.lt.s32.totalorder %s94_s21, %s94_s21 }
  0xc9   :  { %p4940_p10 = scmp.ne.s32.totalorder %s94_s21, %s4939_s0  ;;  %p4945_p12 = scmp.lt.s32.totalorder %s4939_s0, %s4939_s0 }
  0xcb   :  { %p4946_p13 = por %p4945_p12, %p4944_p11 }
  0xcd   :  { %p4947_p0 = pnand %p4946_p13, %p4940_p10 }
  0xcf   :  { %4950 = shalt.err (!%p4947_p0)
}
  0xd0   :  { %96 = dma.hbm_to_vmem [thread:$0]  %s6175_s6, 32, %s94_s21, [#allocation16]  }
  0xd1   :  { %s4951_s20 = scalar_lea.hbm %s6177_s8, 2048 }
  0xd2   :  { %p4952_p1 = scmp.ne.s32.totalorder %s6177_s8, %s4951_s20  ;;  %p4955_p2 = scmp.lt.u32.totalorder %s4951_s20, %s6177_s8 }
  0xd4   :  { %p4957_p3 = pnand %p4955_p2, %p4952_p1 }
  0xd6   :  { %4960 = shalt.err (!%p4957_p3)
}
  0xd7   :  { %s4961_s15 = scalar_lea.vmem %s115_s4, 2048  ;;  %p4966_p5 = scmp.lt.s32.totalorder %s115_s4, %s115_s4 }
  0xd8   :  { %p4962_p4 = scmp.ne.s32.totalorder %s115_s4, %s4961_s15  ;;  %p4967_p6 = scmp.lt.s32.totalorder %s4961_s15, %s4961_s15 }
  0xda   :  { %p4968_p7 = por %p4967_p6, %p4966_p5 }
  0xdc   :  { %p4969_p8 = pnand %p4968_p7, %p4962_p4 }
  0xde   :  { %4972 = shalt.err (!%p4969_p8)
}
  0xdf   :  { %120 = dma.hbm_to_vmem [thread:$0]  %s6177_s8, 2048, %s115_s4, [#allocation19], %s5081_s1, %s5081_s1, %s5082_s22  }
  0xe0   :  { %s5095_s29 = smov [#allocation23]   ;;  %s5096_s27 = smov [#allocation26]  }
  0xe1   :  { %s136_s7 = sshll.u32 %s5095_s29, 4  ;;  %s158_s14 = sshll.u32 %s5096_s27, 4  ;;  %s137_s7 = int_to_ptr.vmem [resolvable:$true] %s136_s7  ;;  %s159_s14 = int_to_ptr.vmem [resolvable:$true] %s158_s14 }
  0xe2   :  { %s4973_s0 = scalar_lea.hbm %s6179_s10, 2048 }
  0xe3   :  { %p4974_p9 = scmp.ne.s32.totalorder %s6179_s10, %s4973_s0  ;;  %p4977_p10 = scmp.lt.u32.totalorder %s4973_s0, %s6179_s10 }
  0xe5   :  { %p4979_p11 = pnand %p4977_p10, %p4974_p9 }
  0xe7   :  { %4982 = shalt.err (!%p4979_p11)
}
  0xe8   :  { %s4983_s8 = scalar_lea.vmem %s137_s7, 2048  ;;  %p4988_p13 = scmp.lt.s32.totalorder %s137_s7, %s137_s7 }
  0xe9   :  { %p4984_p12 = scmp.ne.s32.totalorder %s137_s7, %s4983_s8  ;;  %p4989_p0 = scmp.lt.s32.totalorder %s4983_s8, %s4983_s8 }
  0xeb   :  { %p4990_p1 = por %p4989_p0, %p4988_p13 }
  0xed   :  { %p4991_p2 = pnand %p4990_p1, %p4984_p12 }
  0xef   :  { %4994 = shalt.err (!%p4991_p2)
}
  0xf0   :  { %142 = dma.hbm_to_vmem [thread:$0]  %s6179_s10, 2048, %s137_s7, [#allocation22], %s5081_s1, %s5081_s1, %s5082_s22  }
  0xf1   :  { %s4995_s9 = scalar_lea.hbm %s6181_s12, 512 }
  0xf2   :  { %p4996_p3 = scmp.ne.s32.totalorder %s6181_s12, %s4995_s9  ;;  %p4999_p4 = scmp.lt.u32.totalorder %s4995_s9, %s6181_s12 }
  0xf4   :  { %p5001_p5 = pnand %p4999_p4, %p4996_p3 }
  0xf6   :  { %5004 = shalt.err (!%p5001_p5)
}
  0xf7   :  { %s5005_s29 = scalar_lea.vmem %s159_s14, 512  ;;  %p5010_p7 = scmp.lt.s32.totalorder %s159_s14, %s159_s14 }
  0xf8   :  { %p5006_p6 = scmp.ne.s32.totalorder %s159_s14, %s5005_s29  ;;  %p5011_p8 = scmp.lt.s32.totalorder %s5005_s29, %s5005_s29 }
  0xfa   :  { %p5012_p9 = por %p5011_p8, %p5010_p7 }
  0xfc   :  { %p5013_p10 = pnand %p5012_p9, %p5006_p6 }
  0xfe   :  { %5016 = shalt.err (!%p5013_p10)
}
  0xff   :  { %164 = dma.hbm_to_vmem [thread:$0]  %s6181_s12, 512, %s159_s14, [#allocation25], %s5089_s28, %s5089_s28, %s5090_s3  }
 0x100   :  { %s5097_s22 = smov [#allocation29]   ;;  %s5098_s27 = smov [#allocation32]  }
 0x101   :  { %s182_s7 = sshll.u32 %s5097_s22, 4  ;;  %s206_s26 = sshll.u32 %s5098_s27, 4  ;;  %s183_s7 = int_to_ptr.vmem [resolvable:$true] %s182_s7  ;;  %s207_s26 = int_to_ptr.vmem [resolvable:$true] %s206_s26 }
 0x102   :  { %s6206_s13 = sld [smem:[#allocation47_spill]] }
 0x108   :  { %s5017_s25 = scalar_lea.hbm %s6206_s13, 256 }
 0x109   :  { %p5018_p11 = scmp.ne.s32.totalorder %s6206_s13, %s5017_s25  ;;  %p5021_p12 = scmp.lt.u32.totalorder %s5017_s25, %s6206_s13 }
 0x10b   :  { %p5023_p13 = pnand %p5021_p12, %p5018_p11 }
 0x10d   :  { %5026 = shalt.err (!%p5023_p13)
}
 0x10e   :  { %s5027_s12 = scalar_lea.vmem %s183_s7, 256  ;;  %p5032_p1 = scmp.lt.s32.totalorder %s183_s7, %s183_s7 }
 0x10f   :  { %p5028_p0 = scmp.ne.s32.totalorder %s183_s7, %s5027_s12  ;;  %p5033_p2 = scmp.lt.s32.totalorder %s5027_s12, %s5027_s12 }
 0x111   :  { %p5034_p3 = por %p5033_p2, %p5032_p1 }
 0x113   :  { %p5035_p4 = pnand %p5034_p3, %p5028_p0 }
 0x115   :  { %5038 = shalt.err (!%p5035_p4)
}
 0x116   :  { %188 = dma.hbm_to_vmem [thread:$0]  %s6206_s13, 256, %s183_s7, [#allocation28], %s5089_s28, %s5089_s28, %s5090_s3  }
 0x117   :  { %s5039_s9 = scalar_lea.hbm %s6185_s16, 512 }
 0x118   :  { %p5040_p5 = scmp.ne.s32.totalorder %s6185_s16, %s5039_s9  ;;  %p5043_p6 = scmp.lt.u32.totalorder %s5039_s9, %s6185_s16 }
 0x11a   :  { %p5045_p7 = pnand %p5043_p6, %p5040_p5 }
 0x11c   :  { %5048 = shalt.err (!%p5045_p7)
}
 0x11d   :  { %s5049_s29 = scalar_lea.vmem %s207_s26, 512  ;;  %p5054_p9 = scmp.lt.s32.totalorder %s207_s26, %s207_s26 }
 0x11e   :  { %p5050_p8 = scmp.ne.s32.totalorder %s207_s26, %s5049_s29  ;;  %p5055_p10 = scmp.lt.s32.totalorder %s5049_s29, %s5049_s29 }
 0x120   :  { %p5056_p11 = por %p5055_p10, %p5054_p9 }
 0x122   :  { %p5057_p12 = pnand %p5056_p11, %p5050_p8 }
 0x124   :  { %5060 = shalt.err (!%p5057_p12)
}
 0x125   :  { %212 = dma.hbm_to_vmem [thread:$0]  %s6185_s16, 512, %s207_s26, [#allocation31], %s5089_s28, %s5089_s28, %s5090_s3  }
 0x126   :  { %5063 = dma.done.wait [#allocation11], 896  }
 0x127   :  { %5064 = vsyncadd [#allocation11], 4294966400 }
 0x128   :  { %5065 = dma.done.wait [#allocation13], 2080  }
 0x129   :  { %5066 = vsyncadd [#allocation13], 4294965216 }
 0x12a   :  { %5067 = dma.done.wait [#allocation16], 2080  }
 0x12b   :  { %5068 = vsyncadd [#allocation16], 4294965216 }
 0x12c   :  { %5069 = dma.done.wait [#allocation19], 4096  }
 0x12d   :  { %5070 = vsyncadd [#allocation19], 4294963200 }
 0x12e   :  { %5071 = dma.done.wait [#allocation22], 2080  }
 0x12f   :  { %5072 = vsyncadd [#allocation22], 4294965216 }
 0x130   :  { %5073 = dma.done.wait [#allocation25], 544  }
 0x131   :  { %5074 = vsyncadd [#allocation25], 4294966752 }
 0x132   :  { %5075 = dma.done.wait [#allocation28], 768  }
 0x133   :  { %5076 = vsyncadd [#allocation28], 4294966528 }
 0x134   :  { %5077 = dma.done.wait [#allocation31], 1024  }
 0x135   :  { %5078 = vsyncadd [#allocation31], 4294966272  ;;  %s3944_s22 = sld [smem:[#allocation9 + $0x6]]  ;;  %s3942_s7 = sld [smem:[#allocation9 + $0x4]]  ;;  %vm267_vm0 = vcmask 253952   ;;  %v542_v0 = vld [vmem:[#allocation15 + $0x8] sm:$0xff] }
 0x136   :  { %s3945_s27 = sld [smem:[#allocation9 + $0x7]]  ;;  %s3943_s16 = sld [smem:[#allocation9 + $0x5]]  ;;  %v544_v1 = vld [vmem:[#allocation15 + $0x18] sm:$0xff]  ;;  %v429_v7 = vld [vmem:[#allocation12 + $0x8] sm:$0xff]  ;;  %v543_v19 = vld [vmem:[#allocation15 + $0x10] sm:$0xff]  ;;  %v5100_v21 = vmov 0.0  }
 0x137   :  { %s5425_s28 = sld [smem:[#allocation9 + $0x85]]  ;;  %s5427_s3 = sld [smem:[#allocation9 + $0x84]]  ;;  %v5445_v4 = vpack.c.bf16 %v544_v1, %v542_v0  ;;  %v431_v16 = vld [vmem:[#allocation12 + $0x18] sm:$0xff]  ;;  %v541_v18 = vld [vmem:[#allocation15] sm:$0xff]  ;;  %636 = vmatprep.mubr.f32.mxu1 %v5100_v21  ;;  %527 = vmatprep.mubr.f32.mxu0 %v5100_v21  ;;  %v430_v23 = vld [vmem:[#allocation12 + $0x10] sm:$0xff]  ;;  %vm456_vm1 = vcmask 523264  }
 0x138   :  { %s5429_s26 = sld [smem:[#allocation9 + $0x87]]  ;;  %s5431_s30 = sld [smem:[#allocation9 + $0x86]]  ;;  %v4196_v17 = vpack.c.bf16 %v431_v16, %v429_v7  ;;  %v428_v20 = vld [vmem:[#allocation12] sm:$0xff]  ;;  %v5520_v22 = vpack.c.bf16 %v543_v19, %v541_v18  ;;  %v546_v24 = vld [vmem:[#allocation15 + $0x28] sm:$0xff]  ;;  %v435_v29 = vld [vmem:[#allocation12 + $0x38] sm:$0xff]  ;;  %vm274_vm2 = vcmask 516352  }
 0x139   :  { %s5433_s0 = sld [smem:[#allocation9 + $0x1]]  ;;  %s5435_s13 = sld [smem:[#allocation9 + $0x3]]  ;;  %4213 = vmatprep.subr.bf16.mxu1 %v5445_v4  ;;  %v548_v25 = vld [vmem:[#allocation15 + $0x38] sm:$0xff]  ;;  %v4198_v26 = vpack.c.bf16 %v430_v23, %v428_v20  ;;  %v433_v28 = vld [vmem:[#allocation12 + $0x28] sm:$0xff]  ;;  %v547_v32 = vld [vmem:[#allocation15 + $0x30] sm:$0xff]  ;;  %vm1377_vm3 = vcmask 517120  }
 0x13a   :  { %s5437_s25 = sld [smem:[#allocation9]]  ;;  %s5439_s11 = sld [smem:[#allocation9 + $0x2]]  ;;  %4197 = vmatprep.subr.bf16.mxu0 %v4196_v17  ;;  %v5524_v27 = vpack.c.bf16 %v548_v25, %v546_v24  ;;  %v545_v30 = vld [vmem:[#allocation15 + $0x20] sm:$0xff]  ;;  %v4200_v31 = vpack.c.bf16 %v435_v29, %v433_v28  ;;  %v434_v34 = vld [vmem:[#allocation12 + $0x30] sm:$0xff]  ;;  %4215 = vmatpush1.bf16.msra.mxu1 %v5520_v22  ;;  %v552_v38 = vld [vmem:[#allocation15 + $0x58] sm:$0xff]  ;;  %vm1383_vm4 = vcmask 519170  }
 0x13b   :  { %s327_s23 = scalar_lea.vmem [#allocation10], %s3944_s22  ;;  %s307_s8 = scalar_lea.vmem [#allocation10], %s3942_s7  ;;  %v432_v33 = vld [vmem:[#allocation12 + $0x20] sm:$0xff]  ;;  %4199 = vmatpush1.bf16.msra.mxu0 %v4198_v26  ;;  %v5535_v35 = vpack.c.bf16 %v547_v32, %v545_v30  ;;  %v550_v37 = vld [vmem:[#allocation15 + $0x48] sm:$0xff]  ;;  %v439_v41 = vld [vmem:[#allocation12 + $0x58] sm:$0xff]  ;;  %v446_v26 = vlaneseq  ;;  %vm1389_vm5 = vcmask 521220  }
 0x13c   :  { %v5441_v2 = vld [vmem:[%s327_s23] sm:$0x1]  ;;  %s5099_s4 = smov 32   ;;  %s337_s12 = scalar_lea.vmem [#allocation10], %s3945_s27  ;;  %v4202_v36 = vpack.c.bf16 %v434_v34, %v432_v33  ;;  %4217 = vmatprep.subr.bf16.mxu1 %v5524_v27  ;;  %4201 = vmatprep.subr.bf16.mxu0 %v4200_v31  ;;  %v5538_v40 = vpack.c.bf16 %v552_v38, %v550_v37  ;;  %v551_v43 = vld [vmem:[#allocation15 + $0x50] sm:$0xff]  ;;  %v436_v45 = vld [vmem:[#allocation12 + $0x40] sm:$0xff] }
 0x13d   :  { %v5443_v3 = vld [vmem:[%s307_s8] sm:$0x1]  ;;  %332 = vrot.lane.b32.xlu1 %v5441_v2, %s5099_s4  ;;  %329 = vst.msk [vmem:[#allocation3 + $0x6] sm:$0x1] %vm267_vm0, %v5441_v2  ;;  %s317_s14 = scalar_lea.vmem [#allocation10], %s3943_s16  ;;  %s397_s20 = scalar_lea.vmem [#allocation10], %s5425_s28 }
 0x13e   :  { %312 = vrot.lane.b32.xlu0 %v5443_v3, %s5099_s4  ;;  %309 = vst.msk [vmem:[#allocation3 + $0x4] sm:$0x1] %vm267_vm0, %v5443_v3  ;;  %v5455_v5 = vld [vmem:[%s337_s12] sm:$0x1]  ;;  %s387_s5 = scalar_lea.vmem [#allocation10], %s5427_s3  ;;  %s417_s24 = scalar_lea.vmem [#allocation10], %s5429_s26  ;;  %4219 = vmatpush1.bf16.msra.mxu1 %v5535_v35 }
 0x13f   :  { %v5457_v6 = vld [vmem:[%s317_s14] sm:$0x1]  ;;  %339 = vst.msk [vmem:[#allocation3 + $0x7] sm:$0x1] %vm267_vm0, %v5455_v5  ;;  %s407_s9 = scalar_lea.vmem [#allocation10], %s5431_s30  ;;  %s277_s2 = scalar_lea.vmem [#allocation10], %s5433_s0  ;;  %4203 = vmatpush1.bf16.msra.mxu0 %v4202_v36  ;;  %4221 = vmatprep.subr.bf16.mxu1 %v5538_v40 }
 0x140   :  { %319 = vst.msk [vmem:[#allocation3 + $0x5] sm:$0x1] %vm267_vm0, %v5457_v6  ;;  %v5464_v8 = vld [vmem:[%s397_s20] sm:$0x1]  ;;  %s297_s15 = scalar_lea.vmem [#allocation10], %s5435_s13  ;;  %s265_s6 = scalar_lea.vmem [#allocation10], %s5437_s25 }
 0x141   :  { %v5467_v9 = vld [vmem:[%s387_s5] sm:$0x1]  ;;  %399 = vst.msk [vmem:[#allocation3 + $0xd] sm:$0x1] %vm267_vm0, %v5464_v8  ;;  %342 = vrot.lane.b32.xlu1 %v5455_v5, %s5099_s4  ;;  %s287_s21 = scalar_lea.vmem [#allocation10], %s5439_s11  ;;  %s5516_s29 = sld [smem:[#allocation9 + $0x82]] }
 0x142   :  { %389 = vst.msk [vmem:[#allocation3 + $0xc] sm:$0x1] %vm267_vm0, %v5467_v9  ;;  %v5475_v10 = vld [vmem:[%s417_s24] sm:$0x1]  ;;  %322 = vrot.lane.b32.xlu0 %v5457_v6, %s5099_s4  ;;  %s5522_s10 = sld [smem:[#allocation9 + $0x83]]  ;;  %s5526_s1 = sld [smem:[#allocation9 + $0x80]] }
 0x143   :  { %v5478_v11 = vld [vmem:[%s407_s9] sm:$0x1]  ;;  %419 = vst.msk [vmem:[#allocation3 + $0xf] sm:$0x1] %vm267_vm0, %v5475_v10  ;;  %s5532_s22 = sld [smem:[#allocation9 + $0x81]]  ;;  %v438_v46 = vld [vmem:[#allocation12 + $0x50] sm:$0xff] }
 0x144   :  { %409 = vst.msk [vmem:[#allocation3 + $0xe] sm:$0x1] %vm267_vm0, %v5478_v11  ;;  %v5485_v12 = vld [vmem:[%s277_s2] sm:$0x1]  ;;  %v554_v47 = vld [vmem:[#allocation15 + $0x68] sm:$0xff]  ;;  %v556_v49 = vld [vmem:[#allocation15 + $0x78] sm:$0xff]  ;;  %v4206_v53 = vpack.c.bf16 %v438_v46, %v436_v45 }
 0x145   :  { %v5488_v13 = vld [vmem:[%s297_s15] sm:$0x1]  ;;  %279 = vst.msk [vmem:[#allocation3 + $0x1] sm:$0x1] %vm267_vm0, %v5485_v12  ;;  %280 = vst.msk [vmem:[#allocation2 + $0x2] sm:$0x1] %vm267_vm0, %v5485_v12  ;;  %402 = vrot.lane.b32.xlu1 %v5464_v8, %s5099_s4  ;;  %v5561_v57 = vpack.c.bf16 %v556_v49, %v554_v47 }
 0x146   :  { %299 = vst.msk [vmem:[#allocation3 + $0x3] sm:$0x1] %vm267_vm0, %v5488_v13  ;;  %300 = vst.msk [vmem:[#allocation2 + $0x6] sm:$0x1] %vm267_vm0, %v5488_v13  ;;  %v5503_v14 = vld [vmem:[%s265_s6] sm:$0x1]  ;;  %392 = vrot.lane.b32.xlu0 %v5467_v9, %s5099_s4 }
 0x147   :  { %v5506_v15 = vld [vmem:[%s287_s21] sm:$0x1]  ;;  %268 = vst.msk [vmem:[#allocation3] sm:$0x1] %vm267_vm0, %v5503_v14  ;;  %269 = vst.msk [vmem:[#allocation2] sm:$0x1] %vm267_vm0, %v5503_v14 }
 0x148   :  { %289 = vst.msk [vmem:[#allocation3 + $0x2] sm:$0x1] %vm267_vm0, %v5506_v15  ;;  %290 = vst.msk [vmem:[#allocation2 + $0x4] sm:$0x1] %vm267_vm0, %v5506_v15  ;;  %v437_v39 = vld [vmem:[#allocation12 + $0x48] sm:$0xff]  ;;  %s367_s7 = scalar_lea.vmem [#allocation10], %s5516_s29 }
 0x149   :  { %v549_v42 = vld [vmem:[#allocation15 + $0x40] sm:$0xff]  ;;  %v4204_v44 = vpack.c.bf16 %v439_v41, %v437_v39  ;;  %422 = vrot.lane.b32.xlu1 %v5475_v10, %s5099_s4  ;;  %s377_s27 = scalar_lea.vmem [#allocation10], %s5522_s10  ;;  %v443_v54 = vld [vmem:[#allocation12 + $0x78] sm:$0xff]  ;;  %s347_s16 = scalar_lea.vmem [#allocation10], %s5526_s1  ;;  %v442_v62 = vld [vmem:[#allocation12 + $0x70] sm:$0xff]  ;;  %v447_v28 = vshrl.u32 %v446_v26, 7 }
 0x14a   :  { %412 = vrot.lane.b32.xlu0 %v5478_v11, %s5099_s4  ;;  %v5545_v48 = vld [vmem:[%s367_s7] sm:$0x1]  ;;  %v5553_v52 = vpack.c.bf16 %v551_v43, %v549_v42  ;;  %v555_v59 = vld [vmem:[#allocation15 + $0x70] sm:$0xff]  ;;  %v440_v60 = vld [vmem:[#allocation12 + $0x60] sm:$0xff]  ;;  %s357_s28 = scalar_lea.vmem [#allocation10], %s5532_s22  ;;  %s6207_s30 = sld [smem:[#allocation44_spill]] }
 0x14b   :  { %v441_v50 = vld [vmem:[#allocation12 + $0x68] sm:$0xff]  ;;  %369 = vst.msk [vmem:[#allocation3 + $0xa] sm:$0x1] %vm267_vm0, %v5545_v48  ;;  %370 = vst.msk [vmem:[#allocation2 + $0x5] sm:$0x1] %vm267_vm0, %v5545_v48  ;;  %4205 = vmatprep.subr.bf16.mxu0 %v4204_v44  ;;  %s5101_s0 = smov 64   ;;  %v4210_v1 = vpack.c.bf16 %v442_v62, %v440_v60 }
 0x14c   :  { %v378_v51 = vld [vmem:[%s377_s27] sm:$0x1]  ;;  %v4208_v58 = vpack.c.bf16 %v443_v54, %v441_v50  ;;  %4223 = vmatpush1.bf16.msra.mxu1 %v5553_v52  ;;  %4207 = vmatpush1.bf16.msra.mxu0 %v4206_v53  ;;  %v5615_v29 = vsub.s32 0, %v447_v28  ;;  %v557_v30 = vld [vmem:[#allocation17] sm:$0x3]  ;;  %v5628_v44 = vsub.s32 1, %v447_v28 }
 0x14d   :  { %v553_v55 = vld [vmem:[#allocation15 + $0x60] sm:$0xff]  ;;  %379 = vst.msk [vmem:[#allocation3 + $0xb] sm:$0x1] %vm267_vm0, %v378_v51  ;;  %380 = vst.msk [vmem:[#allocation2 + $0x7] sm:$0x1] %vm267_vm0, %v378_v51  ;;  %4225 = vmatprep.subr.bf16.mxu1 %v5561_v57  ;;  %vm1395_vm6 = vcmask 523270  }
 0x14e   :  { %v5559_v56 = vld [vmem:[%s347_s16] sm:$0x1]  ;;  %v5575_v0 = vpack.c.bf16 %v555_v59, %v553_v55  ;;  %4209 = vmatprep.subr.bf16.mxu0 %v4208_v58  ;;  %v444_v31 = vld [vmem:[#allocation14] sm:$0x3]  ;;  %v5618_v32 = vrot.slane %v557_v30, %v5615_v29  ;;  %v5631_v45 = vrot.slane %v557_v30, %v5628_v44  ;;  %vm2468_vm7 = vcmask 254976   ;;  %s6208_s10 = sld [smem:[#allocation48_spill]] }
 0x14f   :  { %349 = vst.msk [vmem:[#allocation3 + $0x8] sm:$0x1] %vm267_vm0, %v5559_v56  ;;  %350 = vst.msk [vmem:[#allocation2 + $0x1] sm:$0x1] %vm267_vm0, %v5559_v56  ;;  %v358_v61 = vld [vmem:[%s357_s28] sm:$0x1]  ;;  %v5621_v33 = vrot.slane %v444_v31, %v5615_v29  ;;  %v5634_v46 = vrot.slane %v444_v31, %v5628_v44 }
 0x150   :  { %v540_v63 = vld [vmem:[%s6207_s30] sm:$0x3]  ;;  %359 = vst.msk [vmem:[#allocation3 + $0x9] sm:$0x1] %vm267_vm0, %v358_v61  ;;  %360 = vst.msk [vmem:[#allocation2 + $0x3] sm:$0x1] %vm267_vm0, %v358_v61  ;;  %4227 = vmatpush1.bf16.msra.mxu1 %v5575_v0  ;;  %4211 = vmatpush1.bf16.msra.mxu0 %v4210_v1 }
 0x151   :  { %659 = vrot.lane.b32.xlu1 %v540_v63, %s5101_s0  ;;  %4229 = vmatprep.subr.bf16.mxu0 %v5445_v4  ;;  %vm2538_vm8 = vcmask 261120   ;;  %vm3081_vm9 = vcmask 62464   ;;  %vm2477_vm10 = vcmask 257026   ;;  %vm2711_vm11 = vcmask 130048  }
 0x152   :  { %4245 = vmatprep.subr.bf16.mxu1 %v5445_v4  ;;  %vm2486_vm12 = vcmask 259076   ;;  %vm2495_vm13 = vcmask 261126   ;;  %vm5102_vm14 = vmmov 0   ;;  %vm3093_vm15 = vcmask 64512  }
 0x153   :  { %3956 = vmatmul.mubr.msk.f32.vlgmr.msra.gmra.mrb[0].mxu1 %vm456_vm1, %v540_v63 }
 0x154   :  { %4247 = vmatpush1.bf16.msra.mxu1 %v5520_v22  ;;  %836 = vmatprep.mubr.f32.mxu1 %v5100_v21 }
 0x155   :  { %282 = vrot.lane.b32.xlu1 %v5485_v12, %s5099_s4  ;;  %4249 = vmatprep.subr.bf16.mxu1 %v5524_v27 }
 0x158   :  { %4251 = vmatpush1.bf16.msra.mxu1 %v5535_v35 }
 0x159   :  { %302 = vrot.lane.b32.xlu1 %v5488_v13, %s5099_s4  ;;  %4253 = vmatprep.subr.bf16.mxu1 %v5538_v40 }
 0x15c   :  { %4255 = vmatpush1.bf16.msra.mxu1 %v5553_v52 }
 0x15d   :  { %362 = vrot.lane.b32.xlu1 %v358_v61, %s5099_s4  ;;  %4257 = vmatprep.subr.bf16.mxu1 %v5561_v57 }
 0x160   :  { %4259 = vmatpush1.bf16.msra.mxu1 %v5575_v0 }
 0x161   :  { %382 = vrot.lane.b32.xlu1 %v378_v51, %s5099_s4  ;;  %4277 = vmatprep.subr.bf16.mxu1 %v5445_v4 }
 0x1af   :  { %v333_v7 = vpop.permute.xlu1 %332 }
 0x1b0   :  { %v313_v12 = vpop.permute.xlu0 %312  ;;  %335 = vst.msk [vmem:[#allocation2 + $0x2] sm:$0x1] %vm274_vm2, %v333_v7 }
 0x1b1   :  { %315 = vst.msk [vmem:[#allocation2 + $0x6] sm:$0x1] %vm274_vm2, %v313_v12 }
 0x1b3   :  { %v343_v13 = vpop.permute.xlu1 %342 }
 0x1b4   :  { %v323_v16 = vpop.permute.xlu0 %322  ;;  %345 = vst.msk [vmem:[#allocation2] sm:$0x1] %vm274_vm2, %v343_v13 }
 0x1b5   :  { %325 = vst.msk [vmem:[#allocation2 + $0x4] sm:$0x1] %vm274_vm2, %v323_v16 }
 0x1b7   :  { %v403_v17 = vpop.permute.xlu1 %402 }
 0x1b8   :  { %v393_v18 = vpop.permute.xlu0 %392  ;;  %405 = vst.msk [vmem:[#allocation2 + $0x5] sm:$0x1] %vm274_vm2, %v403_v17 }
 0x1b9   :  { %395 = vst.msk [vmem:[#allocation2 + $0x7] sm:$0x1] %vm274_vm2, %v393_v18 }
 0x1bb   :  { %v423_v19 = vpop.permute.xlu1 %422 }
 0x1bc   :  { %v413_v20 = vpop.permute.xlu0 %412  ;;  %425 = vst.msk [vmem:[#allocation2 + $0x1] sm:$0x1] %vm274_vm2, %v423_v19 }
 0x1bd   :  { %415 = vst.msk [vmem:[#allocation2 + $0x3] sm:$0x1] %vm274_vm2, %v413_v20 }
 0x1c3   :  { %v660_v47 = vpop.permute.xlu1 %659 }
 0x1c4   :  { %v426_v23 = vld [vmem:[#allocation2] sm:$0xff] }
 0x1c5   :  { %3954 = vmatmul.mubr.msk.f32.vlgmr.msra.gmra.mrb[0].mxu0 %vm456_vm1, %v426_v23 }
 0x1c6   :  { %4231 = vmatpush1.bf16.msra.mxu0 %v5520_v22  ;;  %533 = vmatprep.mubr.f32.mxu0 %v5100_v21 }
 0x1c7   :  { %4233 = vmatprep.subr.bf16.mxu0 %v5524_v27  ;;  %v283_v58 = vpop.permute.xlu1 %282 }
 0x1c8   :  { %285 = vst.msk [vmem:[#allocation2 + $0xc] sm:$0x1] %vm274_vm2, %v283_v58 }
 0x1c9   :  { %330 = vst.msk [vmem:[#allocation2 + $0xc] sm:$0x1] %vm267_vm0, %v5441_v2 }
 0x1ca   :  { %4235 = vmatpush1.bf16.msra.mxu0 %v5535_v35 }
 0x1cb   :  { %4237 = vmatprep.subr.bf16.mxu0 %v5538_v40  ;;  %v303_v59 = vpop.permute.xlu1 %302 }
 0x1cc   :  { %305 = vst.msk [vmem:[#allocation2 + $0x8] sm:$0x1] %vm274_vm2, %v303_v59 }
 0x1cd   :  { %310 = vst.msk [vmem:[#allocation2 + $0x8] sm:$0x1] %vm267_vm0, %v5443_v3 }
 0x1ce   :  { %4239 = vmatpush1.bf16.msra.mxu0 %v5553_v52 }
 0x1cf   :  { %4241 = vmatprep.subr.bf16.mxu0 %v5561_v57  ;;  %v363_v61 = vpop.permute.xlu1 %362 }
 0x1d0   :  { %365 = vst.msk [vmem:[#allocation2 + $0xd] sm:$0x1] %vm274_vm2, %v363_v61 }
 0x1d1   :  { %410 = vst.msk [vmem:[#allocation2 + $0xd] sm:$0x1] %vm267_vm0, %v5478_v11 }
 0x1d2   :  { %4243 = vmatpush1.bf16.msra.mxu0 %v5575_v0 }
 0x1d3   :  { %4261 = vmatprep.subr.bf16.mxu0 %v5445_v4  ;;  %v383_v62 = vpop.permute.xlu1 %382 }
 0x1d4   :  { %385 = vst.msk [vmem:[#allocation2 + $0x9] sm:$0x1] %vm274_vm2, %v383_v62 }
 0x1d5   :  { %390 = vst.msk [vmem:[#allocation2 + $0x9] sm:$0x1] %vm267_vm0, %v5467_v9 }
 0x226   :  { %v638_v24 = vpop.f32.mrb[0].mxu1 }
 0x227   :  { %v640_v25 = vpop.f32.mrb[1].mxu1  ;;  %v639_v34 = vadd.f32 %v638_v24, %v5618_v32 }
 0x228   :  { %v641_v49 = vadd.f32 %v640_v25, %v5631_v45 }
 0x298   :  { %v529_v36 = vpop.f32.mrb[0].mxu0 }
 0x299   :  { %v5625_v37 = vadd.f32 %v529_v36, %v5621_v33  ;;  %v531_v38 = vpop.f32.mrb[1].mxu0 }
 0x29a   :  { %v5638_v53 = vadd.f32 %v531_v38, %v5634_v46 }
 0x29b   :  { %v643_v39 = vadd.f32 %v639_v34, %v5625_v37 }
 0x29d   :  { %v3957_v41 = vmul.f32 -1.442695, %v643_v39 }
 0x29f   :  { %4595 = vpow2.f32 %v3957_v41 }
 0x2a9   :  { %v4596_v42 = vpop.eup %4595 }
 0x2aa   :  { %v647_v43 = vadd.f32 1.0, %v4596_v42 }
 0x2ac   :  { %4597 = vrcp.f32 %v647_v43 }
 0x2b6   :  { %v4598_v50 = vpop.eup %4597 }
 0x2b7   :  { %v650_v51 = vmul.f32 %v4598_v50, %v641_v49  ;;  %v662_v54 = vmul.f32 %v4598_v50, %v660_v47  ;;  %v653_v2 = vsub.f32 1.0, %v4598_v50 }
 0x2b9   :  { %v651_v55 = vadd.f32 %v650_v51, %v5638_v53 }
 0x2bb   :  { %4599 = vtanh.f32 %v651_v55 }
 0x2c5   :  { %v4600_v60 = vpop.eup %4599 }
 0x2c6   :  { %655 = vrot.lane.b32.xlu0 %v4600_v60, %s5101_s0 }
 0x2ca   :  { %271 = vrot.lane.b32.xlu0 %v5503_v14, %s5099_s4 }
 0x2ce   :  { %292 = vrot.lane.b32.xlu0 %v5506_v15, %s5099_s4 }
 0x2d2   :  { %352 = vrot.lane.b32.xlu0 %v5559_v56, %s5099_s4 }
 0x2d6   :  { %372 = vrot.lane.b32.xlu0 %v5545_v48, %s5099_s4 }
 0x338   :  { %v656_v3 = vpop.permute.xlu0 %655 }
 0x339   :  { %v658_v11 = vmul.f32 %v656_v3, %v653_v2 }
 0x33b   :  { %v663_v63 = vadd.f32 %v662_v54, %v658_v11 }
 0x33c   :  { %v272_v1 = vpop.permute.xlu0 %271 }
 0x33d   :  { %665 = vrot.lane.b32.xlu0 %v663_v63, %s5101_s0  ;;  %275 = vst.msk [vmem:[#allocation2 + $0xe] sm:$0x1] %vm274_vm2, %v272_v1  ;;  %v762_v20 = vrot.slane %v663_v63, 6 }
 0x33e   :  { %340 = vst.msk [vmem:[#allocation2 + $0xe] sm:$0x1] %vm267_vm0, %v5455_v5 }
 0x340   :  { %v293_v9 = vpop.permute.xlu0 %292 }
 0x341   :  { %295 = vst.msk [vmem:[#allocation2 + $0xa] sm:$0x1] %vm274_vm2, %v293_v9 }
 0x342   :  { %320 = vst.msk [vmem:[#allocation2 + $0xa] sm:$0x1] %vm267_vm0, %v5457_v6 }
 0x344   :  { %v353_v14 = vpop.permute.xlu0 %352 }
 0x345   :  { %355 = vst.msk [vmem:[#allocation2 + $0xf] sm:$0x1] %vm274_vm2, %v353_v14 }
 0x346   :  { %420 = vst.msk [vmem:[#allocation2 + $0xf] sm:$0x1] %vm267_vm0, %v5475_v10 }
 0x348   :  { %v373_v15 = vpop.permute.xlu0 %372 }
 0x349   :  { %375 = vst.msk [vmem:[#allocation2 + $0xb] sm:$0x1] %vm274_vm2, %v373_v15  ;;  %vm3361_vm2 = vcmask 1045504  }
 0x34a   :  { %400 = vst.msk [vmem:[#allocation2 + $0xb] sm:$0x1] %vm267_vm0, %v5464_v8  ;;  %vm3599_vm0 = vcmask 1041408  }
 0x351   :  { %v427_v48 = vld [vmem:[#allocation2 + $0x8] sm:$0xff] }
 0x352   :  { %3955 = vmatmul.mubr.msk.f32.gmra.mrb[2].mxu0 %vm456_vm1, %v427_v48 }
 0x353   :  { %733 = vmatprep.mubr.f32.mxu0 %v5100_v21 }
 0x3af   :  { %v666_v5 = vpop.permute.xlu0 %665 }
 0x3b0   :  { %1378 = vst.msk [vmem:[#allocation4] sm:$0x3] %vm1377_vm3, %v666_v5  ;;  %1379 = vst.msk [vmem:[#allocation5 + $0xe] sm:$0x3] %vm1377_vm3, %v666_v5  ;;  %3958 = vmatmul.mubr.msk.f32.vlgmr.msra.gmra.mrb[4].mxu0 %vm456_vm1, %v666_v5 }
 0x3b1   :  { %4263 = vmatpush1.bf16.msra.mxu0 %v5520_v22  ;;  %939 = vmatprep.mubr.f32.mxu0 %v5100_v21 }
 0x3b2   :  { %4265 = vmatprep.subr.bf16.mxu0 %v5524_v27 }
 0x3b5   :  { %4267 = vmatpush1.bf16.msra.mxu0 %v5535_v35 }
 0x3b6   :  { %4269 = vmatprep.subr.bf16.mxu0 %v5538_v40 }
 0x3b9   :  { %4271 = vmatpush1.bf16.msra.mxu0 %v5553_v52 }
 0x3ba   :  { %4273 = vmatprep.subr.bf16.mxu0 %v5561_v57 }
 0x3bd   :  { %4275 = vmatpush1.bf16.msra.mxu0 %v5575_v0 }
 0x3be   :  { %4293 = vmatprep.subr.bf16.mxu0 %v5445_v4 }
 0x425   :  { %v5689_v6 = vpop.f32.mrb[2].mxu0 }
 0x426   :  { %v5691_v8 = vpop.f32.mrb[3].mxu0 }
 0x483   :  { %v735_v10 = vpop.f32.mrb[4].mxu0 }
 0x484   :  { %v736_v56 = vadd.f32 %v735_v10, %v5618_v32  ;;  %v737_v7 = vpop.f32.mrb[5].mxu0 }
 0x485   :  { %v738_v19 = vadd.f32 %v737_v7, %v5631_v45 }
 0x486   :  { %v741_v12 = vrot.slane %v736_v56, 6 }
 0x487   :  { %v751_v23 = vrot.slane %v738_v19, 6 }
 0x488   :  { %v743_v13 = vadd.f32 %v741_v12, %v5625_v37 }
 0x48a   :  { %v3959_v16 = vmul.f32 -1.442695, %v743_v13 }
 0x48c   :  { %4601 = vpow2.f32 %v3959_v16 }
 0x496   :  { %v4602_v17 = vpop.eup %4601 }
 0x497   :  { %v747_v18 = vadd.f32 1.0, %v4602_v17 }
 0x499   :  { %4603 = vrcp.f32 %v747_v18 }
 0x4a3   :  { %v4604_v24 = vpop.eup %4603 }
 0x4a4   :  { %v753_v25 = vmul.f32 %v4604_v24, %v751_v23  ;;  %v764_v26 = vmul.f32 %v4604_v24, %v762_v20  ;;  %v756_v31 = vsub.f32 1.0, %v4604_v24 }
 0x4a6   :  { %v754_v28 = vadd.f32 %v753_v25, %v5638_v53 }
 0x4a8   :  { %4605 = vtanh.f32 %v754_v28 }
 0x4b2   :  { %v4606_v30 = vpop.eup %4605 }
 0x4b3   :  { %758 = vrot.lane.b32.xlu1 %v4606_v30, %s5101_s0 }
 0x525   :  { %v759_v34 = vpop.permute.xlu1 %758 }
 0x526   :  { %v761_v36 = vmul.f32 %v759_v34, %v756_v31 }
 0x528   :  { %v5698_v38 = vadd.f32 %v764_v26, %v761_v36 }
 0x52a   :  { %v767_v39 = vrot.slane %v5698_v38, 2  ;;  %v865_v11 = vrot.slane %v5698_v38, 6 }
 0x52c   :  { %768 = vrot.lane.b32.xlu0 %v767_v39, %s5101_s0  ;;  %v5753_v39 = vadd.f32 %v5689_v6, %v5621_v33 }
 0x59e   :  { %v769_v41 = vpop.permute.xlu0 %768 }
 0x59f   :  { %3960 = vmatmul.mubr.msk.f32.vlgmr.msra.gmra.mrb[2].mxu1 %vm456_vm1, %v769_v41 }
 0x5a0   :  { %4279 = vmatpush1.bf16.msra.mxu1 %v5520_v22  ;;  %1042 = vmatprep.mubr.f32.mxu1 %v5100_v21 }
 0x5a1   :  { %4281 = vmatprep.subr.bf16.mxu1 %v5524_v27 }
 0x5a4   :  { %4283 = vmatpush1.bf16.msra.mxu1 %v5535_v35 }
 0x5a5   :  { %4285 = vmatprep.subr.bf16.mxu1 %v5538_v40 }
 0x5a8   :  { %4287 = vmatpush1.bf16.msra.mxu1 %v5553_v52 }
 0x5a9   :  { %4289 = vmatprep.subr.bf16.mxu1 %v5561_v57 }
 0x5ac   :  { %4291 = vmatpush1.bf16.msra.mxu1 %v5575_v0 }
 0x5ad   :  { %4309 = vmatprep.subr.bf16.mxu1 %v5445_v4 }
 0x672   :  { %v838_v42 = vpop.f32.mrb[2].mxu1 }
 0x673   :  { %v839_v43 = vadd.f32 %v838_v42, %v5618_v32  ;;  %v840_v47 = vpop.f32.mrb[3].mxu1 }
 0x674   :  { %v841_v58 = vadd.f32 %v840_v47, %v5631_v45 }
 0x675   :  { %v844_v49 = vrot.slane %v839_v43, 4 }
 0x676   :  { %v854_v59 = vrot.slane %v841_v58, 4 }
 0x677   :  { %v846_v50 = vadd.f32 %v844_v49, %v5625_v37 }
 0x679   :  { %v3961_v51 = vmul.f32 -1.442695, %v846_v50 }
 0x67b   :  { %4607 = vpow2.f32 %v3961_v51 }
 0x685   :  { %v4608_v54 = vpop.eup %4607 }
 0x686   :  { %v850_v55 = vadd.f32 1.0, %v4608_v54 }
 0x688   :  { %4609 = vrcp.f32 %v850_v55  ;;  %v5760_v55 = vadd.f32 %v5691_v8, %v5634_v46 }
 0x692   :  { %v4610_v60 = vpop.eup %4609 }
 0x693   :  { %v856_v61 = vmul.f32 %v4610_v60, %v854_v59  ;;  %v859_v3 = vsub.f32 1.0, %v4610_v60  ;;  %v867_v1 = vmul.f32 %v4610_v60, %v865_v11 }
 0x695   :  { %v857_v62 = vadd.f32 %v856_v61, %v5638_v53 }
 0x697   :  { %4611 = vtanh.f32 %v857_v62 }
 0x6a1   :  { %v4612_v2 = vpop.eup %4611 }
 0x6a2   :  { %861 = vrot.lane.b32.xlu1 %v4612_v2, %s5101_s0 }
 0x714   :  { %v862_v63 = vpop.permute.xlu1 %861 }
 0x715   :  { %v864_v9 = vmul.f32 %v862_v63, %v859_v3 }
 0x717   :  { %v5718_v14 = vadd.f32 %v867_v1, %v864_v9 }
 0x719   :  { %v870_v15 = vrot.slane %v5718_v14, 4  ;;  %v968_v26 = vrot.slane %v5718_v14, 6 }
 0x71b   :  { %871 = vrot.lane.b32.xlu0 %v870_v15, %s5101_s0 }
 0x78d   :  { %v872_v48 = vpop.permute.xlu0 %871 }
 0x78e   :  { %3962 = vmatmul.mubr.msk.f32.vlgmr.msra.gmra.mrb[6].mxu0 %vm456_vm1, %v872_v48 }
 0x78f   :  { %4295 = vmatpush1.bf16.msra.mxu0 %v5520_v22  ;;  %1137 = vmatprep.mubr.f32.mxu0 %v5100_v21 }
 0x790   :  { %4297 = vmatprep.subr.bf16.mxu0 %v5524_v27 }
 0x793   :  { %4299 = vmatpush1.bf16.msra.mxu0 %v5535_v35 }
 0x794   :  { %4301 = vmatprep.subr.bf16.mxu0 %v5538_v40 }
 0x797   :  { %4303 = vmatpush1.bf16.msra.mxu0 %v5553_v52 }
 0x798   :  { %4305 = vmatprep.subr.bf16.mxu0 %v5561_v57 }
 0x79b   :  { %4307 = vmatpush1.bf16.msra.mxu0 %v5575_v0 }
 0x79c   :  { %4325 = vmatprep.subr.bf16.mxu0 %v5445_v4 }
 0x861   :  { %v941_v5 = vpop.f32.mrb[6].mxu0 }
 0x862   :  { %v942_v10 = vadd.f32 %v941_v5, %v5618_v32  ;;  %v943_v56 = vpop.f32.mrb[7].mxu0 }
 0x863   :  { %v944_v18 = vadd.f32 %v943_v56, %v5631_v45 }
 0x864   :  { %v947_v7 = vrot.slane %v942_v10, 2 }
 0x865   :  { %v957_v19 = vrot.slane %v944_v18, 2 }
 0x866   :  { %v949_v12 = vadd.f32 %v947_v7, %v5625_v37 }
 0x868   :  { %v3963_v13 = vmul.f32 -1.442695, %v949_v12 }
 0x86a   :  { %4613 = vpow2.f32 %v3963_v13 }
 0x874   :  { %v4614_v16 = vpop.eup %4613 }
 0x875   :  { %v953_v17 = vadd.f32 1.0, %v4614_v16 }
 0x877   :  { %4615 = vrcp.f32 %v953_v17 }
 0x881   :  { %v4616_v20 = vpop.eup %4615 }
 0x882   :  { %v959_v23 = vmul.f32 %v4616_v20, %v957_v19  ;;  %v962_v25 = vsub.f32 1.0, %v4616_v20  ;;  %v970_v28 = vmul.f32 %v4616_v20, %v968_v26 }
 0x884   :  { %v960_v24 = vadd.f32 %v959_v23, %v5638_v53 }
 0x886   :  { %4617 = vtanh.f32 %v960_v24 }
 0x890   :  { %v4618_v4 = vpop.eup %4617 }
 0x891   :  { %964 = vrot.lane.b32.xlu1 %v4618_v4, %s5101_s0 }
 0x903   :  { %v965_v37 = vpop.permute.xlu1 %964 }
 0x904   :  { %v967_v30 = vmul.f32 %v965_v37, %v962_v25 }
 0x906   :  { %v5738_v31 = vadd.f32 %v970_v28, %v967_v30 }
 0x908   :  { %v973_v34 = vrot.slane %v5738_v31, 6 }
 0x90a   :  { %974 = vrot.lane.b32.xlu0 %v973_v34, %s5101_s0 }
 0x97c   :  { %v975_v36 = vpop.permute.xlu0 %974 }
 0x97d   :  { %3964 = vmatmul.mubr.msk.f32.vlgmr.msra.gmra.mrb[4].mxu1 %vm456_vm1, %v975_v36 }
 0x97e   :  { %4311 = vmatpush1.bf16.msra.mxu1 %v5520_v22  ;;  %1240 = vmatprep.mubr.f32.mxu1 %v5100_v21 }
 0x97f   :  { %4313 = vmatprep.subr.bf16.mxu1 %v5524_v27 }
 0x982   :  { %4315 = vmatpush1.bf16.msra.mxu1 %v5535_v35 }
 0x983   :  { %4317 = vmatprep.subr.bf16.mxu1 %v5538_v40 }
 0x986   :  { %4319 = vmatpush1.bf16.msra.mxu1 %v5553_v52 }
 0x987   :  { %4321 = vmatprep.subr.bf16.mxu1 %v5561_v57 }
 0x98a   :  { %4323 = vmatpush1.bf16.msra.mxu1 %v5575_v0 }
 0xa50   :  { %v1044_v53 = vpop.f32.mrb[4].mxu1 }
 0xa51   :  { %v1045_v41 = vadd.f32 %v1044_v53, %v5618_v32  ;;  %v1046_v42 = vpop.f32.mrb[5].mxu1 }
 0xa52   :  { %v1047_v51 = vadd.f32 %v1046_v42, %v5631_v45 }
 0xa53   :  { %v1049_v43 = vadd.f32 %v1045_v41, %v5753_v39 }
 0xa55   :  { %v3965_v47 = vmul.f32 -1.442695, %v1049_v43 }
 0xa57   :  { %4619 = vpow2.f32 %v3965_v47 }
 0xa61   :  { %v4620_v49 = vpop.eup %4619 }
 0xa62   :  { %v1053_v50 = vadd.f32 1.0, %v4620_v49 }
 0xa64   :  { %4621 = vrcp.f32 %v1053_v50 }
 0xa6e   :  { %v4622_v54 = vpop.eup %4621 }
 0xa6f   :  { %v1056_v58 = vmul.f32 %v4622_v54, %v1047_v51  ;;  %v1059_v59 = vsub.f32 1.0, %v4622_v54  ;;  %v1066_v61 = vmul.f32 %v4622_v54, %v973_v34 }
 0xa71   :  { %v1057_v33 = vadd.f32 %v1056_v58, %v5760_v55 }
 0xa73   :  { %4623 = vtanh.f32 %v1057_v33 }
 0xa7d   :  { %v4624_v6 = vpop.eup %4623 }
 0xa7e   :  { %1061 = vrot.lane.b32.xlu1 %v4624_v6, %s5101_s0 }
 0xaf0   :  { %v1062_v60 = vpop.permute.xlu1 %1061 }
 0xaf1   :  { %v1064_v62 = vmul.f32 %v1062_v60, %v1059_v59 }
 0xaf3   :  { %v1067_v2 = vadd.f32 %v1066_v61, %v1064_v62 }
 0xaf5   :  { %1069 = vrot.lane.b32.xlu0 %v1067_v2, %s5101_s0 }
 0xb67   :  { %v1070_v3 = vpop.permute.xlu0 %1069 }
 0xb68   :  { %1399 = vst.msk [vmem:[#allocation4 + $0x8] sm:$0x3] %vm1377_vm3, %v1070_v3  ;;  %1400 = vst.msk [vmem:[#allocation5 + $0x6] sm:$0x3] %vm1377_vm3, %v1070_v3  ;;  %3966 = vmatmul.mubr.msk.f32.vlgmr.msra.gmra.mrb[8].mxu0 %vm456_vm1, %v1070_v3  ;;  %vm3357_vm3 = vcmask 48128  }
 0xb69   :  { %4327 = vmatpush1.bf16.msra.mxu0 %v5520_v22  ;;  %1343 = vmatprep.mubr.f32.mxu0 %v5100_v21 }
 0xb6a   :  { %4329 = vmatprep.subr.bf16.mxu0 %v5524_v27 }
 0xb6d   :  { %4331 = vmatpush1.bf16.msra.mxu0 %v5535_v35 }
 0xb6e   :  { %4333 = vmatprep.subr.bf16.mxu0 %v5538_v40  ;;  %v1166_v40 = vrot.slane %v1067_v2, 6 }
 0xb71   :  { %4335 = vmatpush1.bf16.msra.mxu0 %v5553_v52 }
 0xb72   :  { %4337 = vmatprep.subr.bf16.mxu0 %v5561_v57 }
 0xb75   :  { %4339 = vmatpush1.bf16.msra.mxu0 %v5575_v0 }
 0xc3b   :  { %v1139_v46 = vpop.f32.mrb[8].mxu0 }
 0xc3c   :  { %v1140_v8 = vadd.f32 %v1139_v46, %v5618_v32  ;;  %v1141_v11 = vpop.f32.mrb[9].mxu0 }
 0xc3d   :  { %v1142_v35 = vadd.f32 %v1141_v11, %v5631_v45 }
 0xc3e   :  { %v1145_v63 = vrot.slane %v1140_v8, 6 }
 0xc3f   :  { %v1155_v52 = vrot.slane %v1142_v35, 6  ;;  %v1442_v35 = vld [vmem:[#allocation20 + $0x28] sm:$0xff] }
 0xc40   :  { %v1147_v22 = vadd.f32 %v1145_v63, %v5753_v39 }
 0xc42   :  { %v3967_v1 = vmul.f32 -1.442695, %v1147_v22 }
 0xc44   :  { %4625 = vpow2.f32 %v3967_v1  ;;  %v1438_v1 = vld [vmem:[#allocation20 + $0x8] sm:$0xff] }
 0xc4e   :  { %v4626_v27 = vpop.eup %4625 }
 0xc4f   :  { %v1151_v9 = vadd.f32 1.0, %v4626_v27  ;;  %v1437_v27 = vld [vmem:[#allocation20] sm:$0xff] }
 0xc51   :  { %4627 = vrcp.f32 %v1151_v9  ;;  %v1439_v9 = vld [vmem:[#allocation20 + $0x10] sm:$0xff] }
 0xc5b   :  { %v4628_v15 = vpop.eup %4627 }
 0xc5c   :  { %v1157_v57 = vmul.f32 %v4628_v15, %v1155_v52  ;;  %v1168_v48 = vmul.f32 %v4628_v15, %v1166_v40  ;;  %v1160_v10 = vsub.f32 1.0, %v4628_v15  ;;  %v1444_v40 = vld [vmem:[#allocation20 + $0x38] sm:$0xff]  ;;  %v4342_v52 = vpack.c.bf16 %v1439_v9, %v1437_v27 }
 0xc5d   :  { %v4344_v15 = vpack.c.bf16 %v1444_v40, %v1442_v35  ;;  %v1426_v9 = vld [vmem:[#allocation18 + $0x38] sm:$0xff] }
 0xc5e   :  { %v1158_v0 = vadd.f32 %v1157_v57, %v5760_v55  ;;  %v1441_v57 = vld [vmem:[#allocation20 + $0x20] sm:$0xff] }
 0xc60   :  { %4629 = vtanh.f32 %v1158_v0  ;;  %v1448_v0 = vld [vmem:[#allocation20 + $0x58] sm:$0xff] }
 0xc6a   :  { %v4630_v5 = vpop.eup %4629 }
 0xc6b   :  { %1162 = vrot.lane.b32.xlu1 %v4630_v5, %s5101_s0 }
 0xcdd   :  { %v1163_v56 = vpop.permute.xlu1 %1162 }
 0xcde   :  { %v1165_v7 = vmul.f32 %v1163_v56, %v1160_v10  ;;  %v1445_v10 = vld [vmem:[#allocation20 + $0x40] sm:$0xff]  ;;  %v1447_v56 = vld [vmem:[#allocation20 + $0x50] sm:$0xff] }
 0xce0   :  { %v1169_v12 = vadd.f32 %v1168_v48, %v1165_v7  ;;  %v1446_v48 = vld [vmem:[#allocation20 + $0x48] sm:$0xff]  ;;  %v4350_v7 = vpack.c.bf16 %v1447_v56, %v1445_v10  ;;  %v1429_v10 = vld [vmem:[#allocation18 + $0x50] sm:$0xff] }
 0xce1   :  { %v4348_v5 = vpack.c.bf16 %v1448_v0, %v1446_v48  ;;  %v1430_v48 = vld [vmem:[#allocation18 + $0x58] sm:$0xff] }
 0xce2   :  { %v1171_v13 = vrot.slane %v1169_v12, 2  ;;  %v1269_v41 = vrot.slane %v1169_v12, 6 }
 0xce4   :  { %1172 = vrot.lane.b32.xlu0 %v1171_v13, %s5101_s0  ;;  %v1452_v13 = vld [vmem:[#allocation20 + $0x78] sm:$0xff] }
 0xd56   :  { %v1173_v16 = vpop.permute.xlu0 %1172 }
 0xd57   :  { %3968 = vmatmul.mubr.msk.f32.vlgmr.msra.gmra.mrb[6].mxu1 %vm456_vm1, %v1173_v16 }
 0xd58   :  { %1523 = vmatprep.mubr.f32.mxu1 %v5100_v21 }
 0xe2a   :  { %v1242_v17 = vpop.f32.mrb[6].mxu1 }
 0xe2b   :  { %v1243_v18 = vadd.f32 %v1242_v17, %v5618_v32  ;;  %v1244_v19 = vpop.f32.mrb[7].mxu1  ;;  %v1449_v17 = vld [vmem:[#allocation20 + $0x60] sm:$0xff] }
 0xe2c   :  { %v1245_v26 = vadd.f32 %v1244_v19, %v5631_v45 }
 0xe2d   :  { %v1248_v20 = vrot.slane %v1243_v18, 4  ;;  %v1451_v18 = vld [vmem:[#allocation20 + $0x70] sm:$0xff] }
 0xe2e   :  { %v1258_v37 = vrot.slane %v1245_v26, 4  ;;  %v4354_v19 = vpack.c.bf16 %v1451_v18, %v1449_v17  ;;  %v1637_v26 = vld [vmem:[#allocation23 + $0x10] sm:$0xff]  ;;  %v1431_v17 = vld [vmem:[#allocation18 + $0x60] sm:$0xff] }
 0xe2f   :  { %v1250_v23 = vadd.f32 %v1248_v20, %v5753_v39  ;;  %v1636_v20 = vld [vmem:[#allocation23 + $0x8] sm:$0xff] }
 0xe30   :  { %v1433_v18 = vld [vmem:[#allocation18 + $0x70] sm:$0xff] }
 0xe31   :  { %v3969_v24 = vmul.f32 -1.442695, %v1250_v23  ;;  %v1638_v23 = vld [vmem:[#allocation23 + $0x18] sm:$0xff] }
 0xe33   :  { %4631 = vpow2.f32 %v3969_v24  ;;  %v5809_v24 = vpack.c.bf16 %v1638_v23, %v1636_v20 }
 0xe35   :  { %4373 = vmatprep.subr.bf16.mxu0 %v5809_v24 }
 0xe3d   :  { %v4632_v4 = vpop.eup %4631 }
 0xe3e   :  { %v1254_v25 = vadd.f32 1.0, %v4632_v4  ;;  %v1422_v4 = vld [vmem:[#allocation18 + $0x18] sm:$0xff] }
 0xe40   :  { %4633 = vrcp.f32 %v1254_v25  ;;  %v1635_v25 = vld [vmem:[#allocation23] sm:$0xff] }
 0xe4a   :  { %v4634_v28 = vpop.eup %4633 }
 0xe4b   :  { %v1260_v30 = vmul.f32 %v4634_v28, %v1258_v37  ;;  %v1263_v53 = vsub.f32 1.0, %v4634_v28  ;;  %v1271_v43 = vmul.f32 %v4634_v28, %v1269_v41  ;;  %v5812_v37 = vpack.c.bf16 %v1637_v26, %v1635_v25  ;;  %v1651_v25 = vld [vmem:[#allocation24] sm:$0x3] }
 0xe4c   :  { %v5876_v26 = vrot.slane %v1651_v25, %v5615_v29 }
 0xe4d   :  { %v1261_v34 = vadd.f32 %v1260_v30, %v5760_v55 }
 0xe4f   :  { %4635 = vtanh.f32 %v1261_v34 }
 0xe59   :  { %v4636_v36 = vpop.eup %4635 }
 0xe5a   :  { %1265 = vrot.lane.b32.xlu1 %v4636_v36, %s5101_s0  ;;  %v1640_v36 = vld [vmem:[#allocation23 + $0x28] sm:$0xff] }
 0xecc   :  { %v1266_v42 = vpop.permute.xlu1 %1265 }
 0xecd   :  { %v1268_v47 = vmul.f32 %v1266_v42, %v1263_v53  ;;  %v1642_v53 = vld [vmem:[#allocation23 + $0x38] sm:$0xff] }
 0xecf   :  { %v5789_v49 = vadd.f32 %v1271_v43, %v1268_v47  ;;  %v5816_v43 = vpack.c.bf16 %v1642_v53, %v1640_v36  ;;  %v1639_v47 = vld [vmem:[#allocation23 + $0x20] sm:$0xff] }
 0xed1   :  { %v1274_v50 = vrot.slane %v5789_v49, 4  ;;  %v1372_v30 = vrot.slane %v5789_v49, 6 }
 0xed3   :  { %1275 = vrot.lane.b32.xlu0 %v1274_v50, %s5101_s0  ;;  %v1641_v50 = vld [vmem:[#allocation23 + $0x30] sm:$0xff] }
 0xed7   :  { %1401 = vrot.lane.b32.xlu0 %v1169_v12, %s5101_s0  ;;  %v1450_v12 = vld [vmem:[#allocation20 + $0x68] sm:$0xff] }
 0xed8   :  { %v4352_v16 = vpack.c.bf16 %v1452_v13, %v1450_v12  ;;  %v1434_v12 = vld [vmem:[#allocation18 + $0x78] sm:$0xff] }
 0xf45   :  { %v1276_v51 = vpop.permute.xlu0 %1275 }
 0xf46   :  { %3970 = vmatmul.mubr.msk.f32.vlgmr.msra.gmra.mrb[10].mxu0 %vm456_vm1, %v1276_v51 }
 0xf47   :  { %1730 = vmatprep.mubr.f32.mxu0 %v5100_v21  ;;  %4375 = vmatpush1.bf16.msra.mxu0 %v5812_v37 }
 0xf48   :  { %4377 = vmatprep.subr.bf16.mxu0 %v5816_v43 }
 0xf49   :  { %v1402_v54 = vpop.permute.xlu0 %1401 }
 0xf4a   :  { %1404 = vst.msk [vmem:[#allocation4 + $0x8] sm:$0xc] %vm1383_vm4, %v1402_v54  ;;  %1405 = vst.msk [vmem:[#allocation5 + $0x2] sm:$0xc] %vm1383_vm4, %v1402_v54  ;;  %v5819_v54 = vpack.c.bf16 %v1641_v50, %v1639_v47 }
 0xf4c   :  { %4379 = vmatpush1.bf16.msra.mxu0 %v5819_v54 }
0x1019   :  { %v1345_v58 = vpop.f32.mrb[10].mxu0 }
0x101a   :  { %v1346_v33 = vadd.f32 %v1345_v58, %v5618_v32  ;;  %v1347_v6 = vpop.f32.mrb[11].mxu0  ;;  %v1440_v32 = vld [vmem:[#allocation20 + $0x18] sm:$0xff] }
0x101b   :  { %v1348_v3 = vadd.f32 %v1347_v6, %v5631_v45  ;;  %v1443_v45 = vld [vmem:[#allocation20 + $0x30] sm:$0xff] }
0x101c   :  { %v1351_v59 = vrot.slane %v1346_v33, 2  ;;  %v1646_v33 = vld [vmem:[#allocation23 + $0x58] sm:$0xff] }
0x101d   :  { %v1361_v46 = vrot.slane %v1348_v3, 2  ;;  %v1650_v3 = vld [vmem:[#allocation23 + $0x78] sm:$0xff] }
0x101e   :  { %v1353_v60 = vadd.f32 %v1351_v59, %v5753_v39  ;;  %v4340_v39 = vpack.c.bf16 %v1440_v32, %v1438_v1  ;;  %v1643_v59 = vld [vmem:[#allocation23 + $0x40] sm:$0xff]  ;;  %v1421_v32 = vld [vmem:[#allocation18 + $0x10] sm:$0xff] }
0x101f   :  { %v1419_v1 = vld [vmem:[#allocation18] sm:$0xff] }
0x1020   :  { %v3971_v61 = vmul.f32 -1.442695, %v1353_v60  ;;  %4341 = vmatprep.subr.bf16.mxu1 %v4340_v39  ;;  %v1645_v60 = vld [vmem:[#allocation23 + $0x50] sm:$0xff]  ;;  %v1424_v39 = vld [vmem:[#allocation18 + $0x28] sm:$0xff]  ;;  %v4358_v35 = vpack.c.bf16 %v1421_v32, %v1419_v1 }
0x1021   :  { %4343 = vmatpush1.bf16.msra.mxu1 %v4342_v52  ;;  %v4360_v40 = vpack.c.bf16 %v1426_v9, %v1424_v39  ;;  %v1423_v52 = vld [vmem:[#allocation18 + $0x20] sm:$0xff] }
0x1022   :  { %4637 = vpow2.f32 %v3971_v61  ;;  %4345 = vmatprep.subr.bf16.mxu1 %v4344_v15  ;;  %v5828_v61 = vpack.c.bf16 %v1645_v60, %v1643_v59  ;;  %v1425_v15 = vld [vmem:[#allocation18 + $0x30] sm:$0xff]  ;;  %v5889_v59 = vrot.slane %v1651_v25, %v5628_v44 }
0x1023   :  { %v4362_v0 = vpack.c.bf16 %v1425_v15, %v1423_v52 }
0x102c   :  { %v4638_v62 = vpop.eup %4637 }
0x102d   :  { %v1357_v2 = vadd.f32 1.0, %v4638_v62 }
0x102f   :  { %4639 = vrcp.f32 %v1357_v2  ;;  %v1648_v2 = vld [vmem:[#allocation23 + $0x68] sm:$0xff] }
0x1039   :  { %v4640_v8 = vpop.eup %4639 }
0x103a   :  { %v1363_v11 = vmul.f32 %v4640_v8, %v1361_v46  ;;  %v1366_v28 = vsub.f32 1.0, %v4640_v8  ;;  %v1374_v41 = vmul.f32 %v4640_v8, %v1372_v30  ;;  %v5835_v46 = vpack.c.bf16 %v1650_v3, %v1648_v2  ;;  %v1647_v8 = vld [vmem:[#allocation23 + $0x60] sm:$0xff] }
0x103c   :  { %v1364_v63 = vadd.f32 %v1363_v11, %v5760_v55  ;;  %v4346_v55 = vpack.c.bf16 %v1443_v45, %v1441_v57  ;;  %v1649_v11 = vld [vmem:[#allocation23 + $0x70] sm:$0xff]  ;;  %v1428_v45 = vld [vmem:[#allocation18 + $0x48] sm:$0xff] }
0x103e   :  { %4641 = vtanh.f32 %v1364_v63  ;;  %4347 = vmatpush1.bf16.msra.mxu1 %v4346_v55  ;;  %v5838_v63 = vpack.c.bf16 %v1649_v11, %v1647_v8  ;;  %v4364_v55 = vpack.c.bf16 %v1430_v48, %v1428_v45 }
0x103f   :  { %4349 = vmatprep.subr.bf16.mxu1 %v4348_v5  ;;  %v1427_v5 = vld [vmem:[#allocation18 + $0x40] sm:$0xff] }
0x1040   :  { %v4366_v13 = vpack.c.bf16 %v1429_v10, %v1427_v5 }
0x1042   :  { %4351 = vmatpush1.bf16.msra.mxu1 %v4350_v7  ;;  %v1432_v7 = vld [vmem:[#allocation18 + $0x68] sm:$0xff] }
0x1043   :  { %4353 = vmatprep.subr.bf16.mxu1 %v4352_v16  ;;  %v4368_v16 = vpack.c.bf16 %v1434_v12, %v1432_v7 }
0x1046   :  { %4355 = vmatpush1.bf16.msra.mxu1 %v4354_v19  ;;  %v4370_v19 = vpack.c.bf16 %v1433_v18, %v1431_v17 }
0x1048   :  { %v4642_v22 = vpop.eup %4641 }
0x1049   :  { %1368 = vrot.lane.b32.xlu1 %v4642_v22, %s5101_s0 }
0x104d   :  { %1406 = vrot.lane.b32.xlu1 %v5789_v49, %s5101_s0  ;;  %v1644_v49 = vld [vmem:[#allocation23 + $0x48] sm:$0xff] }
0x104e   :  { %v5825_v6 = vpack.c.bf16 %v1646_v33, %v1644_v49 }
0x1050   :  { %4381 = vmatprep.subr.bf16.mxu0 %v5825_v6 }
0x1051   :  { %1380 = vrot.lane.b32.xlu1 %v5698_v38, %s5101_s0  ;;  %v1420_v38 = vld [vmem:[#allocation18 + $0x8] sm:$0xff]  ;;  %4383 = vmatpush1.bf16.msra.mxu0 %v5828_v61 }
0x1052   :  { %4385 = vmatprep.subr.bf16.mxu0 %v5835_v46 }
0x1055   :  { %1392 = vrot.lane.b32.xlu1 %v5738_v31, %s5101_s0  ;;  %v4356_v31 = vpack.c.bf16 %v1422_v4, %v1420_v38  ;;  %4387 = vmatpush1.bf16.msra.mxu0 %v5838_v63 }
0x1056   :  { %4389 = vmatprep.subr.bf16.mxu0 %v5809_v24 }
0x1057   :  { %4357 = vmatprep.subr.bf16.mxu1 %v4356_v31  ;;  %v1619_v31 = vld [vmem:[#allocation21] sm:$0x3] }
0x1058   :  { %1731 = vmatmul.mubr.f32.vlgmr.msra.gmra.mrb[12].mxu0 %v5100_v21 }
0x1059   :  { %4391 = vmatpush1.bf16.msra.mxu0 %v5812_v37  ;;  %1824 = vmatprep.mubr.f32.mxu0 %v5100_v21 }
0x105a   :  { %4393 = vmatprep.subr.bf16.mxu0 %v5816_v43 }
0x105d   :  { %4395 = vmatpush1.bf16.msra.mxu0 %v5819_v54 }
0x105e   :  { %4397 = vmatprep.subr.bf16.mxu0 %v5825_v6 }
0x1061   :  { %4399 = vmatpush1.bf16.msra.mxu0 %v5828_v61 }
0x1062   :  { %4401 = vmatprep.subr.bf16.mxu0 %v5835_v46 }
0x1065   :  { %4403 = vmatpush1.bf16.msra.mxu0 %v5838_v63 }
0x1066   :  { %4421 = vmatprep.subr.bf16.mxu0 %v5809_v24 }
0x10bb   :  { %v1369_v34 = vpop.permute.xlu1 %1368 }
0x10bc   :  { %v1371_v42 = vmul.f32 %v1369_v34, %v1366_v28  ;;  %v1624_v28 = vrot.slane %v1619_v31, %v5615_v29 }
0x10be   :  { %v1375_v51 = vadd.f32 %v1374_v41, %v1371_v42  ;;  %v1628_v42 = vrot.slane %v1619_v31, %v5628_v44 }
0x10bf   :  { %v1407_v58 = vpop.permute.xlu1 %1406 }
0x10c0   :  { %1409 = vst.msk [vmem:[#allocation4 + $0x8] sm:$0x30] %vm1389_vm5, %v1407_v58  ;;  %1410 = vst.msk [vmem:[#allocation5 - $0x2] sm:$0x30] %vm1389_vm5, %v1407_v58  ;;  %1412 = vrot.lane.b32.xlu0 %v1375_v51, %s5101_s0 }
0x10c3   :  { %v1381_v62 = vpop.permute.xlu1 %1380 }
0x10c4   :  { %1384 = vst.msk [vmem:[#allocation4] sm:$0xc] %vm1383_vm4, %v1381_v62  ;;  %1385 = vst.msk [vmem:[#allocation5 + $0xa] sm:$0xc] %vm1383_vm4, %v1381_v62  ;;  %1386 = vrot.lane.b32.xlu0 %v5718_v14, %s5101_s0  ;;  %vm3435_vm4 = vcmask 19456  }
0x10c7   :  { %v1393_v22 = vpop.permute.xlu1 %1392 }
0x10c8   :  { %1396 = vst.msk [vmem:[#allocation4] sm:$0xc0] %vm1395_vm6, %v1393_v22  ;;  %1397 = vst.msk [vmem:[#allocation5 + $0x2] sm:$0xc0] %vm1395_vm6, %v1393_v22 }
0x112b   :  { %v1732_v38 = vpop.f32.mrb[12].mxu0 }
0x112c   :  { %v1734_v4 = vpop.f32.mrb[13].mxu0  ;;  %v1733_v30 = vadd.f32 %v1732_v38, %v5876_v26 }
0x112d   :  { %v1735_v60 = vadd.f32 %v1734_v4, %v5889_v59 }
0x1132   :  { %v1413_v14 = vpop.permute.xlu0 %1412 }
0x1133   :  { %1415 = vst.msk [vmem:[#allocation4 + $0x8] sm:$0xc0] %vm1395_vm6, %v1413_v14  ;;  %1416 = vst.msk [vmem:[#allocation5 - $0x6] sm:$0xc0] %vm1395_vm6, %v1413_v14 }
0x1136   :  { %v1387_v27 = vpop.permute.xlu0 %1386 }
0x1137   :  { %1390 = vst.msk [vmem:[#allocation4] sm:$0x30] %vm1389_vm5, %v1387_v27  ;;  %1391 = vst.msk [vmem:[#allocation5 + $0x6] sm:$0x30] %vm1389_vm5, %v1387_v27  ;;  %vm3479_vm5 = vcmask 26624  }
0x113a   :  { %v1435_v57 = vld [vmem:[#allocation5] sm:$0xff]  ;;  %v1418_v23 = vld [vmem:[#allocation4 + $0x8] sm:$0xff] }
0x113b   :  { %3972 = vmatmul.mubr.msk.f32.vlgmr.msra.gmra.mrb[8].mxu1 %vm456_vm1, %v1435_v57 }
0x113c   :  { %4359 = vmatpush1.bf16.msra.mxu1 %v4358_v35  ;;  %1529 = vmatprep.mubr.f32.mxu1 %v5100_v21 }
0x113d   :  { %4361 = vmatprep.subr.bf16.mxu1 %v4360_v40 }
0x113e   :  { %v1436_v56 = vld [vmem:[#allocation5 + $0x8] sm:$0xff]  ;;  %v1417_v20 = vld [vmem:[#allocation4] sm:$0xff] }
0x113f   :  { %3973 = vmatmul.mubr.msk.f32.gmra.mrb[10].mxu1 %vm456_vm1, %v1436_v56 }
0x1140   :  { %4363 = vmatpush1.bf16.msra.mxu1 %v4362_v0  ;;  %1606 = vmatprep.mubr.f32.mxu1 %v5100_v21 }
0x1141   :  { %4365 = vmatprep.subr.bf16.mxu1 %v4364_v55 }
0x1144   :  { %4367 = vmatpush1.bf16.msra.mxu1 %v4366_v13 }
0x1145   :  { %4369 = vmatprep.subr.bf16.mxu1 %v4368_v16 }
0x1148   :  { %4371 = vmatpush1.bf16.msra.mxu1 %v4370_v19 }
0x1149   :  { %4405 = vmatprep.subr.bf16.mxu1 %v5809_v24 }
0x114b   :  { %3974 = vmatmul.mubr.msk.f32.vlgmr.msra.gmra.mrb[8].mxu1 %vm456_vm1, %v1417_v20 }
0x114c   :  { %1612 = vmatprep.mubr.f32.mxu1 %v5100_v21  ;;  %4407 = vmatpush1.bf16.msra.mxu1 %v5812_v37 }
0x114d   :  { %4409 = vmatprep.subr.bf16.mxu1 %v5816_v43 }
0x114f   :  { %3975 = vmatmul.mubr.msk.f32.gmra.mrb[10].mxu1 %vm456_vm1, %v1418_v23 }
0x1150   :  { %4411 = vmatpush1.bf16.msra.mxu1 %v5819_v54  ;;  %1927 = vmatprep.mubr.f32.mxu1 %v5100_v21 }
0x1151   :  { %4413 = vmatprep.subr.bf16.mxu1 %v5825_v6 }
0x1154   :  { %4415 = vmatpush1.bf16.msra.mxu1 %v5828_v61 }
0x1155   :  { %4417 = vmatprep.subr.bf16.mxu1 %v5835_v46 }
0x1158   :  { %4419 = vmatpush1.bf16.msra.mxu1 %v5838_v63 }
0x1159   :  { %4437 = vmatprep.subr.bf16.mxu1 %v5809_v24 }
0x121e   :  { %v1608_v34 = vpop.f32.mrb[8].mxu1 }
0x121f   :  { %v5880_v36 = vadd.f32 %v1624_v28, %v1608_v34  ;;  %v1610_v53 = vpop.f32.mrb[9].mxu1 }
0x1220   :  { %v5892_v3 = vadd.f32 %v1628_v42, %v1610_v53 }
0x1221   :  { %v1737_v41 = vadd.f32 %v1733_v30, %v5880_v36 }
0x1222   :  { %v1614_v47 = vpop.f32.mrb[10].mxu1 }
0x1223   :  { %v3976_v50 = vmul.f32 -1.442695, %v1737_v41  ;;  %v5884_v51 = vadd.f32 %v1624_v28, %v1614_v47  ;;  %v1616_v58 = vpop.f32.mrb[11].mxu1 }
0x1224   :  { %v5886_v49 = vadd.f32 %v1628_v42, %v1616_v58 }
0x1225   :  { %4643 = vpow2.f32 %v3976_v50 }
0x122f   :  { %v4644_v33 = vpop.eup %4643 }
0x1230   :  { %v1741_v29 = vadd.f32 1.0, %v4644_v33 }
0x1232   :  { %4645 = vrcp.f32 %v1741_v29 }
0x123c   :  { %v4646_v62 = vpop.eup %4645 }
0x123d   :  { %v1744_v2 = vmul.f32 %v4646_v62, %v1735_v60  ;;  %v1747_v22 = vsub.f32 1.0, %v4646_v62  ;;  %v1753_v1 = vmul.f32 0.0, %v4646_v62 }
0x123f   :  { %v1745_v8 = vadd.f32 %v1744_v2, %v5892_v3 }
0x1241   :  { %4647 = vtanh.f32 %v1745_v8 }
0x124b   :  { %v4648_v11 = vpop.eup %4647 }
0x124c   :  { %1749 = vrot.lane.b32.xlu0 %v4648_v11, %s5101_s0 }
0x12be   :  { %v1750_v14 = vpop.permute.xlu0 %1749 }
0x12bf   :  { %v1752_v32 = vmul.f32 %v1750_v14, %v1747_v22 }
0x12c1   :  { %v5896_v27 = vadd.f32 %v1753_v1, %v1752_v32 }
0x12c3   :  { %1756 = vrot.lane.b32.xlu1 %v5896_v27, %s5101_s0  ;;  %v1853_v12 = vrot.slane %v5896_v27, 6 }
0x1335   :  { %v1757_v44 = vpop.permute.xlu1 %1756 }
0x1336   :  { %2469 = vst.msk [vmem:[#allocation6] sm:$0x3] %vm2468_vm7, %v1757_v44  ;;  %3977 = vmatmul.mubr.msk.f32.vlgmr.msra.gmra.mrb[14].mxu0 %vm456_vm1, %v1757_v44 }
0x1337   :  { %4423 = vmatpush1.bf16.msra.mxu0 %v5812_v37  ;;  %2030 = vmatprep.mubr.f32.mxu0 %v5100_v21 }
0x1338   :  { %4425 = vmatprep.subr.bf16.mxu0 %v5816_v43 }
0x133b   :  { %4427 = vmatpush1.bf16.msra.mxu0 %v5819_v54 }
0x133c   :  { %4429 = vmatprep.subr.bf16.mxu0 %v5825_v6 }
0x133f   :  { %4431 = vmatpush1.bf16.msra.mxu0 %v5828_v61 }
0x1340   :  { %4433 = vmatprep.subr.bf16.mxu0 %v5835_v46 }
0x1343   :  { %4435 = vmatpush1.bf16.msra.mxu0 %v5838_v63 }
0x1344   :  { %4453 = vmatprep.subr.bf16.mxu0 %v5809_v24 }
0x1409   :  { %v1826_v39 = vpop.f32.mrb[14].mxu0 }
0x140a   :  { %v1827_v9 = vadd.f32 %v1826_v39, %v5876_v26  ;;  %v1828_v35 = vpop.f32.mrb[15].mxu0 }
0x140b   :  { %v1829_v48 = vadd.f32 %v1828_v35, %v5889_v59 }
0x140c   :  { %v1832_v40 = vrot.slane %v1827_v9, 6 }
0x140d   :  { %v1842_v0 = vrot.slane %v1829_v48, 6 }
0x140e   :  { %v1834_v52 = vadd.f32 %v1832_v40, %v5880_v36 }
0x1410   :  { %v3978_v15 = vmul.f32 -1.442695, %v1834_v52 }
0x1412   :  { %4649 = vpow2.f32 %v3978_v15 }
0x141c   :  { %v4650_v57 = vpop.eup %4649 }
0x141d   :  { %v1838_v45 = vadd.f32 1.0, %v4650_v57 }
0x141f   :  { %4651 = vrcp.f32 %v1838_v45 }
0x1429   :  { %v4652_v55 = vpop.eup %4651 }
0x142a   :  { %v1844_v5 = vmul.f32 %v4652_v55, %v1842_v0  ;;  %v1847_v7 = vsub.f32 1.0, %v4652_v55  ;;  %v1855_v17 = vmul.f32 %v4652_v55, %v1853_v12 }
0x142c   :  { %v1845_v10 = vadd.f32 %v1844_v5, %v5892_v3 }
0x142e   :  { %4653 = vtanh.f32 %v1845_v10 }
0x1438   :  { %v4654_v56 = vpop.eup %4653 }
0x1439   :  { %1849 = vrot.lane.b32.xlu0 %v4654_v56, %s5101_s0 }
0x14ab   :  { %v1850_v13 = vpop.permute.xlu0 %1849 }
0x14ac   :  { %v1852_v16 = vmul.f32 %v1850_v13, %v1847_v7 }
0x14ae   :  { %v5917_v18 = vadd.f32 %v1855_v17, %v1852_v16 }
0x14b0   :  { %v1858_v19 = vrot.slane %v5917_v18, 2  ;;  %v1956_v29 = vrot.slane %v5917_v18, 6 }
0x14b2   :  { %1859 = vrot.lane.b32.xlu1 %v1858_v19, %s5101_s0 }
0x1524   :  { %v1860_v20 = vpop.permute.xlu1 %1859 }
0x1525   :  { %3979 = vmatmul.mubr.msk.f32.vlgmr.msra.gmra.mrb[12].mxu1 %vm456_vm1, %v1860_v20 }
0x1526   :  { %4439 = vmatpush1.bf16.msra.mxu1 %v5812_v37  ;;  %2133 = vmatprep.mubr.f32.mxu1 %v5100_v21 }
0x1527   :  { %4441 = vmatprep.subr.bf16.mxu1 %v5816_v43 }
0x152a   :  { %4443 = vmatpush1.bf16.msra.mxu1 %v5819_v54 }
0x152b   :  { %4445 = vmatprep.subr.bf16.mxu1 %v5825_v6 }
0x152e   :  { %4447 = vmatpush1.bf16.msra.mxu1 %v5828_v61 }
0x152f   :  { %4449 = vmatprep.subr.bf16.mxu1 %v5835_v46 }
0x1532   :  { %4451 = vmatpush1.bf16.msra.mxu1 %v5838_v63 }
0x1533   :  { %4469 = vmatprep.subr.bf16.mxu1 %v5809_v24 }
0x15f8   :  { %v1929_v23 = vpop.f32.mrb[12].mxu1 }
0x15f9   :  { %v1930_v38 = vadd.f32 %v1929_v23, %v5876_v26  ;;  %v1931_v4 = vpop.f32.mrb[13].mxu1 }
0x15fa   :  { %v1932_v53 = vadd.f32 %v1931_v4, %v5889_v59 }
0x15fb   :  { %v1935_v25 = vrot.slane %v1930_v38, 4 }
0x15fc   :  { %v1945_v41 = vrot.slane %v1932_v53, 4 }
0x15fd   :  { %v1937_v31 = vadd.f32 %v1935_v25, %v5880_v36 }
0x15ff   :  { %v3980_v28 = vmul.f32 -1.442695, %v1937_v31 }
0x1601   :  { %4655 = vpow2.f32 %v3980_v28 }
0x160b   :  { %v4656_v30 = vpop.eup %4655 }
0x160c   :  { %v1941_v34 = vadd.f32 1.0, %v4656_v30 }
0x160e   :  { %4657 = vrcp.f32 %v1941_v34 }
0x1618   :  { %v4658_v42 = vpop.eup %4657 }
0x1619   :  { %v1947_v47 = vmul.f32 %v4658_v42, %v1945_v41  ;;  %v1950_v33 = vsub.f32 1.0, %v4658_v42  ;;  %v1958_v62 = vmul.f32 %v4658_v42, %v1956_v29 }
0x161b   :  { %v1948_v50 = vadd.f32 %v1947_v47, %v5892_v3 }
0x161d   :  { %4659 = vtanh.f32 %v1948_v50 }
0x1627   :  { %v4660_v58 = vpop.eup %4659 }
0x1628   :  { %1952 = vrot.lane.b32.xlu0 %v4660_v58, %s5101_s0 }
0x169a   :  { %v1953_v60 = vpop.permute.xlu0 %1952 }
0x169b   :  { %v1955_v2 = vmul.f32 %v1953_v60, %v1950_v33 }
0x169d   :  { %v5937_v8 = vadd.f32 %v1958_v62, %v1955_v2 }
0x169f   :  { %v1961_v11 = vrot.slane %v5937_v8, 4  ;;  %v2059_v55 = vrot.slane %v5937_v8, 6 }
0x16a1   :  { %1962 = vrot.lane.b32.xlu1 %v1961_v11, %s5101_s0  ;;  %v2535_v11 = vld [vmem:[#allocation26 + $0x8] sm:$0xff] }
0x1713   :  { %v1963_v22 = vpop.permute.xlu1 %1962 }
0x1714   :  { %3981 = vmatmul.mubr.msk.f32.vlgmr.msra.gmra.mrb[16].mxu0 %vm456_vm1, %v1963_v22 }
0x1715   :  { %4455 = vmatpush1.bf16.msra.mxu0 %v5812_v37  ;;  %2228 = vmatprep.mubr.f32.mxu0 %v5100_v21 }
0x1716   :  { %4457 = vmatprep.subr.bf16.mxu0 %v5816_v43 }
0x1719   :  { %4459 = vmatpush1.bf16.msra.mxu0 %v5819_v54 }
0x171a   :  { %4461 = vmatprep.subr.bf16.mxu0 %v5825_v6 }
0x171d   :  { %4463 = vmatpush1.bf16.msra.mxu0 %v5828_v61 }
0x171e   :  { %4465 = vmatprep.subr.bf16.mxu0 %v5835_v46 }
0x1721   :  { %4467 = vmatpush1.bf16.msra.mxu0 %v5838_v63 }
0x1722   :  { %4485 = vmatprep.subr.bf16.mxu0 %v5809_v24 }
0x17e7   :  { %v2032_v14 = vpop.f32.mrb[16].mxu0 }
0x17e8   :  { %v2033_v1 = vadd.f32 %v2032_v14, %v5876_v26  ;;  %v2034_v32 = vpop.f32.mrb[17].mxu0 }
0x17e9   :  { %v2035_v52 = vadd.f32 %v2034_v32, %v5889_v59 }
0x17ea   :  { %v2038_v44 = vrot.slane %v2033_v1, 2 }
0x17eb   :  { %v2048_v15 = vrot.slane %v2035_v52, 2  ;;  %v2536_v52 = vld [vmem:[#allocation26 + $0x10] sm:$0xff] }
0x17ec   :  { %v2040_v39 = vadd.f32 %v2038_v44, %v5880_v36 }
0x17ee   :  { %v3982_v9 = vmul.f32 -1.442695, %v2040_v39 }
0x17f0   :  { %4661 = vpow2.f32 %v3982_v9 }
0x17fa   :  { %v4662_v35 = vpop.eup %4661 }
0x17fb   :  { %v2044_v40 = vadd.f32 1.0, %v4662_v35 }
0x17fd   :  { %4663 = vrcp.f32 %v2044_v40 }
0x1807   :  { %v4664_v57 = vpop.eup %4663 }
0x1808   :  { %v2050_v45 = vmul.f32 %v4664_v57, %v2048_v15  ;;  %v2053_v0 = vsub.f32 1.0, %v4664_v57  ;;  %v2061_v5 = vmul.f32 %v4664_v57, %v2059_v55  ;;  %v2537_v15 = vld [vmem:[#allocation26 + $0x18] sm:$0xff]  ;;  %v2623_v55 = vld [vmem:[#allocation27 + $0x8] sm:$0xff] }
0x1809   :  { %v4504_v57 = vpack.c.bf16 %v2537_v15, %v2536_v52 }
0x180a   :  { %v2051_v48 = vadd.f32 %v2050_v45, %v5892_v3  ;;  %v5999_v45 = vld [vmem:[#allocation3] sm:$0xff] }
0x180c   :  { %4665 = vtanh.f32 %v2051_v48 }
0x1816   :  { %v4666_v24 = vpop.eup %4665 }
0x1817   :  { %2055 = vrot.lane.b32.xlu0 %v4666_v24, %s5101_s0  ;;  %v6004_v24 = vld [vmem:[#allocation3 + $0x8] sm:$0xff] }
0x1889   :  { %v2056_v36 = vpop.permute.xlu0 %2055 }
0x188a   :  { %v2058_v10 = vmul.f32 %v2056_v36, %v2053_v0  ;;  %v2622_v0 = vld [vmem:[#allocation27] sm:$0xff] }
0x188b   :  { %v4508_v36 = vpack.c.bf16 %v2623_v55, %v2622_v0 }
0x188c   :  { %v5957_v56 = vadd.f32 %v2061_v5, %v2058_v10  ;;  %v2624_v5 = vld [vmem:[#allocation27 + $0x10] sm:$0xff]  ;;  %v2625_v10 = vld [vmem:[#allocation27 + $0x18] sm:$0xff] }
0x188e   :  { %v2064_v7 = vrot.slane %v5957_v56, 6 }
0x1890   :  { %2065 = vrot.lane.b32.xlu1 %v2064_v7, %s5101_s0 }
0x1902   :  { %v2066_v12 = vpop.permute.xlu1 %2065 }
0x1903   :  { %3983 = vmatmul.mubr.msk.f32.vlgmr.msra.gmra.mrb[14].mxu1 %vm456_vm1, %v2066_v12 }
0x1904   :  { %4471 = vmatpush1.bf16.msra.mxu1 %v5812_v37  ;;  %2331 = vmatprep.mubr.f32.mxu1 %v5100_v21 }
0x1905   :  { %4473 = vmatprep.subr.bf16.mxu1 %v5816_v43 }
0x1908   :  { %4475 = vmatpush1.bf16.msra.mxu1 %v5819_v54 }
0x1909   :  { %4477 = vmatprep.subr.bf16.mxu1 %v5825_v6 }
0x190c   :  { %4479 = vmatpush1.bf16.msra.mxu1 %v5828_v61 }
0x190d   :  { %4481 = vmatprep.subr.bf16.mxu1 %v5835_v46 }
0x1910   :  { %4483 = vmatpush1.bf16.msra.mxu1 %v5838_v63 }
0x19d6   :  { %v2135_v3 = vpop.f32.mrb[14].mxu1 }
0x19d7   :  { %v2136_v13 = vadd.f32 %v2135_v3, %v5876_v26  ;;  %v2137_v16 = vpop.f32.mrb[15].mxu1 }
0x19d8   :  { %v2138_v38 = vadd.f32 %v2137_v16, %v5889_v59 }
0x19d9   :  { %v2140_v17 = vadd.f32 %v2136_v13, %v5884_v51 }
0x19db   :  { %v3984_v19 = vmul.f32 -1.442695, %v2140_v17 }
0x19dd   :  { %4667 = vpow2.f32 %v3984_v19 }
0x19e7   :  { %v4668_v20 = vpop.eup %4667 }
0x19e8   :  { %v2144_v23 = vadd.f32 1.0, %v4668_v20 }
0x19ea   :  { %4669 = vrcp.f32 %v2144_v23 }
0x19f4   :  { %v4670_v4 = vpop.eup %4669 }
0x19f5   :  { %v2147_v25 = vmul.f32 %v4670_v4, %v2138_v38  ;;  %v2150_v30 = vsub.f32 1.0, %v4670_v4  ;;  %v2157_v53 = vmul.f32 %v4670_v4, %v2064_v7  ;;  %v4512_v7 = vpack.c.bf16 %v2625_v10, %v2624_v5  ;;  %v2707_v10 = vld [vmem:[#allocation29] sm:$0xff] }
0x19f7   :  { %v2148_v31 = vadd.f32 %v2147_v25, %v5886_v49 }
0x19f9   :  { %4671 = vtanh.f32 %v2148_v31 }
0x1a03   :  { %v4672_v28 = vpop.eup %4671 }
0x1a04   :  { %2152 = vrot.lane.b32.xlu0 %v4672_v28, %s5101_s0 }
0x1a76   :  { %v2153_v34 = vpop.permute.xlu0 %2152 }
0x1a77   :  { %v2155_v41 = vmul.f32 %v2153_v34, %v2150_v30 }
0x1a79   :  { %v5975_v42 = vadd.f32 %v2157_v53, %v2155_v41 }
0x1a7b   :  { %2160 = vrot.lane.b32.xlu1 %v5975_v42, %s5101_s0  ;;  %v2257_v32 = vrot.slane %v5975_v42, 6 }
0x1aed   :  { %v2161_v47 = vpop.permute.xlu1 %2160 }
0x1aee   :  { %2502 = vst.msk [vmem:[#allocation6 + $0x8] sm:$0x3] %vm2468_vm7, %v2161_v47  ;;  %3985 = vmatmul.mubr.msk.f32.vlgmr.msra.gmra.mrb[18].mxu0 %vm456_vm1, %v2161_v47 }
0x1aef   :  { %4487 = vmatpush1.bf16.msra.mxu0 %v5812_v37  ;;  %2434 = vmatprep.mubr.f32.mxu0 %v5100_v21 }
0x1af0   :  { %4489 = vmatprep.subr.bf16.mxu0 %v5816_v43 }
0x1af3   :  { %4491 = vmatpush1.bf16.msra.mxu0 %v5819_v54 }
0x1af4   :  { %4493 = vmatprep.subr.bf16.mxu0 %v5825_v6 }
0x1af7   :  { %4495 = vmatpush1.bf16.msra.mxu0 %v5828_v61 }
0x1af8   :  { %4497 = vmatprep.subr.bf16.mxu0 %v5835_v46 }
0x1afb   :  { %4499 = vmatpush1.bf16.msra.mxu0 %v5838_v63  ;;  %v2534_v63 = vld [vmem:[#allocation26] sm:$0xff] }
0x1afc   :  { %v4500_v22 = vpack.c.bf16 %v2535_v11, %v2534_v63 }
0x1afe   :  { %4501 = vmatprep.subr.bf16.mxu1 %v4500_v22 }
0x1bc1   :  { %v2230_v50 = vpop.f32.mrb[18].mxu0 }
0x1bc2   :  { %v2231_v58 = vadd.f32 %v2230_v50, %v5876_v26  ;;  %v2232_v33 = vpop.f32.mrb[19].mxu0 }
0x1bc3   :  { %v2233_v54 = vadd.f32 %v2232_v33, %v5889_v59 }
0x1bc4   :  { %v2236_v29 = vrot.slane %v2231_v58, 6 }
0x1bc5   :  { %v2246_v6 = vrot.slane %v2233_v54, 6 }
0x1bc6   :  { %v2238_v37 = vadd.f32 %v2236_v29, %v5884_v51 }
0x1bc8   :  { %v3986_v60 = vmul.f32 -1.442695, %v2238_v37 }
0x1bca   :  { %4673 = vpow2.f32 %v3986_v60 }
0x1bd4   :  { %v4674_v43 = vpop.eup %4673 }
0x1bd5   :  { %v2242_v62 = vadd.f32 1.0, %v4674_v43 }
0x1bd7   :  { %4675 = vrcp.f32 %v2242_v62 }
0x1be1   :  { %v4676_v61 = vpop.eup %4675 }
0x1be2   :  { %v2248_v2 = vmul.f32 %v4676_v61, %v2246_v6  ;;  %v2251_v1 = vsub.f32 1.0, %v4676_v61  ;;  %v2259_v9 = vmul.f32 %v4676_v61, %v2257_v32 }
0x1be4   :  { %v2249_v46 = vadd.f32 %v2248_v2, %v5886_v49 }
0x1be6   :  { %4677 = vtanh.f32 %v2249_v46 }
0x1bf0   :  { %v4678_v14 = vpop.eup %4677 }
0x1bf1   :  { %2253 = vrot.lane.b32.xlu0 %v4678_v14, %s5101_s0 }
0x1c63   :  { %v2254_v44 = vpop.permute.xlu0 %2253 }
0x1c64   :  { %v2256_v39 = vmul.f32 %v2254_v44, %v2251_v1 }
0x1c66   :  { %v5995_v35 = vadd.f32 %v2259_v9, %v2256_v39 }
0x1c68   :  { %v2262_v40 = vrot.slane %v5995_v35, 2  ;;  %v2360_v58 = vrot.slane %v5995_v35, 6 }
0x1c6a   :  { %2263 = vrot.lane.b32.xlu1 %v2262_v40, %s5101_s0 }
0x1cdc   :  { %v2264_v48 = vpop.permute.xlu1 %2263 }
0x1cdd   :  { %3987 = vmatmul.mubr.msk.f32.vlgmr.msra.gmra.mrb[16].mxu1 %vm456_vm1, %v2264_v48 }
0x1cde   :  { %4503 = vmatpush3.bf16.msra.mxu1 %v4500_v22  ;;  %4082 = vmatprep.mubr.msk.f32.mxu1 %vm2538_vm8, %v5999_v45 }
0x1cdf   :  { %4505 = vmatprep.subr.bf16.mxu1 %v4504_v57 }
0x1ce2   :  { %4507 = vmatpush3.bf16.msra.mxu1 %v4504_v57 }
0x1ce3   :  { %4509 = vmatprep.subr.bf16.mxu1 %v4508_v36 }
0x1ce5   :  { %4083 = vmatmul.mubr.msk.f32.vlgmr.msra.gmra.mrb[18].mxu1 %vm2538_vm8, %v6004_v24 }
0x1ce6   :  { %4511 = vmatpush3.bf16.msra.mxu1 %v4508_v36 }
0x1ce7   :  { %4513 = vmatprep.subr.bf16.mxu1 %v4512_v7 }
0x1cea   :  { %4515 = vmatpush3.bf16.msra.mxu1 %v4512_v7 }
0x1db0   :  { %v2333_v12 = vpop.f32.mrb[16].mxu1 }
0x1db1   :  { %v2334_v3 = vadd.f32 %v2333_v12, %v5876_v26  ;;  %v2335_v13 = vpop.f32.mrb[17].mxu1 }
0x1db2   :  { %v2336_v28 = vadd.f32 %v2335_v13, %v5889_v59 }
0x1db3   :  { %v2339_v16 = vrot.slane %v2334_v3, 4 }
0x1db4   :  { %v2349_v30 = vrot.slane %v2336_v28, 4 }
0x1db5   :  { %v2341_v17 = vadd.f32 %v2339_v16, %v5884_v51 }
0x1db7   :  { %v3988_v19 = vmul.f32 -1.442695, %v2341_v17 }
0x1db8   :  { %v4084_v20 = vpop.f32.mrb[18].mxu1 }
0x1db9   :  { %4679 = vpow2.f32 %v3988_v19  ;;  %v2611_v23 = vpop.f32.mrb[19].mxu1 }
0x1dba   :  { %4681 = vtanh.f32 %v4084_v20 }
0x1dbb   :  { %4683 = vtanh.f32 %v2611_v23 }
0x1dc3   :  { %v4680_v38 = vpop.eup %4679 }
0x1dc4   :  { %v4682_v4 = vpop.eup %4681  ;;  %v2345_v25 = vadd.f32 1.0, %v4680_v38 }
0x1dc5   :  { %v4684_v31 = vpop.eup %4683 }
0x1dc6   :  { %4685 = vrcp.f32 %v2345_v25  ;;  %4093 = vmatprep.mubr.msk.f32.mxu1 %vm2538_vm8, %v4684_v31 }
0x1dc7   :  { %4094 = vmatmul.mubr.msk.f32.vlgmr.msra.gmra.mrb[20].mxu1 %vm2538_vm8, %v4682_v4 }
0x1dc8   :  { %4107 = vmatprep.mubr.msk.f32.mxu1 %vm2711_vm11, %v2707_v10 }
0x1dd0   :  { %v4686_v34 = vpop.eup %4685 }
0x1dd1   :  { %v2351_v53 = vmul.f32 %v4686_v34, %v2349_v30  ;;  %v2354_v50 = vsub.f32 1.0, %v4686_v34  ;;  %v2362_v29 = vmul.f32 %v4686_v34, %v2360_v58  ;;  %v2708_v30 = vld [vmem:[#allocation29 + $0x8] sm:$0xf]  ;;  %v3040_v34 = vld [vmem:[%s6186_s17] sm:$0xff] }
0x1dd3   :  { %v2352_v41 = vadd.f32 %v2351_v53, %v5886_v49  ;;  %v3041_v53 = vld [vmem:[%s6186_s17 + $0x8] sm:$0xff] }
0x1dd5   :  { %4687 = vtanh.f32 %v2352_v41 }
0x1ddf   :  { %v4688_v47 = vpop.eup %4687 }
0x1de0   :  { %2356 = vrot.lane.b32.xlu0 %v4688_v47, %s5101_s0  ;;  %v2874_v47 = vld [vmem:[#allocation32] sm:$0xff] }
0x1e52   :  { %v2357_v33 = vpop.permute.xlu0 %2356 }
0x1e53   :  { %v2359_v37 = vmul.f32 %v2357_v33, %v2354_v50  ;;  %v2875_v50 = vld [vmem:[#allocation32 + $0x8] sm:$0xff] }
0x1e55   :  { %v2363_v60 = vadd.f32 %v2362_v29, %v2359_v37  ;;  %v6082_v29 = vpack.c.bf16 %v3041_v53, %v3040_v34 }
0x1e57   :  { %v2365_v43 = vrot.slane %v2363_v60, 4 }
0x1e59   :  { %2366 = vrot.lane.b32.xlu1 %v2365_v43, %s5101_s0  ;;  %v4524_v43 = vpack.c.bf16 %v2875_v50, %v2874_v47 }
0x1e9a   :  { %v6017_v62 = vpop.f32.mrb[20].mxu1 }
0x1e9b   :  { %v2698_v54 = vpop.f32.mrb[21].mxu1 }
0x1e9c   :  { %3049 = vxpose.xlu0.b32.start.end [1/1] (short) (narrow) %v2698_v54, 8  ;;  %v2876_v54 = vld [vmem:[#allocation32 + $0x10] sm:$0xff] }
0x1ecb   :  { %v2367_v6 = vpop.permute.xlu1 %2366 }
0x1ecc   :  { %3989 = vmatmul.mubr.msk.f32.vlgmr.msra.gmra.mrb[20].mxu0 %vm456_vm1, %v2367_v6  ;;  %v2877_v6 = vld [vmem:[#allocation32 + $0x18] sm:$0xff]  ;;  %vm3345_vm1 = vcmask 44032  }
0x1ecd   :  { %4100 = vmatprep.mubr.msk.f32.mxu0 %vm2711_vm11, %v2707_v10 }
0x1f1c   :  { %v3065_v61 = vpop.trf.xlu0 }
0x1f1d   :  { %v3082_v2 = vsel %vm3081_vm9, %v3065_v61, -inf }
0x1f1e   :  { %3083 = vmax.xlane.f32.xlu1 %v3082_v2  ;;  %v3043_v2 = vld [vmem:[%s6186_s17 + $0x18] sm:$0xff] }
0x1f9f   :  { %v2436_v46 = vpop.f32.mrb[20].mxu0 }
0x1fa0   :  { %v2437_v63 = vadd.f32 %v2436_v46, %v5876_v26  ;;  %v2438_v11 = vpop.f32.mrb[21].mxu0 }
0x1fa1   :  { %v2439_v15 = vadd.f32 %v2438_v11, %v5889_v59  ;;  %v2463_v59 = vrot.slane %v2363_v60, 6  ;;  %v2871_v11 = vld [vmem:[#allocation30 + $0x8] sm:$0xff] }
0x1fa2   :  { %v2442_v22 = vrot.slane %v2437_v63, 2  ;;  %v2870_v63 = vld [vmem:[#allocation30] sm:$0xff] }
0x1fa3   :  { %v2452_v57 = vrot.slane %v2439_v15, 2 }
0x1fa4   :  { %v2444_v14 = vadd.f32 %v2442_v22, %v5884_v51  ;;  %v4532_v22 = vpack.c.bf16 %v2871_v11, %v2870_v63 }
0x1fa6   :  { %v3990_v1 = vmul.f32 -1.442695, %v2444_v14  ;;  %v2872_v14 = vld [vmem:[#allocation30 + $0x10] sm:$0xff] }
0x1fa8   :  { %4689 = vpow2.f32 %v3990_v1  ;;  %v2873_v1 = vld [vmem:[#allocation30 + $0x18] sm:$0xff] }
0x1fab   :  { %v3084_v32 = vpop.xlane.xlu1 %3083 }
0x1fac   :  { %v3085_v44 = vsub.f32 %v3065_v61, %v3084_v32  ;;  %v3042_v61 = vld [vmem:[%s6186_s17 + $0x10] sm:$0xff] }
0x1fad   :  { %v4544_v46 = vpack.c.bf16 %v3043_v2, %v3042_v61 }
0x1fae   :  { %v3086_v39 = vmul.f32 1.442695, %v3085_v44 }
0x1fb0   :  { %4691 = vpow2.f32 %v3086_v39  ;;  %v4536_v39 = vpack.c.bf16 %v2873_v1, %v2872_v14 }
0x1fb2   :  { %v4690_v9 = vpop.eup %4689 }
0x1fb3   :  { %v2448_v40 = vadd.f32 1.0, %v4690_v9 }
0x1fb5   :  { %4693 = vrcp.f32 %v2448_v40 }
0x1fba   :  { %v6023_v52 = vpop.eup %4691 }
0x1fbb   :  { %v3088_v26 = vsel %vm3081_vm9, %v6023_v52, 0.0 }
0x1fbc   :  { %3089 = vadd.xlane.f32.xlu1 %v3088_v26  ;;  %v3044_v26 = vld [vmem:[%s6187_s18] sm:$0xff] }
0x1fbf   :  { %v4694_v48 = vpop.eup %4693 }
0x1fc0   :  { %v2454_v51 = vmul.f32 %v4694_v48, %v2452_v57  ;;  %v3045_v57 = vld [vmem:[%s6187_s18 + $0x8] sm:$0xff] }
0x1fc2   :  { %v2455_v0 = vadd.f32 %v2454_v51, %v5886_v49  ;;  %v2457_v49 = vsub.f32 1.0, %v4694_v48  ;;  %v3046_v51 = vld [vmem:[%s6187_s18 + $0x10] sm:$0xff] }
0x1fc4   :  { %4695 = vtanh.f32 %v2455_v0  ;;  %v3047_v0 = vld [vmem:[%s6187_s18 + $0x18] sm:$0xff] }
0x1fcd   :  { %2470 = vrot.lane.b32.xlu1 %v5896_v27, %s5099_s4 }
0x1fce   :  { %v4696_v55 = vpop.eup %4695 }
0x1fcf   :  { %2459 = vrot.lane.b32.xlu0 %v4696_v55, %s5101_s0  ;;  %v4550_v55 = vpack.c.bf16 %v3047_v0, %v3046_v51 }
0x1fd1   :  { %2479 = vrot.lane.b32.xlu1 %v5917_v18, %s5099_s4 }
0x1fd3   :  { %2511 = vrot.lane.b32.xlu0 %v5995_v35, %s5099_s4 }
0x1fd5   :  { %2488 = vrot.lane.b32.xlu1 %v5937_v8, %s5099_s4 }
0x1fd7   :  { %2483 = vrot.lane.b32.xlu0 %v5937_v8, %s5101_s0  ;;  %v2465_v8 = vmul.f32 %v4694_v48, %v2463_v59  ;;  %v6115_v48 = vpack.c.bf16 %v3045_v57, %v3044_v26 }
0x1fd9   :  { %2497 = vrot.lane.b32.xlu1 %v5957_v56, %s5099_s4 }
0x1fdd   :  { %2503 = vrot.lane.b32.xlu1 %v5975_v42, %s5099_s4 }
0x1fe1   :  { %2519 = vrot.lane.b32.xlu1 %v2363_v60, %s5099_s4 }
0x1fe5   :  { %2474 = vrot.lane.b32.xlu1 %v5917_v18, %s5101_s0 }
0x1fe9   :  { %2492 = vrot.lane.b32.xlu1 %v5957_v56, %s5101_s0 }
0x1fed   :  { %2515 = vrot.lane.b32.xlu1 %v2363_v60, %s5101_s0 }
0x2041   :  { %v2460_v27 = vpop.permute.xlu0 %2459 }
0x2042   :  { %v2462_v36 = vmul.f32 %v2460_v27, %v2457_v49 }
0x2044   :  { %v2466_v5 = vadd.f32 %v2465_v8, %v2462_v36 }
0x2045   :  { %v2512_v42 = vpop.permute.xlu0 %2511 }
0x2046   :  { %2514 = vst.msk [vmem:[#allocation7 + $0x2] sm:$0xc] %vm2477_vm10, %v2512_v42  ;;  %2528 = vrot.lane.b32.xlu0 %v2466_v5, %s5099_s4 }
0x2049   :  { %v3090_v18 = vpop.xlane.xlu1 %3089  ;;  %v2484_v56 = vpop.permute.xlu0 %2483 }
0x204a   :  { %2487 = vst.msk [vmem:[#allocation6] sm:$0x30] %vm2486_vm12, %v2484_v56  ;;  %2507 = vrot.lane.b32.xlu0 %v5995_v35, %s5101_s0  ;;  %4697 = vrcp.f32 %v3090_v18 }
0x204d   :  { %v2471_v7 = vpop.permute.xlu1 %2470 }
0x204e   :  { %2473 = vst.msk [vmem:[#allocation7 + $0xe] sm:$0x3] %vm2468_vm7, %v2471_v7  ;;  %2524 = vrot.lane.b32.xlu0 %v2466_v5, %s5101_s0 }
0x2051   :  { %v2480_v12 = vpop.permute.xlu1 %2479 }
0x2052   :  { %2482 = vst.msk [vmem:[#allocation7 + $0xa] sm:$0xc] %vm2477_vm10, %v2480_v12 }
0x2054   :  { %v4698_v41 = vpop.eup %4697 }
0x2055   :  { %v2489_v3 = vpop.permute.xlu1 %2488  ;;  %v3092_v37 = vmul.f32 %v4698_v41, %v6023_v52 }
0x2056   :  { %2491 = vst.msk [vmem:[#allocation7 + $0x6] sm:$0x30] %vm2486_vm12, %v2489_v3 }
0x2059   :  { %v2498_v13 = vpop.permute.xlu1 %2497 }
0x205a   :  { %2500 = vst.msk [vmem:[#allocation7 + $0x2] sm:$0xc0] %vm2495_vm13, %v2498_v13 }
0x205d   :  { %v2504_v16 = vpop.permute.xlu1 %2503 }
0x205e   :  { %2506 = vst.msk [vmem:[#allocation7 + $0x6] sm:$0x3] %vm2468_vm7, %v2504_v16 }
0x2061   :  { %v2520_v17 = vpop.permute.xlu1 %2519  ;;  %v2794_v31 = vld [vmem:[#allocation7 + $0x8] sm:$0xff] }
0x2062   :  { %2522 = vst.msk [vmem:[#allocation7 - $0x2] sm:$0x30] %vm2486_vm12, %v2520_v17 }
0x2065   :  { %v2475_v35 = vpop.permute.xlu1 %2474 }
0x2066   :  { %2478 = vst.msk [vmem:[#allocation6] sm:$0xc] %vm2477_vm10, %v2475_v35 }
0x2069   :  { %v2493_v19 = vpop.permute.xlu1 %2492 }
0x206a   :  { %2496 = vst.msk [vmem:[#allocation6] sm:$0xc0] %vm2495_vm13, %v2493_v19 }
0x206c   :  { %3481 = vxpose.xlu0.b32.start.end [1/1] (short) (narrow) %v6017_v62, 8  ;;  %v5103_v62 = vmov 0.0|0.0  }
0x206d   :  { %v2516_v20 = vpop.permute.xlu1 %2515 }
0x206e   :  { %2518 = vst.msk [vmem:[#allocation6 + $0x8] sm:$0x30] %vm2486_vm12, %v2516_v20 }
0x2071   :  { %v2709_v58 = vld [vmem:[#allocation6] sm:$0xff] }
0x20b8   :  { %v2529_v23 = vpop.permute.xlu0 %2528 }
0x20b9   :  { %2531 = vst.msk [vmem:[#allocation7 - $0x6] sm:$0xc0] %vm2495_vm13, %v2529_v23 }
0x20bc   :  { %v2508_v38 = vpop.permute.xlu0 %2507 }
0x20bd   :  { %2510 = vst.msk [vmem:[#allocation6 + $0x8] sm:$0xc] %vm2477_vm10, %v2508_v38 }
0x20c0   :  { %v2525_v4 = vpop.permute.xlu0 %2524  ;;  %v2793_v25 = vld [vmem:[#allocation7] sm:$0xff] }
0x20c1   :  { %2527 = vst.msk [vmem:[#allocation6 + $0x8] sm:$0xc0] %vm2495_vm13, %v2525_v4  ;;  %v4520_v28 = vpack.c.bf16 %v2794_v31, %v2793_v25 }
0x20c3   :  { %4521 = vmatprep.subr.bf16.mxu1 %v4520_v28 }
0x20c4   :  { %4523 = vmatpush3.bf16.msra.mxu1 %v4520_v28  ;;  %v3048_v28 = vld [vmem:[%s6188_s19] sm:$0x3f] }
0x20c5   :  { %4132 = vmatprep.subr.mxu1 %v5100_v21 }
0x20c7   :  { %4108 = vmatmul.mubr.msk.f32.vlgmr.msra.gmra.mrb[22].mxu1 %vm2711_vm11, %v2708_v30 }
0x20c8   :  { %4133 = vmatpush3.msra.mxu1 %v5999_v45  ;;  %4134 = vmatprep.mubr.msk.f32.mxu1 %vm5102_vm14, %v5100_v21  ;;  %v2710_v33 = vld [vmem:[#allocation6 + $0x8] sm:$0xff]  ;;  %v4528_v45 = vpack.c.bf16 %v2877_v6, %v2876_v54 }
0x20c9   :  { %v4516_v60 = vpack.c.bf16 %v2710_v33, %v2709_v58  ;;  %4540 = vmatprep.subr.bf16.mxu1 %v5103_v62 }
0x20cb   :  { %4517 = vmatprep.subr.bf16.mxu0 %v4516_v60  ;;  %4135 = vmatmul.mubr.msk.f32.vlgmr.msra.gmra.mrb[24].mxu1 %vm3093_vm15, %v3092_v37 }
0x20cc   :  { %4519 = vmatpush3.bf16.msra.mxu0 %v4516_v60  ;;  %4542 = vmatpush3.bf16.msra.mxu1 %v6082_v29 }
0x20cd   :  { %4525 = vmatprep.subr.bf16.mxu0 %v4524_v43  ;;  %4543 = vmatprep.subr.bf16.mxu1 %v5103_v62 }
0x20ce   :  { %4145 = vmatprep.mubr.msk.f32.mxu1 %vm5102_vm14, %v5100_v21 }
0x20cf   :  { %4101 = vmatmul.mubr.msk.f32.vlgmr.msra.gmra.mrb[22].mxu0 %vm2711_vm11, %v2708_v30 }
0x20d0   :  { %4527 = vmatpush3.bf16.msra.mxu0 %v4524_v43  ;;  %4545 = vmatpush3.bf16.msra.mxu1 %v4544_v46 }
0x20d1   :  { %4529 = vmatprep.subr.bf16.mxu0 %v4528_v45  ;;  %4546 = vmatprep.subr.bf16.mxu1 %v5103_v62 }
0x20d4   :  { %4531 = vmatpush3.bf16.msra.mxu0 %v4528_v45 }
0x20d5   :  { %4533 = vmatprep.subr.bf16.mxu0 %v4532_v22 }
0x20ec   :  { %v3497_v7 = vpop.trf.xlu0 }
0x20ed   :  { %v3513_v12 = vsel %vm3081_vm9, %v3497_v7, -inf }
0x219a   :  { %v4109_v32 = vpop.f32.mrb[22].mxu1 }
0x219b   :  { %v2861_v44 = vpop.f32.mrb[23].mxu1 }
0x219c   :  { %4118 = vmatprep.mubr.msk.f32.mxu0 %vm2538_vm8, %v2861_v44 }
0x219d   :  { %4119 = vmatmul.mubr.msk.f32.vlgmr.msra.gmra.mrb[24].mxu0 %vm2538_vm8, %v4109_v32 }
0x219e   :  { %4535 = vmatpush3.bf16.msra.mxu0 %v4532_v22  ;;  %v3163_v9 = vpop.f32.mrb[24].mxu1 }
0x219f   :  { %v4136_v40 = vpop.f32.mrb[25].mxu1  ;;  %4146 = vmatmul.mubr.msk.f32.vlgmr.msra.gmra.mrb[26].mxu1 %vm2538_vm8, %v3163_v9  ;;  %4537 = vmatprep.subr.bf16.mxu0 %v4536_v39 }
0x21a0   :  { %4156 = vmatprep.mubr.msk.f32.mxu1 %vm5102_vm14, %v5100_v21  ;;  %4548 = vmatpush3.bf16.msra.mxu1 %v6115_v48 }
0x21a1   :  { %4549 = vmatprep.subr.bf16.mxu1 %v5103_v62 }
0x21a2   :  { %v4102_v52 = vpop.f32.mrb[22].mxu0  ;;  %4539 = vmatpush3.bf16.msra.mxu0 %v4536_v39 }
0x21a3   :  { %v2784_v15 = vpop.f32.mrb[23].mxu0  ;;  %4159 = vmatprep.subr.mxu0 %v5100_v21 }
0x21a4   :  { %4129 = vmatprep.mubr.msk.f32.mxu0 %vm2538_vm8, %v2784_v15  ;;  %4551 = vmatpush3.bf16.msra.mxu1 %v4550_v55 }
0x21a5   :  { %4130 = vmatmul.mubr.msk.f32.vlgmr.msra.gmra.mrb[24].mxu0 %vm2538_vm8, %v4102_v52  ;;  %4552 = vmatprep.subr.bf16.mxu1 %v5103_v62 }
0x21a6   :  { %4161 = vmatprep.mubr.msk.f32.mxu0 %vm5102_vm14, %v5100_v21  ;;  %4160 = vmatpush3.msk.msra.mxu0 %vm3361_vm2, %v3048_v28 }
0x21a7   :  { %4164 = vmatprep.subr.mxu0 %v5100_v21 }
0x2272   :  { %v3236_v49 = vpop.f32.mrb[26].mxu1 }
0x2273   :  { %v4147_v59 = vpop.f32.mrb[27].mxu1 }
0x2278   :  { %v4131_v27 = vpop.f32.mrb[24].mxu0 }
0x2279   :  { %v3601_v8 = vrot.slane %v4131_v27, 6  ;;  %v3031_v36 = vpop.f32.mrb[25].mxu0 }
0x227a   :  { %v3237_v5 = vadd.f32 %v3236_v49, %v3031_v36  ;;  %v3600_v10 = vrot.slane %v3031_v36, 6 }
0x227c   :  { %4157 = vmatmul.mubr.msk.f32.vlgmr.msra.gmra.mrb[28].mxu1 %vm2538_vm8, %v3237_v5  ;;  %v3602_v42 = vsel %vm3599_vm0, %v3600_v10, %v3601_v8 }
0x227d   :  { %4554 = vmatpush3.bf16.msra.mxu1 %v6082_v29  ;;  %4177 = vmatprep.mubr.msk.f32.mxu1 %vm5102_vm14, %v5100_v21 }
0x227e   :  { %4555 = vmatprep.subr.bf16.mxu1 %v5103_v62 }
0x2281   :  { %4557 = vmatpush3.bf16.msra.mxu1 %v4544_v46 }
0x2282   :  { %4191 = vmatprep.subr.mxu1 %v5100_v21 }
0x234f   :  { %v3309_v18 = vpop.f32.mrb[28].mxu1 }
0x2350   :  { %3313 = vxpose.xlu1.b32.start.end [1/1] (short) (narrow) %v3309_v18, 8  ;;  %v4158_v56 = vpop.f32.mrb[29].mxu1 }
0x2377   :  { %3514 = vmax.xlane.f32.xlu1 %v3513_v12 }
0x23d0   :  { %v3329_v3 = vpop.trf.xlu1 }
0x23d1   :  { %v3346_v13 = vsel %vm3345_vm1, %v3329_v3, -inf }
0x23d2   :  { %3347 = vmax.xlane.f32.xlu0 %v3346_v13 }
0x2404   :  { %v3515_v16 = vpop.xlane.xlu1 %3514 }
0x2405   :  { %v3516_v17 = vsub.f32 %v3497_v7, %v3515_v16 }
0x2407   :  { %v3517_v35 = vmul.f32 1.442695, %v3516_v17 }
0x2409   :  { %4699 = vpow2.f32 %v3517_v35 }
0x2413   :  { %v4700_v19 = vpop.eup %4699 }
0x2414   :  { %v3519_v20 = vsel %vm3081_vm9, %v4700_v19, 0.0 }
0x2415   :  { %3520 = vadd.xlane.f32.xlu1 %v3519_v20 }
0x245f   :  { %v3348_v23 = vpop.xlane.xlu0 %3347 }
0x2460   :  { %v3349_v38 = vsub.f32 %v3329_v3, %v3348_v23 }
0x2462   :  { %v3350_v4 = vmul.f32 1.442695, %v3349_v38 }
0x2464   :  { %4701 = vpow2.f32 %v3350_v4 }
0x246e   :  { %v4702_v25 = vpop.eup %4701 }
0x246f   :  { %v3352_v31 = vsel %vm3345_vm1, %v4702_v25, 0.0 }
0x2470   :  { %3353 = vadd.xlane.f32.xlu0 %v3352_v31 }
0x24a2   :  { %v3521_v30 = vpop.xlane.xlu1 %3520 }
0x24fd   :  { %v3354_v34 = vpop.xlane.xlu0 %3353 }
0x24fe   :  { %4703 = vrcp.f32 %v3354_v34 }
0x24ff   :  { %4705 = vrcp.f32 %v3521_v30 }
0x2508   :  { %v4704_v53 = vpop.eup %4703 }
0x2509   :  { %v3356_v41 = vmul.f32 %v4704_v53, %v4702_v25  ;;  %v4706_v47 = vpop.eup %4705 }
0x250a   :  { %v3523_v50 = vmul.f32 %v4706_v47, %v4700_v19 }
0x250b   :  { %4162 = vmatmul.mubr.msk.f32.vlgmr.msra.gmra.mrb[26].mxu0 %vm3357_vm3, %v3356_v41 }
0x250c   :  { %4165 = vmatpush3.msra.mxu0 %v6004_v24  ;;  %4166 = vmatprep.mubr.msk.f32.mxu0 %vm5102_vm14, %v5100_v21 }
0x250d   :  { %4558 = vmatprep.subr.bf16.mxu0 %v5103_v62 }
0x250f   :  { %4167 = vmatmul.mubr.msk.f32.vlgmr.msra.gmra.mrb[28].mxu0 %vm3093_vm15, %v3523_v50 }
0x2510   :  { %4560 = vmatpush3.bf16.msra.mxu0 %v6115_v48  ;;  %4188 = vmatprep.mubr.msk.f32.mxu0 %vm5102_vm14, %v5100_v21 }
0x2511   :  { %4561 = vmatprep.subr.bf16.mxu0 %v5103_v62 }
0x2514   :  { %4563 = vmatpush3.bf16.msra.mxu0 %v4550_v55 }
0x25de   :  { %v3431_v58 = vpop.f32.mrb[26].mxu0 }
0x25df   :  { %v4163_v33 = vpop.f32.mrb[27].mxu0 }
0x25e2   :  { %v3593_v29 = vpop.f32.mrb[28].mxu0 }
0x25e3   :  { %v4168_v24 = vpop.f32.mrb[29].mxu0  ;;  %4178 = vmatmul.mubr.msk.f32.vlgmr.msra.gmra.mrb[30].mxu1 %vm2538_vm8, %v3593_v29 }
0x25e4   :  { %4192 = vmatpush3.msk.msra.mxu1 %vm3361_vm2, %v3048_v28  ;;  %4193 = vmatprep.mubr.msk.f32.mxu1 %vm5102_vm14, %v5100_v21  ;;  %v3436_v21 = vsel %vm3435_vm4, %v3431_v58, -inf }
0x26b6   :  { %v3673_v37 = vpop.f32.mrb[30].mxu1 }
0x26b7   :  { %v3674_v60 = vadd.f32 %v3673_v37, %v3602_v42  ;;  %v4179_v43 = vpop.f32.mrb[31].mxu1 }
0x26b9   :  { %4189 = vmatmul.mubr.msk.f32.vlgmr.msra.gmra.mrb[30].mxu0 %vm2538_vm8, %v3674_v60 }
0x278c   :  { %v3746_v54 = vpop.f32.mrb[30].mxu0 }
0x278d   :  { %3750 = vxpose.xlu0.b32.start.end [1/1] (short) (narrow) %v3746_v54, 8  ;;  %v4190_v62 = vpop.f32.mrb[31].mxu0 }
0x280d   :  { %v3766_v6 = vpop.trf.xlu0 }
0x280e   :  { %v3782_v45 = vsel %vm3345_vm1, %v3766_v6, -inf }
0x280f   :  { %3783 = vmax.xlane.f32.xlu1 %v3782_v45 }
0x289c   :  { %v3784_v61 = vpop.xlane.xlu1 %3783 }
0x289d   :  { %v3785_v2 = vsub.f32 %v3766_v6, %v3784_v61 }
0x289f   :  { %v3786_v46 = vmul.f32 1.442695, %v3785_v2 }
0x28a1   :  { %4707 = vpow2.f32 %v3786_v46 }
0x28ab   :  { %v4708_v63 = vpop.eup %4707 }
0x28ac   :  { %v3788_v11 = vsel %vm3345_vm1, %v4708_v63, 0.0 }
0x28ad   :  { %3789 = vadd.xlane.f32.xlu1 %v3788_v11 }
0x28b1   :  { %3437 = vmax.xlane.f32.xlu1 %v3436_v21 }
0x293a   :  { %v3790_v22 = vpop.xlane.xlu1 %3789 }
0x293b   :  { %4709 = vrcp.f32 %v3790_v22 }
0x293e   :  { %v3438_v32 = vpop.xlane.xlu1 %3437 }
0x293f   :  { %v3439_v44 = vsub.f32 %v3431_v58, %v3438_v32 }
0x2941   :  { %v3440_v39 = vmul.f32 1.442695, %v3439_v44 }
0x2943   :  { %4711 = vpow2.f32 %v3440_v39 }
0x2945   :  { %v4710_v14 = vpop.eup %4709 }
0x2946   :  { %v3792_v1 = vmul.f32 %v4710_v14, %v4708_v63 }
0x2948   :  { %4194 = vmatmul.mubr.msk.f32.vlgmr.msra.gmra.mrb[32].mxu1 %vm3357_vm3, %v3792_v1 }
0x294d   :  { %v4712_v15 = vpop.eup %4711 }
0x294e   :  { %v3442_v26 = vsel %vm3435_vm4, %v4712_v15, 0.0 }
0x2a1b   :  { %v3862_v9 = vpop.f32.mrb[32].mxu1 }
0x2a1c   :  { %v4195_v40 = vpop.f32.mrb[33].mxu1  ;;  %v3866_v52 = vsel %vm3435_vm4, %v3862_v9, -inf }
0x2a1d   :  { %3867 = vmax.xlane.f32.xlu1 %v3866_v52 }
0x2a21   :  { %3443 = vadd.xlane.f32.xlu1 %v3442_v26 }
0x2aaa   :  { %v3868_v57 = vpop.xlane.xlu1 %3867 }
0x2aab   :  { %v3869_v48 = vsub.f32 %v3862_v9, %v3868_v57 }
0x2aad   :  { %v3870_v51 = vmul.f32 1.442695, %v3869_v48 }
0x2aae   :  { %v3444_v49 = vpop.xlane.xlu1 %3443 }
0x2aaf   :  { %4713 = vpow2.f32 %v3870_v51 }
0x2ab0   :  { %4715 = vrcp.f32 %v3444_v49 }
0x2ab9   :  { %v4714_v0 = vpop.eup %4713 }
0x2aba   :  { %v3872_v55 = vsel %vm3435_vm4, %v4714_v0, 0.0  ;;  %v4716_v59 = vpop.eup %4715 }
0x2abb   :  { %3873 = vadd.xlane.f32.xlu1 %v3872_v55  ;;  %v3446_v27 = vmul.f32 %v4716_v59, %v4712_v15 }
0x2aee   :  { %3447 = vxpose.xlu1.b32.start.end [1/1] (short) (narrow) %v3446_v27, 8 }
0x2b48   :  { %v3874_v8 = vpop.xlane.xlu1 %3873 }
0x2b49   :  { %4717 = vrcp.f32 %v3874_v8 }
0x2b53   :  { %v4718_v36 = vpop.eup %4717 }
0x2b54   :  { %v3876_v5 = vmul.f32 %v4718_v36, %v4714_v0 }
0x2b56   :  { %3877 = vxpose.xlu0.b32.start.end [1/1] (short) (narrow) %v3876_v5, 8 }
0x2b6e   :  { %v3463_v10 = vpop.trf.xlu1 }
0x2b6f   :  { %3480 = vst.msk [vmem:[%s6208_s10] sm:$0x7] %vm3479_vm5, %v3463_v10 }
0x2bd6   :  { %v3893_v42 = vpop.trf.xlu0 }
0x2bd7   :  { %4013 = vst.msk [vmem:[%s6208_s10 + $0x4] sm:$0x7] %vm3479_vm5, %v3893_v42 }
0x2bd8   :  { %3915 = vsyncpa [#allocation11], 1 }
0x2bd9   :  { %3916 = vsyncpa [#allocation13], 1 }
0x2bda   :  { %3917 = vsyncpa [#allocation16], 1 }
0x2bdb   :  { %3918 = vsyncpa [#allocation19], 1 }
0x2bdc   :  { %3919 = vsyncpa [#allocation22], 1 }
0x2bdd   :  { %3920 = vsyncpa [#allocation25], 1 }
0x2bde   :  { %3921 = vsyncpa [#allocation28], 1 }
0x2bdf   :  { %3922 = vsyncpa [#allocation31], 1 }

</bundles_post_ra>
